<compile_context>
chip_gen: v6e
topology: v6e:2x2x1
jax: 0.10.0
libtpu: 0.0.40
codegen_flags: <defaults>
</compile_context>

<pallas_src>
import numpy as np
import jax
import jax.numpy as jnp
from jax import lax
from jax.experimental import pallas as pl
from jax.experimental.pallas import tpu as pltpu

DIM = 2                       # LEQL(dim=2)
D = 2 * DIM                   # network input width (q ++ qd) = 4
THETA = 0.5                   # DivUnit theta at its construction default
STRUCT = np.array([[2, 2, 2, 2],
                   [2, 2, 2, 2]], dtype=np.int64)     # (n_id, n_sin, n_cos, n_mult)
A, NB, NC, E = (int(v) for v in STRUCT[0])            # 2, 2, 2, 2 (layers identical)
N_LIN = NB + NC + 2 * E       # linear output width with id-feeding columns pruned (8)
N_TRIG = NB + NC              # trig rows (4)
W_HID = NB + NC + E           # hidden output width (constant-ones block folded) (6)
N_OUT = DIM + 2               # output rows: qdd0, qdd1, lg, y2

# column layout of the packed (8, 128) parameter slab
C_W1, C_B1, C_W2, C_B2, C_WO, C_BO = 0, 4, 8, 16, 24, 32


def _leql_kernel(x_ref, p_ref, out_ref):
    f32 = jnp.float32
    TB = x_ref.shape[1]
    x = x_ref[...].astype(f32)                      # (4, TB): rows [q0, q1, qd0, qd1]
    P = p_ref[...]                                  # (8, 128) packed parameter slab

    W1 = P[:, C_W1:C_W1 + D]                        # (8, 4)  layer-1 weight (out, in)
    b1 = P[:, C_B1:C_B1 + 1]                        # (8, 1)
    W2 = P[:, C_W2:C_W2 + N_LIN]                    # (8, 8)  layer-2 weight (out, in incl ones)
    b2 = P[:, C_B2:C_B2 + 1]                        # (8, 1)
    Wo = P[0:2, C_WO:C_WO + N_LIN]                  # (2, 8)  DivUnit weight
    bo = P[0:2, C_BO:C_BO + 1]                      # (2, 1)

    # apply_hidden_ops leaves its first block as constant ONES -> fold those
    # input columns of the following linear into its bias.
    b2e = b2 + W2[:, 0:1] + W2[:, 1:2]
    W2e = W2[:, A:]                                 # (8, 6)
    boe = bo + Wo[:, 0:1] + Wo[:, 1:2]
    Woe = Wo[:, A:]                                 # (2, 6)

    sin_m = lax.broadcasted_iota(jnp.int32, (N_TRIG, TB), 0) < NB   # rows 0-1 sin, 2-3 cos

    def mac(W, rows, bias=None):
        """VPU broadcast MAC (no MXU): (Nout, TB) = sum_k W[:, k] * rows[k] (+ bias)."""
        acc = W[:, 0:1] * rows[0]
        for k in range(1, len(rows)):
            acc = acc + W[:, k:k + 1] * rows[k]
        return acc if bias is None else acc + bias

    def rows6(trig, mult):
        """The 6 hidden rows [sin, sin, cos, cos, mult, mult] as (1, .) slices."""
        return [trig[0:1], trig[1:2], trig[2:3], trig[3:4], mult[0:1], mult[1:2]]

    # ---------------- layer 1 ------------------------------------------------
    z1 = mac(W1, [x[k:k + 1] for k in range(D)], b1)          # (8, TB)
    T1, MA1, MB1 = z1[:N_TRIG], z1[N_TRIG:N_TRIG + E], z1[N_TRIG + E:]
    sT1, cT1 = jnp.sin(T1), jnp.cos(T1)
    f1 = jnp.where(sin_m, sT1, cT1)                           # trig block values
    fp1 = jnp.where(sin_m, cT1, -sT1)                         # 1st deriv (2nd deriv = -f1)
    m1 = MA1 * MB1                                            # mult block values

    # dz1/dx_p = W1[:, p]   (constant across the batch lanes; incoming Hessian = 0)
    t1J = [W1[:N_TRIG, p:p + 1] for p in range(D)]            # (4, 1)
    a1J = [W1[N_TRIG:N_TRIG + E, p:p + 1] for p in range(D)]  # (2, 1)
    b1J = [W1[N_TRIG + E:, p:p + 1] for p in range(D)]        # (2, 1)
    s1Jt = [fp1 * t1J[p] for p in range(D)]                   # (4, TB)
    s1Jm = [MB1 * a1J[p] + MA1 * b1J[p] for p in range(D)]    # (2, TB)

    # ---------------- layer 2 ------------------------------------------------
    z2 = mac(W2e, rows6(f1, m1), b2e)                         # (8, TB)
    T2, MA2, MB2 = z2[:N_TRIG], z2[N_TRIG:N_TRIG + E], z2[N_TRIG + E:]
    sT2, cT2 = jnp.sin(T2), jnp.cos(T2)
    f2 = jnp.where(sin_m, sT2, cT2)
    fp2 = jnp.where(sin_m, cT2, -sT2)
    m2 = MA2 * MB2

    z2J = [mac(W2e, rows6(s1Jt[p], s1Jm[p])) for p in range(D)]
    t2J = [z[:N_TRIG] for z in z2J]
    a2J = [z[N_TRIG:N_TRIG + E] for z in z2J]
    b2J = [z[N_TRIG + E:] for z in z2J]
    s2Jt = [fp2 * t2J[p] for p in range(D)]
    s2Jm = [MB2 * a2J[p] + MA2 * b2J[p] for p in range(D)]

    # ---------------- DivUnit -------------------------------------------------
    Y = mac(Woe, rows6(f2, m2), boe)                          # (2, TB)
    YJ = [mac(Woe, rows6(s2Jt[p], s2Jm[p])) for p in range(D)]
    y1, y2 = Y[0:1], Y[1:2]
    maskb = y2 > THETA
    mask = maskb.astype(f32)
    # Same masked value as the reference wherever the mask is on, but no NaN when
    # the mask is off and y2 ~ 0 (reference can produce 0 * inf there).
    g = 1.0 / jnp.where(maskb, y2, 1.0)                       # exact division
    g2 = g * g
    g3 = g2 * g
    J1 = [YJ[p][0:1] for p in range(D)]
    J2 = [YJ[p][1:2] for p in range(D)]

    lg = mask * y1 * g

    def dlg(p):
        return mask * (J1[p] * g - y1 * J2[p] * g2)

    jc0, jc1 = dlg(0), dlg(1)                                 # d lg / d q

    def d2lg(p, q):
        """d^2 lg / dx_p dx_q — fully lazy chain, one Hessian channel at a time."""
        s1Ht = f1 * (-(t1J[p] * t1J[q]))                      # (4, TB) trig rows
        s1Hm = a1J[p] * b1J[q] + b1J[p] * a1J[q]              # (2, 1) constant over batch
        z2H = mac(W2e, rows6(s1Ht, s1Hm))                     # (8, TB)
        t2H = z2H[:N_TRIG]
        a2H = z2H[N_TRIG:N_TRIG + E]
        b2H = z2H[N_TRIG + E:]
        s2Ht = fp2 * t2H - f2 * (t2J[p] * t2J[q])
        s2Hm = MB2 * a2H + MA2 * b2H + a2J[p] * b2J[q] + b2J[p] * a2J[q]
        YH = mac(Woe, rows6(s2Ht, s2Hm))                      # (2, TB)
        H1, H2 = YH[0:1], YH[1:2]
        return mask * (H1 * g
                       - (J1[p] * J2[q] + J1[q] * J2[p]) * g2
                       - y1 * H2 * g2
                       + 2.0 * y1 * J2[p] * J2[q] * g3)

    h1_00, h1_01, h1_11 = d2lg(2, 2), d2lg(2, 3), d2lg(3, 3)  # d2 lg / dqd dqd (symmetric)
    h2_00, h2_01 = d2lg(0, 2), d2lg(0, 3)                     # d2 lg / dq dqd
    h2_10, h2_11 = d2lg(1, 2), d2lg(1, 3)

    # qdd = (hmat1 + 1e-3 I)^-1 (jcob - hmat2 @ q), closed-form 2x2 inverse.
    q0, q1 = x[0:1], x[1:2]
    r0 = jc0 - (h2_00 * q0 + h2_01 * q1)
    r1 = jc1 - (h2_10 * q0 + h2_11 * q1)
    m00 = h1_00 + 0.001
    m11 = h1_11 + 0.001
    m01 = h1_01
    det = m00 * m11 - m01 * m01
    inv_det = 1.0 / det                                       # exact (det may be tiny)
    qdd0 = (m11 * r0 - m01 * r1) * inv_det
    qdd1 = (m00 * r1 - m01 * r0) * inv_det

    # lane-dense output slab: rows [qdd0, qdd1, lg, y2]
    out_ref[0:1, :] = qdd0
    out_ref[1:2, :] = qdd1
    out_ref[2:3, :] = lg
    out_ref[3:4, :] = y2


def _round_up(n, m):
    return ((n + m - 1) // m) * m


def pack_params(params):
    """Pack all LEQL parameters into one (8, 128) f32 slab (a single DMA)."""
    (w1, b1), (w2, b2), (wo, bo) = params
    P = jnp.zeros((8, 128), jnp.float32)
    P = P.at[:, C_W1:C_W1 + D].set(w1[A:, :].astype(jnp.float32))     # drop id-feeding rows
    P = P.at[:, C_B1].set(b1[A:].astype(jnp.float32))
    P = P.at[:, C_W2:C_W2 + N_LIN].set(w2[A:, :].astype(jnp.float32))
    P = P.at[:, C_B2].set(b2[A:].astype(jnp.float32))
    P = P.at[0:2, C_WO:C_WO + N_LIN].set(wo.astype(jnp.float32))
    P = P.at[0:2, C_BO].set(bo.astype(jnp.float32))
    return P


def leql_forward(x, params, *, tb=None):
    """Forward pass of LEQL(dim=2, STRUCT): returns (qdd, lg, y2)."""
    B = x.shape[0]
    P = pack_params(params)
    if tb is None:
        # Lane tile (multiple of 128).  ~100 live (<=8, tb) f32 rows -> a few hundred KiB
        # at tb=2048, far under the v7x 64 MiB VMEM and the v5e 16 MiB scoped default,
        # so no vmem_limit_bytes override is needed.  Raise tb for very large batches.
        tb = min(2048, _round_up(max(B, 1), 128))
    Bp = _round_up(max(B, 1), tb)
    # Transpose so batch maps to the 128-lane axis; zero-pad batch to the tile.
    xt = jnp.zeros((D, Bp), jnp.float32).at[:, :B].set(x.astype(jnp.float32).T)

    out = pl.pallas_call(
        _leql_kernel,
        out_shape=jax.ShapeDtypeStruct((N_OUT, Bp), jnp.float32),
        grid=(Bp // tb,),
        in_specs=[
            pl.BlockSpec((D, tb), lambda i: (0, i)),        # x^T, batch on lanes
            pl.BlockSpec((8, 128), lambda i: (0, 0)),       # packed params (not re-fetched)
        ],
        out_specs=pl.BlockSpec((N_OUT, tb), lambda i: (0, i)),
        compiler_params=pltpu.CompilerParams(
            dimension_semantics=("parallel",)),
    )(xt, P)

    qdd = out[0:DIM, :B].T
    lg = out[DIM:DIM + 1, :B].T
    y2 = out[DIM + 1:N_OUT, :B].T
    return qdd, lg, y2


def init_params(key):
    """Deterministic synthetic parameters matching LEQL(dim=2, STRUCT)."""
    k1, k2, k3 = jax.random.split(key, 3)
    f0 = 2 * DIM
    o1 = int(np.sum(STRUCT[0, :-1]) + 2 * STRUCT[0, -1])
    f1 = int(np.sum(STRUCT[0, :]))
    o2 = int(np.sum(STRUCT[1, :-1]) + 2 * STRUCT[1, -1])
    w1 = 0.4 * jax.random.normal(k1, (o1, f0), jnp.float32)
    b1 = jnp.full((o1,), 0.1, jnp.float32)
    w2 = 0.4 * jax.random.normal(k2, (o2, f1), jnp.float32)
    b2 = jnp.full((o2,), 0.1, jnp.float32)
    wo = 0.4 * jax.random.normal(k3, (2, int(np.sum(STRUCT[1, :]))), jnp.float32)
    bo = jnp.array([0.1, 1.0], jnp.float32)   # push y2 around theta=0.5
    return (w1, b1), (w2, b2), (wo, bo)


# ----------------------- pure-JAX autodiff reference --------------------------
def _hidden_ref(z):
    s = jnp.sin(z[A:A + NB])
    c = jnp.cos(z[A + NB:A + NB + NC])
    m = z[A + NB + NC:A + NB + NC + E] * z[A + NB + NC + E:]
    return jnp.concatenate([jnp.ones((A,), z.dtype), s, c, m])


def _lg_y2_ref(xv, params, theta=THETA):
    (w1, b1), (w2, b2), (wo, bo) = params
    h = _hidden_ref(w1 @ xv + b1)
    h = _hidden_ref(w2 @ h + b2)
    y = wo @ h + bo
    y1, y2 = y[0], y[1]
    lg = (y2 > theta).astype(jnp.float32) * y1 / y2
    return lg, y2


def leql_reference_pieces(x, params):
    """lg, y2, hmat1 = d2lg/dqd dqd and rhs = dlg/dq - hmat2 @ q (pure JAX autodiff)."""
    def single(xv):
        lg_fn = lambda xx: _lg_y2_ref(xx, params)[0]
        lg, y2 = _lg_y2_ref(xv, params)
        jac = jax.grad(lg_fn)(xv)
        hess = jax.hessian(lg_fn)(xv)
        h1 = hess[DIM:, DIM:]
        h2 = hess[:DIM, DIM:]
        rhs = jac[:DIM] - h2 @ xv[:DIM]
        return lg, y2, h1, rhs
    return jax.vmap(single)(x)


if __name__ == "__main__":
    key = jax.random.PRNGKey(0)
    kx, kp = jax.random.split(key)
    B = 8
    x = jax.random.normal(kx, (B, 2 * DIM), jnp.float32)
    params = init_params(kp)

    qdd, lg, y2 = jax.jit(leql_forward)(x, params)
    jax.block_until_ready((qdd, lg, y2))
    assert qdd.shape == (B, DIM) and lg.shape == (B, 1) and y2.shape == (B, 1)
    assert bool(jnp.all(jnp.isfinite(qdd)))

    # Correctness vs. a pure-JAX autodiff reference of the same module.
    lg_r, y2_r, h1_r, rhs_r = leql_reference_pieces(x, params)
    assert bool(jnp.allclose(lg[:, 0], lg_r, atol=2e-3, rtol=2e-3))
    assert bool(jnp.allclose(y2[:, 0], y2_r, atol=2e-3, rtol=2e-3))
    # qdd must solve the reference linear system (h1 + 1e-3 I) qdd = rhs
    # (residual form: robust even when the 2x2 system is near-singular).
    mat = h1_r + 1e-3 * jnp.eye(DIM, dtype=jnp.float32)[None]
    res = jnp.einsum("bij,bj->bi", mat, qdd) - rhs_r
    scale = (1.0 + jnp.abs(rhs_r)
             + jnp.sum(jnp.abs(mat), axis=-1) * jnp.max(jnp.abs(qdd), -1, keepdims=True))
    assert bool(jnp.all(jnp.abs(res) <= 5e-3 * scale))

    print("KERNEL_OK")
</pallas_src>

<mosaic_0001>
module attributes {stable_mosaic.version = 11 : i64} {
  func.func @_leql_kernel(%arg0: i32, %arg1: memref<4x128xf32, #tpu.memory_space<vmem>>, %arg2: memref<8x128xf32, #tpu.memory_space<vmem>>, %arg3: memref<4x128xf32, #tpu.memory_space<vmem>>) attributes {dimension_semantics = [#tpu.dimension_semantics<parallel>], iteration_bounds = array<i64: 1>, scalar_prefetch = 0 : i64, scratch_operands = 0 : i64, tpu.core_type = #tpu.core_type<tc>, window_params = [{transform_indices = @transform_0, window_bounds = array<i64: 4, 128>}, {pipeline_mode = #tpu.pipeline_mode<synchronous>, transform_indices = @transform_1, window_bounds = array<i64: 8, 128>}, {transform_indices = @transform_2, window_bounds = array<i64: 4, 128>}]} {
    %c0 = arith.constant 0 : index
    %c0_0 = arith.constant 0 : index
    %0 = vector.load %arg1[%c0, %c0_0] : memref<4x128xf32, #tpu.memory_space<vmem>>, vector<4x128xf32>
    %c0_1 = arith.constant 0 : index
    %c0_2 = arith.constant 0 : index
    %1 = vector.load %arg2[%c0_1, %c0_2] : memref<8x128xf32, #tpu.memory_space<vmem>>, vector<8x128xf32>
    %2 = vector.extract_strided_slice %1 {offsets = [0, 0], sizes = [8, 4], strides = [1, 1]} : vector<8x128xf32> to vector<8x4xf32>
    %3 = vector.extract_strided_slice %1 {offsets = [0, 4], sizes = [8, 1], strides = [1, 1]} : vector<8x128xf32> to vector<8x1xf32>
    %4 = vector.extract_strided_slice %1 {offsets = [0, 8], sizes = [8, 8], strides = [1, 1]} : vector<8x128xf32> to vector<8x8xf32>
    %5 = vector.extract_strided_slice %1 {offsets = [0, 16], sizes = [8, 1], strides = [1, 1]} : vector<8x128xf32> to vector<8x1xf32>
    %6 = vector.extract_strided_slice %1 {offsets = [0, 24], sizes = [2, 8], strides = [1, 1]} : vector<8x128xf32> to vector<2x8xf32>
    %7 = vector.extract_strided_slice %1 {offsets = [0, 32], sizes = [2, 1], strides = [1, 1]} : vector<8x128xf32> to vector<2x1xf32>
    %8 = vector.extract_strided_slice %4 {offsets = [0, 0], sizes = [8, 1], strides = [1, 1]} : vector<8x8xf32> to vector<8x1xf32>
    %9 = arith.addf %5, %8 : vector<8x1xf32>
    %10 = vector.extract_strided_slice %4 {offsets = [0, 1], sizes = [8, 1], strides = [1, 1]} : vector<8x8xf32> to vector<8x1xf32>
    %11 = arith.addf %9, %10 : vector<8x1xf32>
    %12 = vector.extract_strided_slice %4 {offsets = [0, 2], sizes = [8, 6], strides = [1, 1]} : vector<8x8xf32> to vector<8x6xf32>
    %13 = vector.extract_strided_slice %6 {offsets = [0, 0], sizes = [2, 1], strides = [1, 1]} : vector<2x8xf32> to vector<2x1xf32>
    %14 = arith.addf %7, %13 : vector<2x1xf32>
    %15 = vector.extract_strided_slice %6 {offsets = [0, 1], sizes = [2, 1], strides = [1, 1]} : vector<2x8xf32> to vector<2x1xf32>
    %16 = arith.addf %14, %15 : vector<2x1xf32>
    %17 = vector.extract_strided_slice %6 {offsets = [0, 2], sizes = [2, 6], strides = [1, 1]} : vector<2x8xf32> to vector<2x6xf32>
    %18 = tpu.iota {dimensions = array<i32: 0>} : vector<4x128xi32>
    %c2_i32 = arith.constant 2 : i32
    %19 = vector.broadcast %c2_i32 : i32 to vector<4x128xi32>
    %20 = arith.cmpi slt, %18, %19 : vector<4x128xi32>
    %21 = vector.extract_strided_slice %0 {offsets = [0, 0], sizes = [1, 128], strides = [1, 1]} : vector<4x128xf32> to vector<1x128xf32>
    %22 = vector.extract_strided_slice %0 {offsets = [1, 0], sizes = [1, 128], strides = [1, 1]} : vector<4x128xf32> to vector<1x128xf32>
    %23 = vector.extract_strided_slice %0 {offsets = [2, 0], sizes = [1, 128], strides = [1, 1]} : vector<4x128xf32> to vector<1x128xf32>
    %24 = vector.extract_strided_slice %0 {offsets = [3, 0], sizes = [1, 128], strides = [1, 1]} : vector<4x128xf32> to vector<1x128xf32>
    %25 = vector.extract_strided_slice %2 {offsets = [0, 0], sizes = [8, 1], strides = [1, 1]} : vector<8x4xf32> to vector<8x1xf32>
    %26 = vector.broadcast %25 : vector<8x1xf32> to vector<8x128xf32>
    %27 = vector.broadcast %21 : vector<1x128xf32> to vector<8x128xf32>
    %28 = arith.mulf %26, %27 : vector<8x128xf32>
    %29 = vector.extract_strided_slice %2 {offsets = [0, 1], sizes = [8, 1], strides = [1, 1]} : vector<8x4xf32> to vector<8x1xf32>
    %30 = vector.broadcast %29 : vector<8x1xf32> to vector<8x128xf32>
    %31 = vector.broadcast %22 : vector<1x128xf32> to vector<8x128xf32>
    %32 = arith.mulf %30, %31 : vector<8x128xf32>
    %33 = arith.addf %28, %32 : vector<8x128xf32>
    %34 = vector.extract_strided_slice %2 {offsets = [0, 2], sizes = [8, 1], strides = [1, 1]} : vector<8x4xf32> to vector<8x1xf32>
    %35 = vector.broadcast %34 : vector<8x1xf32> to vector<8x128xf32>
    %36 = vector.broadcast %23 : vector<1x128xf32> to vector<8x128xf32>
    %37 = arith.mulf %35, %36 : vector<8x128xf32>
    %38 = arith.addf %33, %37 : vector<8x128xf32>
    %39 = vector.extract_strided_slice %2 {offsets = [0, 3], sizes = [8, 1], strides = [1, 1]} : vector<8x4xf32> to vector<8x1xf32>
    %40 = vector.broadcast %39 : vector<8x1xf32> to vector<8x128xf32>
    %41 = vector.broadcast %24 : vector<1x128xf32> to vector<8x128xf32>
    %42 = arith.mulf %40, %41 : vector<8x128xf32>
    %43 = arith.addf %38, %42 : vector<8x128xf32>
    %44 = vector.broadcast %3 : vector<8x1xf32> to vector<8x128xf32>
    %45 = arith.addf %43, %44 : vector<8x128xf32>
    %46 = vector.extract_strided_slice %45 {offsets = [0, 0], sizes = [4, 128], strides = [1, 1]} : vector<8x128xf32> to vector<4x128xf32>
    %47 = vector.extract_strided_slice %45 {offsets = [4, 0], sizes = [2, 128], strides = [1, 1]} : vector<8x128xf32> to vector<2x128xf32>
    %48 = vector.extract_strided_slice %45 {offsets = [6, 0], sizes = [2, 128], strides = [1, 1]} : vector<8x128xf32> to vector<2x128xf32>
    %49 = math.sin %46 : vector<4x128xf32>
    %50 = math.cos %46 : vector<4x128xf32>
    %51 = arith.select %20, %49, %50 : vector<4x128xi1>, vector<4x128xf32>
    %cst = arith.constant 0.000000e+00 : f32
    %52 = vector.broadcast %cst : f32 to vector<4x128xf32>
    %53 = arith.subf %52, %49 : vector<4x128xf32>
    %54 = arith.select %20, %50, %53 : vector<4x128xi1>, vector<4x128xf32>
    %55 = arith.mulf %47, %48 : vector<2x128xf32>
    %56 = vector.extract_strided_slice %2 {offsets = [0, 0], sizes = [4, 1], strides = [1, 1]} : vector<8x4xf32> to vector<4x1xf32>
    %57 = vector.extract_strided_slice %2 {offsets = [0, 1], sizes = [4, 1], strides = [1, 1]} : vector<8x4xf32> to vector<4x1xf32>
    %58 = vector.extract_strided_slice %2 {offsets = [0, 2], sizes = [4, 1], strides = [1, 1]} : vector<8x4xf32> to vector<4x1xf32>
    %59 = vector.extract_strided_slice %2 {offsets = [0, 3], sizes = [4, 1], strides = [1, 1]} : vector<8x4xf32> to vector<4x1xf32>
    %60 = vector.extract_strided_slice %2 {offsets = [4, 0], sizes = [2, 1], strides = [1, 1]} : vector<8x4xf32> to vector<2x1xf32>
    %61 = vector.extract_strided_slice %2 {offsets = [4, 1], sizes = [2, 1], strides = [1, 1]} : vector<8x4xf32> to vector<2x1xf32>
    %62 = vector.extract_strided_slice %2 {offsets = [4, 2], sizes = [2, 1], strides = [1, 1]} : vector<8x4xf32> to vector<2x1xf32>
    %63 = vector.extract_strided_slice %2 {offsets = [4, 3], sizes = [2, 1], strides = [1, 1]} : vector<8x4xf32> to vector<2x1xf32>
    %64 = vector.extract_strided_slice %2 {offsets = [6, 0], sizes = [2, 1], strides = [1, 1]} : vector<8x4xf32> to vector<2x1xf32>
    %65 = vector.extract_strided_slice %2 {offsets = [6, 1], sizes = [2, 1], strides = [1, 1]} : vector<8x4xf32> to vector<2x1xf32>
    %66 = vector.extract_strided_slice %2 {offsets = [6, 2], sizes = [2, 1], strides = [1, 1]} : vector<8x4xf32> to vector<2x1xf32>
    %67 = vector.extract_strided_slice %2 {offsets = [6, 3], sizes = [2, 1], strides = [1, 1]} : vector<8x4xf32> to vector<2x1xf32>
    %68 = vector.broadcast %56 : vector<4x1xf32> to vector<4x128xf32>
    %69 = arith.mulf %54, %68 : vector<4x128xf32>
    %70 = vector.broadcast %57 : vector<4x1xf32> to vector<4x128xf32>
    %71 = arith.mulf %54, %70 : vector<4x128xf32>
    %72 = vector.broadcast %58 : vector<4x1xf32> to vector<4x128xf32>
    %73 = arith.mulf %54, %72 : vector<4x128xf32>
    %74 = vector.broadcast %59 : vector<4x1xf32> to vector<4x128xf32>
    %75 = arith.mulf %54, %74 : vector<4x128xf32>
    %76 = vector.broadcast %60 : vector<2x1xf32> to vector<2x128xf32>
    %77 = arith.mulf %48, %76 : vector<2x128xf32>
    %78 = vector.broadcast %64 : vector<2x1xf32> to vector<2x128xf32>
    %79 = arith.mulf %47, %78 : vector<2x128xf32>
    %80 = arith.addf %77, %79 : vector<2x128xf32>
    %81 = vector.broadcast %61 : vector<2x1xf32> to vector<2x128xf32>
    %82 = arith.mulf %48, %81 : vector<2x128xf32>
    %83 = vector.broadcast %65 : vector<2x1xf32> to vector<2x128xf32>
    %84 = arith.mulf %47, %83 : vector<2x128xf32>
    %85 = arith.addf %82, %84 : vector<2x128xf32>
    %86 = vector.broadcast %62 : vector<2x1xf32> to vector<2x128xf32>
    %87 = arith.mulf %48, %86 : vector<2x128xf32>
    %88 = vector.broadcast %66 : vector<2x1xf32> to vector<2x128xf32>
    %89 = arith.mulf %47, %88 : vector<2x128xf32>
    %90 = arith.addf %87, %89 : vector<2x128xf32>
    %91 = vector.broadcast %63 : vector<2x1xf32> to vector<2x128xf32>
    %92 = arith.mulf %48, %91 : vector<2x128xf32>
    %93 = vector.broadcast %67 : vector<2x1xf32> to vector<2x128xf32>
    %94 = arith.mulf %47, %93 : vector<2x128xf32>
    %95 = arith.addf %92, %94 : vector<2x128xf32>
    %96 = vector.extract_strided_slice %51 {offsets = [0, 0], sizes = [1, 128], strides = [1, 1]} : vector<4x128xf32> to vector<1x128xf32>
    %97 = vector.extract_strided_slice %51 {offsets = [1, 0], sizes = [1, 128], strides = [1, 1]} : vector<4x128xf32> to vector<1x128xf32>
    %98 = vector.extract_strided_slice %51 {offsets = [2, 0], sizes = [1, 128], strides = [1, 1]} : vector<4x128xf32> to vector<1x128xf32>
    %99 = vector.extract_strided_slice %51 {offsets = [3, 0], sizes = [1, 128], strides = [1, 1]} : vector<4x128xf32> to vector<1x128xf32>
    %100 = vector.extract_strided_slice %55 {offsets = [0, 0], sizes = [1, 128], strides = [1, 1]} : vector<2x128xf32> to vector<1x128xf32>
    %101 = vector.extract_strided_slice %55 {offsets = [1, 0], sizes = [1, 128], strides = [1, 1]} : vector<2x128xf32> to vector<1x128xf32>
    %102 = vector.extract_strided_slice %12 {offsets = [0, 0], sizes = [8, 1], strides = [1, 1]} : vector<8x6xf32> to vector<8x1xf32>
    %103 = vector.broadcast %102 : vector<8x1xf32> to vector<8x128xf32>
    %104 = vector.broadcast %96 : vector<1x128xf32> to vector<8x128xf32>
    %105 = arith.mulf %103, %104 : vector<8x128xf32>
    %106 = vector.extract_strided_slice %12 {offsets = [0, 1], sizes = [8, 1], strides = [1, 1]} : vector<8x6xf32> to vector<8x1xf32>
    %107 = vector.broadcast %106 : vector<8x1xf32> to vector<8x128xf32>
    %108 = vector.broadcast %97 : vector<1x128xf32> to vector<8x128xf32>
    %109 = arith.mulf %107, %108 : vector<8x128xf32>
    %110 = arith.addf %105, %109 : vector<8x128xf32>
    %111 = vector.extract_strided_slice %12 {offsets = [0, 2], sizes = [8, 1], strides = [1, 1]} : vector<8x6xf32> to vector<8x1xf32>
    %112 = vector.broadcast %111 : vector<8x1xf32> to vector<8x128xf32>
    %113 = vector.broadcast %98 : vector<1x128xf32> to vector<8x128xf32>
    %114 = arith.mulf %112, %113 : vector<8x128xf32>
    %115 = arith.addf %110, %114 : vector<8x128xf32>
    %116 = vector.extract_strided_slice %12 {offsets = [0, 3], sizes = [8, 1], strides = [1, 1]} : vector<8x6xf32> to vector<8x1xf32>
    %117 = vector.broadcast %116 : vector<8x1xf32> to vector<8x128xf32>
    %118 = vector.broadcast %99 : vector<1x128xf32> to vector<8x128xf32>
    %119 = arith.mulf %117, %118 : vector<8x128xf32>
    %120 = arith.addf %115, %119 : vector<8x128xf32>
    %121 = vector.extract_strided_slice %12 {offsets = [0, 4], sizes = [8, 1], strides = [1, 1]} : vector<8x6xf32> to vector<8x1xf32>
    %122 = vector.broadcast %121 : vector<8x1xf32> to vector<8x128xf32>
    %123 = vector.broadcast %100 : vector<1x128xf32> to vector<8x128xf32>
    %124 = arith.mulf %122, %123 : vector<8x128xf32>
    %125 = arith.addf %120, %124 : vector<8x128xf32>
    %126 = vector.extract_strided_slice %12 {offsets = [0, 5], sizes = [8, 1], strides = [1, 1]} : vector<8x6xf32> to vector<8x1xf32>
    %127 = vector.broadcast %126 : vector<8x1xf32> to vector<8x128xf32>
    %128 = vector.broadcast %101 : vector<1x128xf32> to vector<8x128xf32>
    %129 = arith.mulf %127, %128 : vector<8x128xf32>
    %130 = arith.addf %125, %129 : vector<8x128xf32>
    %131 = vector.broadcast %11 : vector<8x1xf32> to vector<8x128xf32>
    %132 = arith.addf %130, %131 : vector<8x128xf32>
    %133 = vector.extract_strided_slice %132 {offsets = [0, 0], sizes = [4, 128], strides = [1, 1]} : vector<8x128xf32> to vector<4x128xf32>
    %134 = vector.extract_strided_slice %132 {offsets = [4, 0], sizes = [2, 128], strides = [1, 1]} : vector<8x128xf32> to vector<2x128xf32>
    %135 = vector.extract_strided_slice %132 {offsets = [6, 0], sizes = [2, 128], strides = [1, 1]} : vector<8x128xf32> to vector<2x128xf32>
    %136 = math.sin %133 : vector<4x128xf32>
    %137 = math.cos %133 : vector<4x128xf32>
    %138 = arith.select %20, %136, %137 : vector<4x128xi1>, vector<4x128xf32>
    %cst_3 = arith.constant 0.000000e+00 : f32
    %139 = vector.broadcast %cst_3 : f32 to vector<4x128xf32>
    %140 = arith.subf %139, %136 : vector<4x128xf32>
    %141 = arith.select %20, %137, %140 : vector<4x128xi1>, vector<4x128xf32>
    %142 = arith.mulf %134, %135 : vector<2x128xf32>
    %143 = vector.extract_strided_slice %69 {offsets = [0, 0], sizes = [1, 128], strides = [1, 1]} : vector<4x128xf32> to vector<1x128xf32>
    %144 = vector.extract_strided_slice %69 {offsets = [1, 0], sizes = [1, 128], strides = [1, 1]} : vector<4x128xf32> to vector<1x128xf32>
    %145 = vector.extract_strided_slice %69 {offsets = [2, 0], sizes = [1, 128], strides = [1, 1]} : vector<4x128xf32> to vector<1x128xf32>
    %146 = vector.extract_strided_slice %69 {offsets = [3, 0], sizes = [1, 128], strides = [1, 1]} : vector<4x128xf32> to vector<1x128xf32>
    %147 = vector.extract_strided_slice %80 {offsets = [0, 0], sizes = [1, 128], strides = [1, 1]} : vector<2x128xf32> to vector<1x128xf32>
    %148 = vector.extract_strided_slice %80 {offsets = [1, 0], sizes = [1, 128], strides = [1, 1]} : vector<2x128xf32> to vector<1x128xf32>
    %149 = vector.extract_strided_slice %12 {offsets = [0, 0], sizes = [8, 1], strides = [1, 1]} : vector<8x6xf32> to vector<8x1xf32>
    %150 = vector.broadcast %149 : vector<8x1xf32> to vector<8x128xf32>
    %151 = vector.broadcast %143 : vector<1x128xf32> to vector<8x128xf32>
    %152 = arith.mulf %150, %151 : vector<8x128xf32>
    %153 = vector.extract_strided_slice %12 {offsets = [0, 1], sizes = [8, 1], strides = [1, 1]} : vector<8x6xf32> to vector<8x1xf32>
    %154 = vector.broadcast %153 : vector<8x1xf32> to vector<8x128xf32>
    %155 = vector.broadcast %144 : vector<1x128xf32> to vector<8x128xf32>
    %156 = arith.mulf %154, %155 : vector<8x128xf32>
    %157 = arith.addf %152, %156 : vector<8x128xf32>
    %158 = vector.extract_strided_slice %12 {offsets = [0, 2], sizes = [8, 1], strides = [1, 1]} : vector<8x6xf32> to vector<8x1xf32>
    %159 = vector.broadcast %158 : vector<8x1xf32> to vector<8x128xf32>
    %160 = vector.broadcast %145 : vector<1x128xf32> to vector<8x128xf32>
    %161 = arith.mulf %159, %160 : vector<8x128xf32>
    %162 = arith.addf %157, %161 : vector<8x128xf32>
    %163 = vector.extract_strided_slice %12 {offsets = [0, 3], sizes = [8, 1], strides = [1, 1]} : vector<8x6xf32> to vector<8x1xf32>
    %164 = vector.broadcast %163 : vector<8x1xf32> to vector<8x128xf32>
    %165 = vector.broadcast %146 : vector<1x128xf32> to vector<8x128xf32>
    %166 = arith.mulf %164, %165 : vector<8x128xf32>
    %167 = arith.addf %162, %166 : vector<8x128xf32>
    %168 = vector.extract_strided_slice %12 {offsets = [0, 4], sizes = [8, 1], strides = [1, 1]} : vector<8x6xf32> to vector<8x1xf32>
    %169 = vector.broadcast %168 : vector<8x1xf32> to vector<8x128xf32>
    %170 = vector.broadcast %147 : vector<1x128xf32> to vector<8x128xf32>
    %171 = arith.mulf %169, %170 : vector<8x128xf32>
    %172 = arith.addf %167, %171 : vector<8x128xf32>
    %173 = vector.extract_strided_slice %12 {offsets = [0, 5], sizes = [8, 1], strides = [1, 1]} : vector<8x6xf32> to vector<8x1xf32>
    %174 = vector.broadcast %173 : vector<8x1xf32> to vector<8x128xf32>
    %175 = vector.broadcast %148 : vector<1x128xf32> to vector<8x128xf32>
    %176 = arith.mulf %174, %175 : vector<8x128xf32>
    %177 = arith.addf %172, %176 : vector<8x128xf32>
    %178 = vector.extract_strided_slice %71 {offsets = [0, 0], sizes = [1, 128], strides = [1, 1]} : vector<4x128xf32> to vector<1x128xf32>
    %179 = vector.extract_strided_slice %71 {offsets = [1, 0], sizes = [1, 128], strides = [1, 1]} : vector<4x128xf32> to vector<1x128xf32>
    %180 = vector.extract_strided_slice %71 {offsets = [2, 0], sizes = [1, 128], strides = [1, 1]} : vector<4x128xf32> to vector<1x128xf32>
    %181 = vector.extract_strided_slice %71 {offsets = [3, 0], sizes = [1, 128], strides = [1, 1]} : vector<4x128xf32> to vector<1x128xf32>
    %182 = vector.extract_strided_slice %85 {offsets = [0, 0], sizes = [1, 128], strides = [1, 1]} : vector<2x128xf32> to vector<1x128xf32>
    %183 = vector.extract_strided_slice %85 {offsets = [1, 0], sizes = [1, 128], strides = [1, 1]} : vector<2x128xf32> to vector<1x128xf32>
    %184 = vector.extract_strided_slice %12 {offsets = [0, 0], sizes = [8, 1], strides = [1, 1]} : vector<8x6xf32> to vector<8x1xf32>
    %185 = vector.broadcast %184 : vector<8x1xf32> to vector<8x128xf32>
    %186 = vector.broadcast %178 : vector<1x128xf32> to vector<8x128xf32>
    %187 = arith.mulf %185, %186 : vector<8x128xf32>
    %188 = vector.extract_strided_slice %12 {offsets = [0, 1], sizes = [8, 1], strides = [1, 1]} : vector<8x6xf32> to vector<8x1xf32>
    %189 = vector.broadcast %188 : vector<8x1xf32> to vector<8x128xf32>
    %190 = vector.broadcast %179 : vector<1x128xf32> to vector<8x128xf32>
    %191 = arith.mulf %189, %190 : vector<8x128xf32>
    %192 = arith.addf %187, %191 : vector<8x128xf32>
    %193 = vector.extract_strided_slice %12 {offsets = [0, 2], sizes = [8, 1], strides = [1, 1]} : vector<8x6xf32> to vector<8x1xf32>
    %194 = vector.broadcast %193 : vector<8x1xf32> to vector<8x128xf32>
    %195 = vector.broadcast %180 : vector<1x128xf32> to vector<8x128xf32>
    %196 = arith.mulf %194, %195 : vector<8x128xf32>
    %197 = arith.addf %192, %196 : vector<8x128xf32>
    %198 = vector.extract_strided_slice %12 {offsets = [0, 3], sizes = [8, 1], strides = [1, 1]} : vector<8x6xf32> to vector<8x1xf32>
    %199 = vector.broadcast %198 : vector<8x1xf32> to vector<8x128xf32>
    %200 = vector.broadcast %181 : vector<1x128xf32> to vector<8x128xf32>
    %201 = arith.mulf %199, %200 : vector<8x128xf32>
    %202 = arith.addf %197, %201 : vector<8x128xf32>
    %203 = vector.extract_strided_slice %12 {offsets = [0, 4], sizes = [8, 1], strides = [1, 1]} : vector<8x6xf32> to vector<8x1xf32>
    %204 = vector.broadcast %203 : vector<8x1xf32> to vector<8x128xf32>
    %205 = vector.broadcast %182 : vector<1x128xf32> to vector<8x128xf32>
    %206 = arith.mulf %204, %205 : vector<8x128xf32>
    %207 = arith.addf %202, %206 : vector<8x128xf32>
    %208 = vector.extract_strided_slice %12 {offsets = [0, 5], sizes = [8, 1], strides = [1, 1]} : vector<8x6xf32> to vector<8x1xf32>
    %209 = vector.broadcast %208 : vector<8x1xf32> to vector<8x128xf32>
    %210 = vector.broadcast %183 : vector<1x128xf32> to vector<8x128xf32>
    %211 = arith.mulf %209, %210 : vector<8x128xf32>
    %212 = arith.addf %207, %211 : vector<8x128xf32>
    %213 = vector.extract_strided_slice %73 {offsets = [0, 0], sizes = [1, 128], strides = [1, 1]} : vector<4x128xf32> to vector<1x128xf32>
    %214 = vector.extract_strided_slice %73 {offsets = [1, 0], sizes = [1, 128], strides = [1, 1]} : vector<4x128xf32> to vector<1x128xf32>
    %215 = vector.extract_strided_slice %73 {offsets = [2, 0], sizes = [1, 128], strides = [1, 1]} : vector<4x128xf32> to vector<1x128xf32>
    %216 = vector.extract_strided_slice %73 {offsets = [3, 0], sizes = [1, 128], strides = [1, 1]} : vector<4x128xf32> to vector<1x128xf32>
    %217 = vector.extract_strided_slice %90 {offsets = [0, 0], sizes = [1, 128], strides = [1, 1]} : vector<2x128xf32> to vector<1x128xf32>
    %218 = vector.extract_strided_slice %90 {offsets = [1, 0], sizes = [1, 128], strides = [1, 1]} : vector<2x128xf32> to vector<1x128xf32>
    %219 = vector.extract_strided_slice %12 {offsets = [0, 0], sizes = [8, 1], strides = [1, 1]} : vector<8x6xf32> to vector<8x1xf32>
    %220 = vector.broadcast %219 : vector<8x1xf32> to vector<8x128xf32>
    %221 = vector.broadcast %213 : vector<1x128xf32> to vector<8x128xf32>
    %222 = arith.mulf %220, %221 : vector<8x128xf32>
    %223 = vector.extract_strided_slice %12 {offsets = [0, 1], sizes = [8, 1], strides = [1, 1]} : vector<8x6xf32> to vector<8x1xf32>
    %224 = vector.broadcast %223 : vector<8x1xf32> to vector<8x128xf32>
    %225 = vector.broadcast %214 : vector<1x128xf32> to vector<8x128xf32>
    %226 = arith.mulf %224, %225 : vector<8x128xf32>
    %227 = arith.addf %222, %226 : vector<8x128xf32>
    %228 = vector.extract_strided_slice %12 {offsets = [0, 2], sizes = [8, 1], strides = [1, 1]} : vector<8x6xf32> to vector<8x1xf32>
    %229 = vector.broadcast %228 : vector<8x1xf32> to vector<8x128xf32>
    %230 = vector.broadcast %215 : vector<1x128xf32> to vector<8x128xf32>
    %231 = arith.mulf %229, %230 : vector<8x128xf32>
    %232 = arith.addf %227, %231 : vector<8x128xf32>
    %233 = vector.extract_strided_slice %12 {offsets = [0, 3], sizes = [8, 1], strides = [1, 1]} : vector<8x6xf32> to vector<8x1xf32>
    %234 = vector.broadcast %233 : vector<8x1xf32> to vector<8x128xf32>
    %235 = vector.broadcast %216 : vector<1x128xf32> to vector<8x128xf32>
    %236 = arith.mulf %234, %235 : vector<8x128xf32>
    %237 = arith.addf %232, %236 : vector<8x128xf32>
    %238 = vector.extract_strided_slice %12 {offsets = [0, 4], sizes = [8, 1], strides = [1, 1]} : vector<8x6xf32> to vector<8x1xf32>
    %239 = vector.broadcast %238 : vector<8x1xf32> to vector<8x128xf32>
    %240 = vector.broadcast %217 : vector<1x128xf32> to vector<8x128xf32>
    %241 = arith.mulf %239, %240 : vector<8x128xf32>
    %242 = arith.addf %237, %241 : vector<8x128xf32>
    %243 = vector.extract_strided_slice %12 {offsets = [0, 5], sizes = [8, 1], strides = [1, 1]} : vector<8x6xf32> to vector<8x1xf32>
    %244 = vector.broadcast %243 : vector<8x1xf32> to vector<8x128xf32>
    %245 = vector.broadcast %218 : vector<1x128xf32> to vector<8x128xf32>
    %246 = arith.mulf %244, %245 : vector<8x128xf32>
    %247 = arith.addf %242, %246 : vector<8x128xf32>
    %248 = vector.extract_strided_slice %75 {offsets = [0, 0], sizes = [1, 128], strides = [1, 1]} : vector<4x128xf32> to vector<1x128xf32>
    %249 = vector.extract_strided_slice %75 {offsets = [1, 0], sizes = [1, 128], strides = [1, 1]} : vector<4x128xf32> to vector<1x128xf32>
    %250 = vector.extract_strided_slice %75 {offsets = [2, 0], sizes = [1, 128], strides = [1, 1]} : vector<4x128xf32> to vector<1x128xf32>
    %251 = vector.extract_strided_slice %75 {offsets = [3, 0], sizes = [1, 128], strides = [1, 1]} : vector<4x128xf32> to vector<1x128xf32>
    %252 = vector.extract_strided_slice %95 {offsets = [0, 0], sizes = [1, 128], strides = [1, 1]} : vector<2x128xf32> to vector<1x128xf32>
    %253 = vector.extract_strided_slice %95 {offsets = [1, 0], sizes = [1, 128], strides = [1, 1]} : vector<2x128xf32> to vector<1x128xf32>
    %254 = vector.extract_strided_slice %12 {offsets = [0, 0], sizes = [8, 1], strides = [1, 1]} : vector<8x6xf32> to vector<8x1xf32>
    %255 = vector.broadcast %254 : vector<8x1xf32> to vector<8x128xf32>
    %256 = vector.broadcast %248 : vector<1x128xf32> to vector<8x128xf32>
    %257 = arith.mulf %255, %256 : vector<8x128xf32>
    %258 = vector.extract_strided_slice %12 {offsets = [0, 1], sizes = [8, 1], strides = [1, 1]} : vector<8x6xf32> to vector<8x1xf32>
    %259 = vector.broadcast %258 : vector<8x1xf32> to vector<8x128xf32>
    %260 = vector.broadcast %249 : vector<1x128xf32> to vector<8x128xf32>
    %261 = arith.mulf %259, %260 : vector<8x128xf32>
    %262 = arith.addf %257, %261 : vector<8x128xf32>
    %263 = vector.extract_strided_slice %12 {offsets = [0, 2], sizes = [8, 1], strides = [1, 1]} : vector<8x6xf32> to vector<8x1xf32>
    %264 = vector.broadcast %263 : vector<8x1xf32> to vector<8x128xf32>
    %265 = vector.broadcast %250 : vector<1x128xf32> to vector<8x128xf32>
    %266 = arith.mulf %264, %265 : vector<8x128xf32>
    %267 = arith.addf %262, %266 : vector<8x128xf32>
    %268 = vector.extract_strided_slice %12 {offsets = [0, 3], sizes = [8, 1], strides = [1, 1]} : vector<8x6xf32> to vector<8x1xf32>
    %269 = vector.broadcast %268 : vector<8x1xf32> to vector<8x128xf32>
    %270 = vector.broadcast %251 : vector<1x128xf32> to vector<8x128xf32>
    %271 = arith.mulf %269, %270 : vector<8x128xf32>
    %272 = arith.addf %267, %271 : vector<8x128xf32>
    %273 = vector.extract_strided_slice %12 {offsets = [0, 4], sizes = [8, 1], strides = [1, 1]} : vector<8x6xf32> to vector<8x1xf32>
    %274 = vector.broadcast %273 : vector<8x1xf32> to vector<8x128xf32>
    %275 = vector.broadcast %252 : vector<1x128xf32> to vector<8x128xf32>
    %276 = arith.mulf %274, %275 : vector<8x128xf32>
    %277 = arith.addf %272, %276 : vector<8x128xf32>
    %278 = vector.extract_strided_slice %12 {offsets = [0, 5], sizes = [8, 1], strides = [1, 1]} : vector<8x6xf32> to vector<8x1xf32>
    %279 = vector.broadcast %278 : vector<8x1xf32> to vector<8x128xf32>
    %280 = vector.broadcast %253 : vector<1x128xf32> to vector<8x128xf32>
    %281 = arith.mulf %279, %280 : vector<8x128xf32>
    %282 = arith.addf %277, %281 : vector<8x128xf32>
    %283 = vector.extract_strided_slice %177 {offsets = [0, 0], sizes = [4, 128], strides = [1, 1]} : vector<8x128xf32> to vector<4x128xf32>
    %284 = vector.extract_strided_slice %212 {offsets = [0, 0], sizes = [4, 128], strides = [1, 1]} : vector<8x128xf32> to vector<4x128xf32>
    %285 = vector.extract_strided_slice %247 {offsets = [0, 0], sizes = [4, 128], strides = [1, 1]} : vector<8x128xf32> to vector<4x128xf32>
    %286 = vector.extract_strided_slice %282 {offsets = [0, 0], sizes = [4, 128], strides = [1, 1]} : vector<8x128xf32> to vector<4x128xf32>
    %287 = vector.extract_strided_slice %177 {offsets = [4, 0], sizes = [2, 128], strides = [1, 1]} : vector<8x128xf32> to vector<2x128xf32>
    %288 = vector.extract_strided_slice %212 {offsets = [4, 0], sizes = [2, 128], strides = [1, 1]} : vector<8x128xf32> to vector<2x128xf32>
    %289 = vector.extract_strided_slice %247 {offsets = [4, 0], sizes = [2, 128], strides = [1, 1]} : vector<8x128xf32> to vector<2x128xf32>
    %290 = vector.extract_strided_slice %282 {offsets = [4, 0], sizes = [2, 128], strides = [1, 1]} : vector<8x128xf32> to vector<2x128xf32>
    %291 = vector.extract_strided_slice %177 {offsets = [6, 0], sizes = [2, 128], strides = [1, 1]} : vector<8x128xf32> to vector<2x128xf32>
    %292 = vector.extract_strided_slice %212 {offsets = [6, 0], sizes = [2, 128], strides = [1, 1]} : vector<8x128xf32> to vector<2x128xf32>
    %293 = vector.extract_strided_slice %247 {offsets = [6, 0], sizes = [2, 128], strides = [1, 1]} : vector<8x128xf32> to vector<2x128xf32>
    %294 = vector.extract_strided_slice %282 {offsets = [6, 0], sizes = [2, 128], strides = [1, 1]} : vector<8x128xf32> to vector<2x128xf32>
    %295 = arith.mulf %141, %283 : vector<4x128xf32>
    %296 = arith.mulf %141, %284 : vector<4x128xf32>
    %297 = arith.mulf %141, %285 : vector<4x128xf32>
    %298 = arith.mulf %141, %286 : vector<4x128xf32>
    %299 = arith.mulf %135, %287 : vector<2x128xf32>
    %300 = arith.mulf %134, %291 : vector<2x128xf32>
    %301 = arith.addf %299, %300 : vector<2x128xf32>
    %302 = arith.mulf %135, %288 : vector<2x128xf32>
    %303 = arith.mulf %134, %292 : vector<2x128xf32>
    %304 = arith.addf %302, %303 : vector<2x128xf32>
    %305 = arith.mulf %135, %289 : vector<2x128xf32>
    %306 = arith.mulf %134, %293 : vector<2x128xf32>
    %307 = arith.addf %305, %306 : vector<2x128xf32>
    %308 = arith.mulf %135, %290 : vector<2x128xf32>
    %309 = arith.mulf %134, %294 : vector<2x128xf32>
    %310 = arith.addf %308, %309 : vector<2x128xf32>
    %311 = vector.extract_strided_slice %138 {offsets = [0, 0], sizes = [1, 128], strides = [1, 1]} : vector<4x128xf32> to vector<1x128xf32>
    %312 = vector.extract_strided_slice %138 {offsets = [1, 0], sizes = [1, 128], strides = [1, 1]} : vector<4x128xf32> to vector<1x128xf32>
    %313 = vector.extract_strided_slice %138 {offsets = [2, 0], sizes = [1, 128], strides = [1, 1]} : vector<4x128xf32> to vector<1x128xf32>
    %314 = vector.extract_strided_slice %138 {offsets = [3, 0], sizes = [1, 128], strides = [1, 1]} : vector<4x128xf32> to vector<1x128xf32>
    %315 = vector.extract_strided_slice %142 {offsets = [0, 0], sizes = [1, 128], strides = [1, 1]} : vector<2x128xf32> to vector<1x128xf32>
    %316 = vector.extract_strided_slice %142 {offsets = [1, 0], sizes = [1, 128], strides = [1, 1]} : vector<2x128xf32> to vector<1x128xf32>
    %317 = vector.extract_strided_slice %17 {offsets = [0, 0], sizes = [2, 1], strides = [1, 1]} : vector<2x6xf32> to vector<2x1xf32>
    %318 = vector.broadcast %317 : vector<2x1xf32> to vector<2x128xf32>
    %319 = vector.broadcast %311 : vector<1x128xf32> to vector<2x128xf32>
    %320 = arith.mulf %318, %319 : vector<2x128xf32>
    %321 = vector.extract_strided_slice %17 {offsets = [0, 1], sizes = [2, 1], strides = [1, 1]} : vector<2x6xf32> to vector<2x1xf32>
    %322 = vector.broadcast %321 : vector<2x1xf32> to vector<2x128xf32>
    %323 = vector.broadcast %312 : vector<1x128xf32> to vector<2x128xf32>
    %324 = arith.mulf %322, %323 : vector<2x128xf32>
    %325 = arith.addf %320, %324 : vector<2x128xf32>
    %326 = vector.extract_strided_slice %17 {offsets = [0, 2], sizes = [2, 1], strides = [1, 1]} : vector<2x6xf32> to vector<2x1xf32>
    %327 = vector.broadcast %326 : vector<2x1xf32> to vector<2x128xf32>
    %328 = vector.broadcast %313 : vector<1x128xf32> to vector<2x128xf32>
    %329 = arith.mulf %327, %328 : vector<2x128xf32>
    %330 = arith.addf %325, %329 : vector<2x128xf32>
    %331 = vector.extract_strided_slice %17 {offsets = [0, 3], sizes = [2, 1], strides = [1, 1]} : vector<2x6xf32> to vector<2x1xf32>
    %332 = vector.broadcast %331 : vector<2x1xf32> to vector<2x128xf32>
    %333 = vector.broadcast %314 : vector<1x128xf32> to vector<2x128xf32>
    %334 = arith.mulf %332, %333 : vector<2x128xf32>
    %335 = arith.addf %330, %334 : vector<2x128xf32>
    %336 = vector.extract_strided_slice %17 {offsets = [0, 4], sizes = [2, 1], strides = [1, 1]} : vector<2x6xf32> to vector<2x1xf32>
    %337 = vector.broadcast %336 : vector<2x1xf32> to vector<2x128xf32>
    %338 = vector.broadcast %315 : vector<1x128xf32> to vector<2x128xf32>
    %339 = arith.mulf %337, %338 : vector<2x128xf32>
    %340 = arith.addf %335, %339 : vector<2x128xf32>
    %341 = vector.extract_strided_slice %17 {offsets = [0, 5], sizes = [2, 1], strides = [1, 1]} : vector<2x6xf32> to vector<2x1xf32>
    %342 = vector.broadcast %341 : vector<2x1xf32> to vector<2x128xf32>
    %343 = vector.broadcast %316 : vector<1x128xf32> to vector<2x128xf32>
    %344 = arith.mulf %342, %343 : vector<2x128xf32>
    %345 = arith.addf %340, %344 : vector<2x128xf32>
    %346 = vector.broadcast %16 : vector<2x1xf32> to vector<2x128xf32>
    %347 = arith.addf %345, %346 : vector<2x128xf32>
    %348 = vector.extract_strided_slice %295 {offsets = [0, 0], sizes = [1, 128], strides = [1, 1]} : vector<4x128xf32> to vector<1x128xf32>
    %349 = vector.extract_strided_slice %295 {offsets = [1, 0], sizes = [1, 128], strides = [1, 1]} : vector<4x128xf32> to vector<1x128xf32>
    %350 = vector.extract_strided_slice %295 {offsets = [2, 0], sizes = [1, 128], strides = [1, 1]} : vector<4x128xf32> to vector<1x128xf32>
    %351 = vector.extract_strided_slice %295 {offsets = [3, 0], sizes = [1, 128], strides = [1, 1]} : vector<4x128xf32> to vector<1x128xf32>
    %352 = vector.extract_strided_slice %301 {offsets = [0, 0], sizes = [1, 128], strides = [1, 1]} : vector<2x128xf32> to vector<1x128xf32>
    %353 = vector.extract_strided_slice %301 {offsets = [1, 0], sizes = [1, 128], strides = [1, 1]} : vector<2x128xf32> to vector<1x128xf32>
    %354 = vector.extract_strided_slice %17 {offsets = [0, 0], sizes = [2, 1], strides = [1, 1]} : vector<2x6xf32> to vector<2x1xf32>
    %355 = vector.broadcast %354 : vector<2x1xf32> to vector<2x128xf32>
    %356 = vector.broadcast %348 : vector<1x128xf32> to vector<2x128xf32>
    %357 = arith.mulf %355, %356 : vector<2x128xf32>
    %358 = vector.extract_strided_slice %17 {offsets = [0, 1], sizes = [2, 1], strides = [1, 1]} : vector<2x6xf32> to vector<2x1xf32>
    %359 = vector.broadcast %358 : vector<2x1xf32> to vector<2x128xf32>
    %360 = vector.broadcast %349 : vector<1x128xf32> to vector<2x128xf32>
    %361 = arith.mulf %359, %360 : vector<2x128xf32>
    %362 = arith.addf %357, %361 : vector<2x128xf32>
    %363 = vector.extract_strided_slice %17 {offsets = [0, 2], sizes = [2, 1], strides = [1, 1]} : vector<2x6xf32> to vector<2x1xf32>
    %364 = vector.broadcast %363 : vector<2x1xf32> to vector<2x128xf32>
    %365 = vector.broadcast %350 : vector<1x128xf32> to vector<2x128xf32>
    %366 = arith.mulf %364, %365 : vector<2x128xf32>
    %367 = arith.addf %362, %366 : vector<2x128xf32>
    %368 = vector.extract_strided_slice %17 {offsets = [0, 3], sizes = [2, 1], strides = [1, 1]} : vector<2x6xf32> to vector<2x1xf32>
    %369 = vector.broadcast %368 : vector<2x1xf32> to vector<2x128xf32>
    %370 = vector.broadcast %351 : vector<1x128xf32> to vector<2x128xf32>
    %371 = arith.mulf %369, %370 : vector<2x128xf32>
    %372 = arith.addf %367, %371 : vector<2x128xf32>
    %373 = vector.extract_strided_slice %17 {offsets = [0, 4], sizes = [2, 1], strides = [1, 1]} : vector<2x6xf32> to vector<2x1xf32>
    %374 = vector.broadcast %373 : vector<2x1xf32> to vector<2x128xf32>
    %375 = vector.broadcast %352 : vector<1x128xf32> to vector<2x128xf32>
    %376 = arith.mulf %374, %375 : vector<2x128xf32>
    %377 = arith.addf %372, %376 : vector<2x128xf32>
    %378 = vector.extract_strided_slice %17 {offsets = [0, 5], sizes = [2, 1], strides = [1, 1]} : vector<2x6xf32> to vector<2x1xf32>
    %379 = vector.broadcast %378 : vector<2x1xf32> to vector<2x128xf32>
    %380 = vector.broadcast %353 : vector<1x128xf32> to vector<2x128xf32>
    %381 = arith.mulf %379, %380 : vector<2x128xf32>
    %382 = arith.addf %377, %381 : vector<2x128xf32>
    %383 = vector.extract_strided_slice %296 {offsets = [0, 0], sizes = [1, 128], strides = [1, 1]} : vector<4x128xf32> to vector<1x128xf32>
    %384 = vector.extract_strided_slice %296 {offsets = [1, 0], sizes = [1, 128], strides = [1, 1]} : vector<4x128xf32> to vector<1x128xf32>
    %385 = vector.extract_strided_slice %296 {offsets = [2, 0], sizes = [1, 128], strides = [1, 1]} : vector<4x128xf32> to vector<1x128xf32>
    %386 = vector.extract_strided_slice %296 {offsets = [3, 0], sizes = [1, 128], strides = [1, 1]} : vector<4x128xf32> to vector<1x128xf32>
    %387 = vector.extract_strided_slice %304 {offsets = [0, 0], sizes = [1, 128], strides = [1, 1]} : vector<2x128xf32> to vector<1x128xf32>
    %388 = vector.extract_strided_slice %304 {offsets = [1, 0], sizes = [1, 128], strides = [1, 1]} : vector<2x128xf32> to vector<1x128xf32>
    %389 = vector.extract_strided_slice %17 {offsets = [0, 0], sizes = [2, 1], strides = [1, 1]} : vector<2x6xf32> to vector<2x1xf32>
    %390 = vector.broadcast %389 : vector<2x1xf32> to vector<2x128xf32>
    %391 = vector.broadcast %383 : vector<1x128xf32> to vector<2x128xf32>
    %392 = arith.mulf %390, %391 : vector<2x128xf32>
    %393 = vector.extract_strided_slice %17 {offsets = [0, 1], sizes = [2, 1], strides = [1, 1]} : vector<2x6xf32> to vector<2x1xf32>
    %394 = vector.broadcast %393 : vector<2x1xf32> to vector<2x128xf32>
    %395 = vector.broadcast %384 : vector<1x128xf32> to vector<2x128xf32>
    %396 = arith.mulf %394, %395 : vector<2x128xf32>
    %397 = arith.addf %392, %396 : vector<2x128xf32>
    %398 = vector.extract_strided_slice %17 {offsets = [0, 2], sizes = [2, 1], strides = [1, 1]} : vector<2x6xf32> to vector<2x1xf32>
    %399 = vector.broadcast %398 : vector<2x1xf32> to vector<2x128xf32>
    %400 = vector.broadcast %385 : vector<1x128xf32> to vector<2x128xf32>
    %401 = arith.mulf %399, %400 : vector<2x128xf32>
    %402 = arith.addf %397, %401 : vector<2x128xf32>
    %403 = vector.extract_strided_slice %17 {offsets = [0, 3], sizes = [2, 1], strides = [1, 1]} : vector<2x6xf32> to vector<2x1xf32>
    %404 = vector.broadcast %403 : vector<2x1xf32> to vector<2x128xf32>
    %405 = vector.broadcast %386 : vector<1x128xf32> to vector<2x128xf32>
    %406 = arith.mulf %404, %405 : vector<2x128xf32>
    %407 = arith.addf %402, %406 : vector<2x128xf32>
    %408 = vector.extract_strided_slice %17 {offsets = [0, 4], sizes = [2, 1], strides = [1, 1]} : vector<2x6xf32> to vector<2x1xf32>
    %409 = vector.broadcast %408 : vector<2x1xf32> to vector<2x128xf32>
    %410 = vector.broadcast %387 : vector<1x128xf32> to vector<2x128xf32>
    %411 = arith.mulf %409, %410 : vector<2x128xf32>
    %412 = arith.addf %407, %411 : vector<2x128xf32>
    %413 = vector.extract_strided_slice %17 {offsets = [0, 5], sizes = [2, 1], strides = [1, 1]} : vector<2x6xf32> to vector<2x1xf32>
    %414 = vector.broadcast %413 : vector<2x1xf32> to vector<2x128xf32>
    %415 = vector.broadcast %388 : vector<1x128xf32> to vector<2x128xf32>
    %416 = arith.mulf %414, %415 : vector<2x128xf32>
    %417 = arith.addf %412, %416 : vector<2x128xf32>
    %418 = vector.extract_strided_slice %297 {offsets = [0, 0], sizes = [1, 128], strides = [1, 1]} : vector<4x128xf32> to vector<1x128xf32>
    %419 = vector.extract_strided_slice %297 {offsets = [1, 0], sizes = [1, 128], strides = [1, 1]} : vector<4x128xf32> to vector<1x128xf32>
    %420 = vector.extract_strided_slice %297 {offsets = [2, 0], sizes = [1, 128], strides = [1, 1]} : vector<4x128xf32> to vector<1x128xf32>
    %421 = vector.extract_strided_slice %297 {offsets = [3, 0], sizes = [1, 128], strides = [1, 1]} : vector<4x128xf32> to vector<1x128xf32>
    %422 = vector.extract_strided_slice %307 {offsets = [0, 0], sizes = [1, 128], strides = [1, 1]} : vector<2x128xf32> to vector<1x128xf32>
    %423 = vector.extract_strided_slice %307 {offsets = [1, 0], sizes = [1, 128], strides = [1, 1]} : vector<2x128xf32> to vector<1x128xf32>
    %424 = vector.extract_strided_slice %17 {offsets = [0, 0], sizes = [2, 1], strides = [1, 1]} : vector<2x6xf32> to vector<2x1xf32>
    %425 = vector.broadcast %424 : vector<2x1xf32> to vector<2x128xf32>
    %426 = vector.broadcast %418 : vector<1x128xf32> to vector<2x128xf32>
    %427 = arith.mulf %425, %426 : vector<2x128xf32>
    %428 = vector.extract_strided_slice %17 {offsets = [0, 1], sizes = [2, 1], strides = [1, 1]} : vector<2x6xf32> to vector<2x1xf32>
    %429 = vector.broadcast %428 : vector<2x1xf32> to vector<2x128xf32>
    %430 = vector.broadcast %419 : vector<1x128xf32> to vector<2x128xf32>
    %431 = arith.mulf %429, %430 : vector<2x128xf32>
    %432 = arith.addf %427, %431 : vector<2x128xf32>
    %433 = vector.extract_strided_slice %17 {offsets = [0, 2], sizes = [2, 1], strides = [1, 1]} : vector<2x6xf32> to vector<2x1xf32>
    %434 = vector.broadcast %433 : vector<2x1xf32> to vector<2x128xf32>
    %435 = vector.broadcast %420 : vector<1x128xf32> to vector<2x128xf32>
    %436 = arith.mulf %434, %435 : vector<2x128xf32>
    %437 = arith.addf %432, %436 : vector<2x128xf32>
    %438 = vector.extract_strided_slice %17 {offsets = [0, 3], sizes = [2, 1], strides = [1, 1]} : vector<2x6xf32> to vector<2x1xf32>
    %439 = vector.broadcast %438 : vector<2x1xf32> to vector<2x128xf32>
    %440 = vector.broadcast %421 : vector<1x128xf32> to vector<2x128xf32>
    %441 = arith.mulf %439, %440 : vector<2x128xf32>
    %442 = arith.addf %437, %441 : vector<2x128xf32>
    %443 = vector.extract_strided_slice %17 {offsets = [0, 4], sizes = [2, 1], strides = [1, 1]} : vector<2x6xf32> to vector<2x1xf32>
    %444 = vector.broadcast %443 : vector<2x1xf32> to vector<2x128xf32>
    %445 = vector.broadcast %422 : vector<1x128xf32> to vector<2x128xf32>
    %446 = arith.mulf %444, %445 : vector<2x128xf32>
    %447 = arith.addf %442, %446 : vector<2x128xf32>
    %448 = vector.extract_strided_slice %17 {offsets = [0, 5], sizes = [2, 1], strides = [1, 1]} : vector<2x6xf32> to vector<2x1xf32>
    %449 = vector.broadcast %448 : vector<2x1xf32> to vector<2x128xf32>
    %450 = vector.broadcast %423 : vector<1x128xf32> to vector<2x128xf32>
    %451 = arith.mulf %449, %450 : vector<2x128xf32>
    %452 = arith.addf %447, %451 : vector<2x128xf32>
    %453 = vector.extract_strided_slice %298 {offsets = [0, 0], sizes = [1, 128], strides = [1, 1]} : vector<4x128xf32> to vector<1x128xf32>
    %454 = vector.extract_strided_slice %298 {offsets = [1, 0], sizes = [1, 128], strides = [1, 1]} : vector<4x128xf32> to vector<1x128xf32>
    %455 = vector.extract_strided_slice %298 {offsets = [2, 0], sizes = [1, 128], strides = [1, 1]} : vector<4x128xf32> to vector<1x128xf32>
    %456 = vector.extract_strided_slice %298 {offsets = [3, 0], sizes = [1, 128], strides = [1, 1]} : vector<4x128xf32> to vector<1x128xf32>
    %457 = vector.extract_strided_slice %310 {offsets = [0, 0], sizes = [1, 128], strides = [1, 1]} : vector<2x128xf32> to vector<1x128xf32>
    %458 = vector.extract_strided_slice %310 {offsets = [1, 0], sizes = [1, 128], strides = [1, 1]} : vector<2x128xf32> to vector<1x128xf32>
    %459 = vector.extract_strided_slice %17 {offsets = [0, 0], sizes = [2, 1], strides = [1, 1]} : vector<2x6xf32> to vector<2x1xf32>
    %460 = vector.broadcast %459 : vector<2x1xf32> to vector<2x128xf32>
    %461 = vector.broadcast %453 : vector<1x128xf32> to vector<2x128xf32>
    %462 = arith.mulf %460, %461 : vector<2x128xf32>
    %463 = vector.extract_strided_slice %17 {offsets = [0, 1], sizes = [2, 1], strides = [1, 1]} : vector<2x6xf32> to vector<2x1xf32>
    %464 = vector.broadcast %463 : vector<2x1xf32> to vector<2x128xf32>
    %465 = vector.broadcast %454 : vector<1x128xf32> to vector<2x128xf32>
    %466 = arith.mulf %464, %465 : vector<2x128xf32>
    %467 = arith.addf %462, %466 : vector<2x128xf32>
    %468 = vector.extract_strided_slice %17 {offsets = [0, 2], sizes = [2, 1], strides = [1, 1]} : vector<2x6xf32> to vector<2x1xf32>
    %469 = vector.broadcast %468 : vector<2x1xf32> to vector<2x128xf32>
    %470 = vector.broadcast %455 : vector<1x128xf32> to vector<2x128xf32>
    %471 = arith.mulf %469, %470 : vector<2x128xf32>
    %472 = arith.addf %467, %471 : vector<2x128xf32>
    %473 = vector.extract_strided_slice %17 {offsets = [0, 3], sizes = [2, 1], strides = [1, 1]} : vector<2x6xf32> to vector<2x1xf32>
    %474 = vector.broadcast %473 : vector<2x1xf32> to vector<2x128xf32>
    %475 = vector.broadcast %456 : vector<1x128xf32> to vector<2x128xf32>
    %476 = arith.mulf %474, %475 : vector<2x128xf32>
    %477 = arith.addf %472, %476 : vector<2x128xf32>
    %478 = vector.extract_strided_slice %17 {offsets = [0, 4], sizes = [2, 1], strides = [1, 1]} : vector<2x6xf32> to vector<2x1xf32>
    %479 = vector.broadcast %478 : vector<2x1xf32> to vector<2x128xf32>
    %480 = vector.broadcast %457 : vector<1x128xf32> to vector<2x128xf32>
    %481 = arith.mulf %479, %480 : vector<2x128xf32>
    %482 = arith.addf %477, %481 : vector<2x128xf32>
    %483 = vector.extract_strided_slice %17 {offsets = [0, 5], sizes = [2, 1], strides = [1, 1]} : vector<2x6xf32> to vector<2x1xf32>
    %484 = vector.broadcast %483 : vector<2x1xf32> to vector<2x128xf32>
    %485 = vector.broadcast %458 : vector<1x128xf32> to vector<2x128xf32>
    %486 = arith.mulf %484, %485 : vector<2x128xf32>
    %487 = arith.addf %482, %486 : vector<2x128xf32>
    %488 = vector.extract_strided_slice %347 {offsets = [0, 0], sizes = [1, 128], strides = [1, 1]} : vector<2x128xf32> to vector<1x128xf32>
    %489 = vector.extract_strided_slice %347 {offsets = [1, 0], sizes = [1, 128], strides = [1, 1]} : vector<2x128xf32> to vector<1x128xf32>
    %cst_4 = arith.constant 5.000000e-01 : f32
    %490 = vector.broadcast %cst_4 : f32 to vector<1x128xf32>
    %491 = arith.cmpf ogt, %489, %490 : vector<1x128xf32>
    %492 = arith.extui %491 : vector<1x128xi1> to vector<1x128xi32>
    %493 = arith.sitofp %492 : vector<1x128xi32> to vector<1x128xf32>
    %cst_5 = arith.constant 1.000000e+00 : f32
    %494 = vector.broadcast %cst_5 : f32 to vector<1x128xf32>
    %495 = arith.select %491, %489, %494 : vector<1x128xi1>, vector<1x128xf32>
    %cst_6 = arith.constant 1.000000e+00 : f32
    %496 = vector.broadcast %cst_6 : f32 to vector<1x128xf32>
    %497 = arith.divf %496, %495 : vector<1x128xf32>
    %498 = arith.mulf %497, %497 : vector<1x128xf32>
    %499 = arith.mulf %498, %497 : vector<1x128xf32>
    %500 = vector.extract_strided_slice %382 {offsets = [0, 0], sizes = [1, 128], strides = [1, 1]} : vector<2x128xf32> to vector<1x128xf32>
    %501 = vector.extract_strided_slice %417 {offsets = [0, 0], sizes = [1, 128], strides = [1, 1]} : vector<2x128xf32> to vector<1x128xf32>
    %502 = vector.extract_strided_slice %452 {offsets = [0, 0], sizes = [1, 128], strides = [1, 1]} : vector<2x128xf32> to vector<1x128xf32>
    %503 = vector.extract_strided_slice %487 {offsets = [0, 0], sizes = [1, 128], strides = [1, 1]} : vector<2x128xf32> to vector<1x128xf32>
    %504 = vector.extract_strided_slice %382 {offsets = [1, 0], sizes = [1, 128], strides = [1, 1]} : vector<2x128xf32> to vector<1x128xf32>
    %505 = vector.extract_strided_slice %417 {offsets = [1, 0], sizes = [1, 128], strides = [1, 1]} : vector<2x128xf32> to vector<1x128xf32>
    %506 = vector.extract_strided_slice %452 {offsets = [1, 0], sizes = [1, 128], strides = [1, 1]} : vector<2x128xf32> to vector<1x128xf32>
    %507 = vector.extract_strided_slice %487 {offsets = [1, 0], sizes = [1, 128], strides = [1, 1]} : vector<2x128xf32> to vector<1x128xf32>
    %508 = arith.mulf %493, %488 : vector<1x128xf32>
    %509 = arith.mulf %508, %497 : vector<1x128xf32>
    %510 = arith.mulf %500, %497 : vector<1x128xf32>
    %511 = arith.mulf %488, %504 : vector<1x128xf32>
    %512 = arith.mulf %511, %498 : vector<1x128xf32>
    %513 = arith.subf %510, %512 : vector<1x128xf32>
    %514 = arith.mulf %493, %513 : vector<1x128xf32>
    %515 = arith.mulf %501, %497 : vector<1x128xf32>
    %516 = arith.mulf %488, %505 : vector<1x128xf32>
    %517 = arith.mulf %516, %498 : vector<1x128xf32>
    %518 = arith.subf %515, %517 : vector<1x128xf32>
    %519 = arith.mulf %493, %518 : vector<1x128xf32>
    %520 = arith.mulf %58, %58 : vector<4x1xf32>
    %cst_7 = arith.constant 0.000000e+00 : f32
    %521 = vector.broadcast %cst_7 : f32 to vector<4x1xf32>
    %522 = arith.subf %521, %520 : vector<4x1xf32>
    %523 = vector.broadcast %522 : vector<4x1xf32> to vector<4x128xf32>
    %524 = arith.mulf %51, %523 : vector<4x128xf32>
    %525 = arith.mulf %62, %66 : vector<2x1xf32>
    %526 = arith.mulf %66, %62 : vector<2x1xf32>
    %527 = arith.addf %525, %526 : vector<2x1xf32>
    %528 = vector.extract_strided_slice %524 {offsets = [0, 0], sizes = [1, 128], strides = [1, 1]} : vector<4x128xf32> to vector<1x128xf32>
    %529 = vector.extract_strided_slice %524 {offsets = [1, 0], sizes = [1, 128], strides = [1, 1]} : vector<4x128xf32> to vector<1x128xf32>
    %530 = vector.extract_strided_slice %524 {offsets = [2, 0], sizes = [1, 128], strides = [1, 1]} : vector<4x128xf32> to vector<1x128xf32>
    %531 = vector.extract_strided_slice %524 {offsets = [3, 0], sizes = [1, 128], strides = [1, 1]} : vector<4x128xf32> to vector<1x128xf32>
    %532 = vector.extract_strided_slice %527 {offsets = [0, 0], sizes = [1, 1], strides = [1, 1]} : vector<2x1xf32> to vector<1x1xf32>
    %533 = vector.extract_strided_slice %527 {offsets = [1, 0], sizes = [1, 1], strides = [1, 1]} : vector<2x1xf32> to vector<1x1xf32>
    %534 = vector.extract_strided_slice %12 {offsets = [0, 0], sizes = [8, 1], strides = [1, 1]} : vector<8x6xf32> to vector<8x1xf32>
    %535 = vector.broadcast %534 : vector<8x1xf32> to vector<8x128xf32>
    %536 = vector.broadcast %528 : vector<1x128xf32> to vector<8x128xf32>
    %537 = arith.mulf %535, %536 : vector<8x128xf32>
    %538 = vector.extract_strided_slice %12 {offsets = [0, 1], sizes = [8, 1], strides = [1, 1]} : vector<8x6xf32> to vector<8x1xf32>
    %539 = vector.broadcast %538 : vector<8x1xf32> to vector<8x128xf32>
    %540 = vector.broadcast %529 : vector<1x128xf32> to vector<8x128xf32>
    %541 = arith.mulf %539, %540 : vector<8x128xf32>
    %542 = arith.addf %537, %541 : vector<8x128xf32>
    %543 = vector.extract_strided_slice %12 {offsets = [0, 2], sizes = [8, 1], strides = [1, 1]} : vector<8x6xf32> to vector<8x1xf32>
    %544 = vector.broadcast %543 : vector<8x1xf32> to vector<8x128xf32>
    %545 = vector.broadcast %530 : vector<1x128xf32> to vector<8x128xf32>
    %546 = arith.mulf %544, %545 : vector<8x128xf32>
    %547 = arith.addf %542, %546 : vector<8x128xf32>
    %548 = vector.extract_strided_slice %12 {offsets = [0, 3], sizes = [8, 1], strides = [1, 1]} : vector<8x6xf32> to vector<8x1xf32>
    %549 = vector.broadcast %548 : vector<8x1xf32> to vector<8x128xf32>
    %550 = vector.broadcast %531 : vector<1x128xf32> to vector<8x128xf32>
    %551 = arith.mulf %549, %550 : vector<8x128xf32>
    %552 = arith.addf %547, %551 : vector<8x128xf32>
    %553 = vector.extract_strided_slice %12 {offsets = [0, 4], sizes = [8, 1], strides = [1, 1]} : vector<8x6xf32> to vector<8x1xf32>
    %554 = vector.broadcast %532 : vector<1x1xf32> to vector<8x1xf32>
    %555 = arith.mulf %553, %554 : vector<8x1xf32>
    %556 = vector.broadcast %555 : vector<8x1xf32> to vector<8x128xf32>
    %557 = arith.addf %552, %556 : vector<8x128xf32>
    %558 = vector.extract_strided_slice %12 {offsets = [0, 5], sizes = [8, 1], strides = [1, 1]} : vector<8x6xf32> to vector<8x1xf32>
    %559 = vector.broadcast %533 : vector<1x1xf32> to vector<8x1xf32>
    %560 = arith.mulf %558, %559 : vector<8x1xf32>
    %561 = vector.broadcast %560 : vector<8x1xf32> to vector<8x128xf32>
    %562 = arith.addf %557, %561 : vector<8x128xf32>
    %563 = vector.extract_strided_slice %562 {offsets = [0, 0], sizes = [4, 128], strides = [1, 1]} : vector<8x128xf32> to vector<4x128xf32>
    %564 = vector.extract_strided_slice %562 {offsets = [4, 0], sizes = [2, 128], strides = [1, 1]} : vector<8x128xf32> to vector<2x128xf32>
    %565 = vector.extract_strided_slice %562 {offsets = [6, 0], sizes = [2, 128], strides = [1, 1]} : vector<8x128xf32> to vector<2x128xf32>
    %566 = arith.mulf %141, %563 : vector<4x128xf32>
    %567 = arith.mulf %285, %285 : vector<4x128xf32>
    %568 = arith.mulf %138, %567 : vector<4x128xf32>
    %569 = arith.subf %566, %568 : vector<4x128xf32>
    %570 = arith.mulf %135, %564 : vector<2x128xf32>
    %571 = arith.mulf %134, %565 : vector<2x128xf32>
    %572 = arith.addf %570, %571 : vector<2x128xf32>
    %573 = arith.mulf %289, %293 : vector<2x128xf32>
    %574 = arith.addf %572, %573 : vector<2x128xf32>
    %575 = arith.mulf %293, %289 : vector<2x128xf32>
    %576 = arith.addf %574, %575 : vector<2x128xf32>
    %577 = vector.extract_strided_slice %569 {offsets = [0, 0], sizes = [1, 128], strides = [1, 1]} : vector<4x128xf32> to vector<1x128xf32>
    %578 = vector.extract_strided_slice %569 {offsets = [1, 0], sizes = [1, 128], strides = [1, 1]} : vector<4x128xf32> to vector<1x128xf32>
    %579 = vector.extract_strided_slice %569 {offsets = [2, 0], sizes = [1, 128], strides = [1, 1]} : vector<4x128xf32> to vector<1x128xf32>
    %580 = vector.extract_strided_slice %569 {offsets = [3, 0], sizes = [1, 128], strides = [1, 1]} : vector<4x128xf32> to vector<1x128xf32>
    %581 = vector.extract_strided_slice %576 {offsets = [0, 0], sizes = [1, 128], strides = [1, 1]} : vector<2x128xf32> to vector<1x128xf32>
    %582 = vector.extract_strided_slice %576 {offsets = [1, 0], sizes = [1, 128], strides = [1, 1]} : vector<2x128xf32> to vector<1x128xf32>
    %583 = vector.extract_strided_slice %17 {offsets = [0, 0], sizes = [2, 1], strides = [1, 1]} : vector<2x6xf32> to vector<2x1xf32>
    %584 = vector.broadcast %583 : vector<2x1xf32> to vector<2x128xf32>
    %585 = vector.broadcast %577 : vector<1x128xf32> to vector<2x128xf32>
    %586 = arith.mulf %584, %585 : vector<2x128xf32>
    %587 = vector.extract_strided_slice %17 {offsets = [0, 1], sizes = [2, 1], strides = [1, 1]} : vector<2x6xf32> to vector<2x1xf32>
    %588 = vector.broadcast %587 : vector<2x1xf32> to vector<2x128xf32>
    %589 = vector.broadcast %578 : vector<1x128xf32> to vector<2x128xf32>
    %590 = arith.mulf %588, %589 : vector<2x128xf32>
    %591 = arith.addf %586, %590 : vector<2x128xf32>
    %592 = vector.extract_strided_slice %17 {offsets = [0, 2], sizes = [2, 1], strides = [1, 1]} : vector<2x6xf32> to vector<2x1xf32>
    %593 = vector.broadcast %592 : vector<2x1xf32> to vector<2x128xf32>
    %594 = vector.broadcast %579 : vector<1x128xf32> to vector<2x128xf32>
    %595 = arith.mulf %593, %594 : vector<2x128xf32>
    %596 = arith.addf %591, %595 : vector<2x128xf32>
    %597 = vector.extract_strided_slice %17 {offsets = [0, 3], sizes = [2, 1], strides = [1, 1]} : vector<2x6xf32> to vector<2x1xf32>
    %598 = vector.broadcast %597 : vector<2x1xf32> to vector<2x128xf32>
    %599 = vector.broadcast %580 : vector<1x128xf32> to vector<2x128xf32>
    %600 = arith.mulf %598, %599 : vector<2x128xf32>
    %601 = arith.addf %596, %600 : vector<2x128xf32>
    %602 = vector.extract_strided_slice %17 {offsets = [0, 4], sizes = [2, 1], strides = [1, 1]} : vector<2x6xf32> to vector<2x1xf32>
    %603 = vector.broadcast %602 : vector<2x1xf32> to vector<2x128xf32>
    %604 = vector.broadcast %581 : vector<1x128xf32> to vector<2x128xf32>
    %605 = arith.mulf %603, %604 : vector<2x128xf32>
    %606 = arith.addf %601, %605 : vector<2x128xf32>
    %607 = vector.extract_strided_slice %17 {offsets = [0, 5], sizes = [2, 1], strides = [1, 1]} : vector<2x6xf32> to vector<2x1xf32>
    %608 = vector.broadcast %607 : vector<2x1xf32> to vector<2x128xf32>
    %609 = vector.broadcast %582 : vector<1x128xf32> to vector<2x128xf32>
    %610 = arith.mulf %608, %609 : vector<2x128xf32>
    %611 = arith.addf %606, %610 : vector<2x128xf32>
    %612 = vector.extract_strided_slice %611 {offsets = [0, 0], sizes = [1, 128], strides = [1, 1]} : vector<2x128xf32> to vector<1x128xf32>
    %613 = vector.extract_strided_slice %611 {offsets = [1, 0], sizes = [1, 128], strides = [1, 1]} : vector<2x128xf32> to vector<1x128xf32>
    %614 = arith.mulf %612, %497 : vector<1x128xf32>
    %615 = arith.mulf %502, %506 : vector<1x128xf32>
    %616 = arith.mulf %502, %506 : vector<1x128xf32>
    %617 = arith.addf %615, %616 : vector<1x128xf32>
    %618 = arith.mulf %617, %498 : vector<1x128xf32>
    %619 = arith.subf %614, %618 : vector<1x128xf32>
    %620 = arith.mulf %488, %613 : vector<1x128xf32>
    %621 = arith.mulf %620, %498 : vector<1x128xf32>
    %622 = arith.subf %619, %621 : vector<1x128xf32>
    %cst_8 = arith.constant 2.000000e+00 : f32
    %623 = vector.broadcast %cst_8 : f32 to vector<1x128xf32>
    %624 = arith.mulf %623, %488 : vector<1x128xf32>
    %625 = arith.mulf %624, %506 : vector<1x128xf32>
    %626 = arith.mulf %625, %506 : vector<1x128xf32>
    %627 = arith.mulf %626, %499 : vector<1x128xf32>
    %628 = arith.addf %622, %627 : vector<1x128xf32>
    %629 = arith.mulf %493, %628 : vector<1x128xf32>
    %630 = arith.mulf %58, %59 : vector<4x1xf32>
    %cst_9 = arith.constant 0.000000e+00 : f32
    %631 = vector.broadcast %cst_9 : f32 to vector<4x1xf32>
    %632 = arith.subf %631, %630 : vector<4x1xf32>
    %633 = vector.broadcast %632 : vector<4x1xf32> to vector<4x128xf32>
    %634 = arith.mulf %51, %633 : vector<4x128xf32>
    %635 = arith.mulf %62, %67 : vector<2x1xf32>
    %636 = arith.mulf %66, %63 : vector<2x1xf32>
    %637 = arith.addf %635, %636 : vector<2x1xf32>
    %638 = vector.extract_strided_slice %634 {offsets = [0, 0], sizes = [1, 128], strides = [1, 1]} : vector<4x128xf32> to vector<1x128xf32>
    %639 = vector.extract_strided_slice %634 {offsets = [1, 0], sizes = [1, 128], strides = [1, 1]} : vector<4x128xf32> to vector<1x128xf32>
    %640 = vector.extract_strided_slice %634 {offsets = [2, 0], sizes = [1, 128], strides = [1, 1]} : vector<4x128xf32> to vector<1x128xf32>
    %641 = vector.extract_strided_slice %634 {offsets = [3, 0], sizes = [1, 128], strides = [1, 1]} : vector<4x128xf32> to vector<1x128xf32>
    %642 = vector.extract_strided_slice %637 {offsets = [0, 0], sizes = [1, 1], strides = [1, 1]} : vector<2x1xf32> to vector<1x1xf32>
    %643 = vector.extract_strided_slice %637 {offsets = [1, 0], sizes = [1, 1], strides = [1, 1]} : vector<2x1xf32> to vector<1x1xf32>
    %644 = vector.extract_strided_slice %12 {offsets = [0, 0], sizes = [8, 1], strides = [1, 1]} : vector<8x6xf32> to vector<8x1xf32>
    %645 = vector.broadcast %644 : vector<8x1xf32> to vector<8x128xf32>
    %646 = vector.broadcast %638 : vector<1x128xf32> to vector<8x128xf32>
    %647 = arith.mulf %645, %646 : vector<8x128xf32>
    %648 = vector.extract_strided_slice %12 {offsets = [0, 1], sizes = [8, 1], strides = [1, 1]} : vector<8x6xf32> to vector<8x1xf32>
    %649 = vector.broadcast %648 : vector<8x1xf32> to vector<8x128xf32>
    %650 = vector.broadcast %639 : vector<1x128xf32> to vector<8x128xf32>
    %651 = arith.mulf %649, %650 : vector<8x128xf32>
    %652 = arith.addf %647, %651 : vector<8x128xf32>
    %653 = vector.extract_strided_slice %12 {offsets = [0, 2], sizes = [8, 1], strides = [1, 1]} : vector<8x6xf32> to vector<8x1xf32>
    %654 = vector.broadcast %653 : vector<8x1xf32> to vector<8x128xf32>
    %655 = vector.broadcast %640 : vector<1x128xf32> to vector<8x128xf32>
    %656 = arith.mulf %654, %655 : vector<8x128xf32>
    %657 = arith.addf %652, %656 : vector<8x128xf32>
    %658 = vector.extract_strided_slice %12 {offsets = [0, 3], sizes = [8, 1], strides = [1, 1]} : vector<8x6xf32> to vector<8x1xf32>
    %659 = vector.broadcast %658 : vector<8x1xf32> to vector<8x128xf32>
    %660 = vector.broadcast %641 : vector<1x128xf32> to vector<8x128xf32>
    %661 = arith.mulf %659, %660 : vector<8x128xf32>
    %662 = arith.addf %657, %661 : vector<8x128xf32>
    %663 = vector.extract_strided_slice %12 {offsets = [0, 4], sizes = [8, 1], strides = [1, 1]} : vector<8x6xf32> to vector<8x1xf32>
    %664 = vector.broadcast %642 : vector<1x1xf32> to vector<8x1xf32>
    %665 = arith.mulf %663, %664 : vector<8x1xf32>
    %666 = vector.broadcast %665 : vector<8x1xf32> to vector<8x128xf32>
    %667 = arith.addf %662, %666 : vector<8x128xf32>
    %668 = vector.extract_strided_slice %12 {offsets = [0, 5], sizes = [8, 1], strides = [1, 1]} : vector<8x6xf32> to vector<8x1xf32>
    %669 = vector.broadcast %643 : vector<1x1xf32> to vector<8x1xf32>
    %670 = arith.mulf %668, %669 : vector<8x1xf32>
    %671 = vector.broadcast %670 : vector<8x1xf32> to vector<8x128xf32>
    %672 = arith.addf %667, %671 : vector<8x128xf32>
    %673 = vector.extract_strided_slice %672 {offsets = [0, 0], sizes = [4, 128], strides = [1, 1]} : vector<8x128xf32> to vector<4x128xf32>
    %674 = vector.extract_strided_slice %672 {offsets = [4, 0], sizes = [2, 128], strides = [1, 1]} : vector<8x128xf32> to vector<2x128xf32>
    %675 = vector.extract_strided_slice %672 {offsets = [6, 0], sizes = [2, 128], strides = [1, 1]} : vector<8x128xf32> to vector<2x128xf32>
    %676 = arith.mulf %141, %673 : vector<4x128xf32>
    %677 = arith.mulf %285, %286 : vector<4x128xf32>
    %678 = arith.mulf %138, %677 : vector<4x128xf32>
    %679 = arith.subf %676, %678 : vector<4x128xf32>
    %680 = arith.mulf %135, %674 : vector<2x128xf32>
    %681 = arith.mulf %134, %675 : vector<2x128xf32>
    %682 = arith.addf %680, %681 : vector<2x128xf32>
    %683 = arith.mulf %289, %294 : vector<2x128xf32>
    %684 = arith.addf %682, %683 : vector<2x128xf32>
    %685 = arith.mulf %293, %290 : vector<2x128xf32>
    %686 = arith.addf %684, %685 : vector<2x128xf32>
    %687 = vector.extract_strided_slice %679 {offsets = [0, 0], sizes = [1, 128], strides = [1, 1]} : vector<4x128xf32> to vector<1x128xf32>
    %688 = vector.extract_strided_slice %679 {offsets = [1, 0], sizes = [1, 128], strides = [1, 1]} : vector<4x128xf32> to vector<1x128xf32>
    %689 = vector.extract_strided_slice %679 {offsets = [2, 0], sizes = [1, 128], strides = [1, 1]} : vector<4x128xf32> to vector<1x128xf32>
    %690 = vector.extract_strided_slice %679 {offsets = [3, 0], sizes = [1, 128], strides = [1, 1]} : vector<4x128xf32> to vector<1x128xf32>
    %691 = vector.extract_strided_slice %686 {offsets = [0, 0], sizes = [1, 128], strides = [1, 1]} : vector<2x128xf32> to vector<1x128xf32>
    %692 = vector.extract_strided_slice %686 {offsets = [1, 0], sizes = [1, 128], strides = [1, 1]} : vector<2x128xf32> to vector<1x128xf32>
    %693 = vector.extract_strided_slice %17 {offsets = [0, 0], sizes = [2, 1], strides = [1, 1]} : vector<2x6xf32> to vector<2x1xf32>
    %694 = vector.broadcast %693 : vector<2x1xf32> to vector<2x128xf32>
    %695 = vector.broadcast %687 : vector<1x128xf32> to vector<2x128xf32>
    %696 = arith.mulf %694, %695 : vector<2x128xf32>
    %697 = vector.extract_strided_slice %17 {offsets = [0, 1], sizes = [2, 1], strides = [1, 1]} : vector<2x6xf32> to vector<2x1xf32>
    %698 = vector.broadcast %697 : vector<2x1xf32> to vector<2x128xf32>
    %699 = vector.broadcast %688 : vector<1x128xf32> to vector<2x128xf32>
    %700 = arith.mulf %698, %699 : vector<2x128xf32>
    %701 = arith.addf %696, %700 : vector<2x128xf32>
    %702 = vector.extract_strided_slice %17 {offsets = [0, 2], sizes = [2, 1], strides = [1, 1]} : vector<2x6xf32> to vector<2x1xf32>
    %703 = vector.broadcast %702 : vector<2x1xf32> to vector<2x128xf32>
    %704 = vector.broadcast %689 : vector<1x128xf32> to vector<2x128xf32>
    %705 = arith.mulf %703, %704 : vector<2x128xf32>
    %706 = arith.addf %701, %705 : vector<2x128xf32>
    %707 = vector.extract_strided_slice %17 {offsets = [0, 3], sizes = [2, 1], strides = [1, 1]} : vector<2x6xf32> to vector<2x1xf32>
    %708 = vector.broadcast %707 : vector<2x1xf32> to vector<2x128xf32>
    %709 = vector.broadcast %690 : vector<1x128xf32> to vector<2x128xf32>
    %710 = arith.mulf %708, %709 : vector<2x128xf32>
    %711 = arith.addf %706, %710 : vector<2x128xf32>
    %712 = vector.extract_strided_slice %17 {offsets = [0, 4], sizes = [2, 1], strides = [1, 1]} : vector<2x6xf32> to vector<2x1xf32>
    %713 = vector.broadcast %712 : vector<2x1xf32> to vector<2x128xf32>
    %714 = vector.broadcast %691 : vector<1x128xf32> to vector<2x128xf32>
    %715 = arith.mulf %713, %714 : vector<2x128xf32>
    %716 = arith.addf %711, %715 : vector<2x128xf32>
    %717 = vector.extract_strided_slice %17 {offsets = [0, 5], sizes = [2, 1], strides = [1, 1]} : vector<2x6xf32> to vector<2x1xf32>
    %718 = vector.broadcast %717 : vector<2x1xf32> to vector<2x128xf32>
    %719 = vector.broadcast %692 : vector<1x128xf32> to vector<2x128xf32>
    %720 = arith.mulf %718, %719 : vector<2x128xf32>
    %721 = arith.addf %716, %720 : vector<2x128xf32>
    %722 = vector.extract_strided_slice %721 {offsets = [0, 0], sizes = [1, 128], strides = [1, 1]} : vector<2x128xf32> to vector<1x128xf32>
    %723 = vector.extract_strided_slice %721 {offsets = [1, 0], sizes = [1, 128], strides = [1, 1]} : vector<2x128xf32> to vector<1x128xf32>
    %724 = arith.mulf %722, %497 : vector<1x128xf32>
    %725 = arith.mulf %502, %507 : vector<1x128xf32>
    %726 = arith.mulf %503, %506 : vector<1x128xf32>
    %727 = arith.addf %725, %726 : vector<1x128xf32>
    %728 = arith.mulf %727, %498 : vector<1x128xf32>
    %729 = arith.subf %724, %728 : vector<1x128xf32>
    %730 = arith.mulf %488, %723 : vector<1x128xf32>
    %731 = arith.mulf %730, %498 : vector<1x128xf32>
    %732 = arith.subf %729, %731 : vector<1x128xf32>
    %cst_10 = arith.constant 2.000000e+00 : f32
    %733 = vector.broadcast %cst_10 : f32 to vector<1x128xf32>
    %734 = arith.mulf %733, %488 : vector<1x128xf32>
    %735 = arith.mulf %734, %506 : vector<1x128xf32>
    %736 = arith.mulf %735, %507 : vector<1x128xf32>
    %737 = arith.mulf %736, %499 : vector<1x128xf32>
    %738 = arith.addf %732, %737 : vector<1x128xf32>
    %739 = arith.mulf %493, %738 : vector<1x128xf32>
    %740 = arith.mulf %59, %59 : vector<4x1xf32>
    %cst_11 = arith.constant 0.000000e+00 : f32
    %741 = vector.broadcast %cst_11 : f32 to vector<4x1xf32>
    %742 = arith.subf %741, %740 : vector<4x1xf32>
    %743 = vector.broadcast %742 : vector<4x1xf32> to vector<4x128xf32>
    %744 = arith.mulf %51, %743 : vector<4x128xf32>
    %745 = arith.mulf %63, %67 : vector<2x1xf32>
    %746 = arith.mulf %67, %63 : vector<2x1xf32>
    %747 = arith.addf %745, %746 : vector<2x1xf32>
    %748 = vector.extract_strided_slice %744 {offsets = [0, 0], sizes = [1, 128], strides = [1, 1]} : vector<4x128xf32> to vector<1x128xf32>
    %749 = vector.extract_strided_slice %744 {offsets = [1, 0], sizes = [1, 128], strides = [1, 1]} : vector<4x128xf32> to vector<1x128xf32>
    %750 = vector.extract_strided_slice %744 {offsets = [2, 0], sizes = [1, 128], strides = [1, 1]} : vector<4x128xf32> to vector<1x128xf32>
    %751 = vector.extract_strided_slice %744 {offsets = [3, 0], sizes = [1, 128], strides = [1, 1]} : vector<4x128xf32> to vector<1x128xf32>
    %752 = vector.extract_strided_slice %747 {offsets = [0, 0], sizes = [1, 1], strides = [1, 1]} : vector<2x1xf32> to vector<1x1xf32>
    %753 = vector.extract_strided_slice %747 {offsets = [1, 0], sizes = [1, 1], strides = [1, 1]} : vector<2x1xf32> to vector<1x1xf32>
    %754 = vector.extract_strided_slice %12 {offsets = [0, 0], sizes = [8, 1], strides = [1, 1]} : vector<8x6xf32> to vector<8x1xf32>
    %755 = vector.broadcast %754 : vector<8x1xf32> to vector<8x128xf32>
    %756 = vector.broadcast %748 : vector<1x128xf32> to vector<8x128xf32>
    %757 = arith.mulf %755, %756 : vector<8x128xf32>
    %758 = vector.extract_strided_slice %12 {offsets = [0, 1], sizes = [8, 1], strides = [1, 1]} : vector<8x6xf32> to vector<8x1xf32>
    %759 = vector.broadcast %758 : vector<8x1xf32> to vector<8x128xf32>
    %760 = vector.broadcast %749 : vector<1x128xf32> to vector<8x128xf32>
    %761 = arith.mulf %759, %760 : vector<8x128xf32>
    %762 = arith.addf %757, %761 : vector<8x128xf32>
    %763 = vector.extract_strided_slice %12 {offsets = [0, 2], sizes = [8, 1], strides = [1, 1]} : vector<8x6xf32> to vector<8x1xf32>
    %764 = vector.broadcast %763 : vector<8x1xf32> to vector<8x128xf32>
    %765 = vector.broadcast %750 : vector<1x128xf32> to vector<8x128xf32>
    %766 = arith.mulf %764, %765 : vector<8x128xf32>
    %767 = arith.addf %762, %766 : vector<8x128xf32>
    %768 = vector.extract_strided_slice %12 {offsets = [0, 3], sizes = [8, 1], strides = [1, 1]} : vector<8x6xf32> to vector<8x1xf32>
    %769 = vector.broadcast %768 : vector<8x1xf32> to vector<8x128xf32>
    %770 = vector.broadcast %751 : vector<1x128xf32> to vector<8x128xf32>
    %771 = arith.mulf %769, %770 : vector<8x128xf32>
    %772 = arith.addf %767, %771 : vector<8x128xf32>
    %773 = vector.extract_strided_slice %12 {offsets = [0, 4], sizes = [8, 1], strides = [1, 1]} : vector<8x6xf32> to vector<8x1xf32>
    %774 = vector.broadcast %752 : vector<1x1xf32> to vector<8x1xf32>
    %775 = arith.mulf %773, %774 : vector<8x1xf32>
    %776 = vector.broadcast %775 : vector<8x1xf32> to vector<8x128xf32>
    %777 = arith.addf %772, %776 : vector<8x128xf32>
    %778 = vector.extract_strided_slice %12 {offsets = [0, 5], sizes = [8, 1], strides = [1, 1]} : vector<8x6xf32> to vector<8x1xf32>
    %779 = vector.broadcast %753 : vector<1x1xf32> to vector<8x1xf32>
    %780 = arith.mulf %778, %779 : vector<8x1xf32>
    %781 = vector.broadcast %780 : vector<8x1xf32> to vector<8x128xf32>
    %782 = arith.addf %777, %781 : vector<8x128xf32>
    %783 = vector.extract_strided_slice %782 {offsets = [0, 0], sizes = [4, 128], strides = [1, 1]} : vector<8x128xf32> to vector<4x128xf32>
    %784 = vector.extract_strided_slice %782 {offsets = [4, 0], sizes = [2, 128], strides = [1, 1]} : vector<8x128xf32> to vector<2x128xf32>
    %785 = vector.extract_strided_slice %782 {offsets = [6, 0], sizes = [2, 128], strides = [1, 1]} : vector<8x128xf32> to vector<2x128xf32>
    %786 = arith.mulf %141, %783 : vector<4x128xf32>
    %787 = arith.mulf %286, %286 : vector<4x128xf32>
    %788 = arith.mulf %138, %787 : vector<4x128xf32>
    %789 = arith.subf %786, %788 : vector<4x128xf32>
    %790 = arith.mulf %135, %784 : vector<2x128xf32>
    %791 = arith.mulf %134, %785 : vector<2x128xf32>
    %792 = arith.addf %790, %791 : vector<2x128xf32>
    %793 = arith.mulf %290, %294 : vector<2x128xf32>
    %794 = arith.addf %792, %793 : vector<2x128xf32>
    %795 = arith.mulf %294, %290 : vector<2x128xf32>
    %796 = arith.addf %794, %795 : vector<2x128xf32>
    %797 = vector.extract_strided_slice %789 {offsets = [0, 0], sizes = [1, 128], strides = [1, 1]} : vector<4x128xf32> to vector<1x128xf32>
    %798 = vector.extract_strided_slice %789 {offsets = [1, 0], sizes = [1, 128], strides = [1, 1]} : vector<4x128xf32> to vector<1x128xf32>
    %799 = vector.extract_strided_slice %789 {offsets = [2, 0], sizes = [1, 128], strides = [1, 1]} : vector<4x128xf32> to vector<1x128xf32>
    %800 = vector.extract_strided_slice %789 {offsets = [3, 0], sizes = [1, 128], strides = [1, 1]} : vector<4x128xf32> to vector<1x128xf32>
    %801 = vector.extract_strided_slice %796 {offsets = [0, 0], sizes = [1, 128], strides = [1, 1]} : vector<2x128xf32> to vector<1x128xf32>
    %802 = vector.extract_strided_slice %796 {offsets = [1, 0], sizes = [1, 128], strides = [1, 1]} : vector<2x128xf32> to vector<1x128xf32>
    %803 = vector.extract_strided_slice %17 {offsets = [0, 0], sizes = [2, 1], strides = [1, 1]} : vector<2x6xf32> to vector<2x1xf32>
    %804 = vector.broadcast %803 : vector<2x1xf32> to vector<2x128xf32>
    %805 = vector.broadcast %797 : vector<1x128xf32> to vector<2x128xf32>
    %806 = arith.mulf %804, %805 : vector<2x128xf32>
    %807 = vector.extract_strided_slice %17 {offsets = [0, 1], sizes = [2, 1], strides = [1, 1]} : vector<2x6xf32> to vector<2x1xf32>
    %808 = vector.broadcast %807 : vector<2x1xf32> to vector<2x128xf32>
    %809 = vector.broadcast %798 : vector<1x128xf32> to vector<2x128xf32>
    %810 = arith.mulf %808, %809 : vector<2x128xf32>
    %811 = arith.addf %806, %810 : vector<2x128xf32>
    %812 = vector.extract_strided_slice %17 {offsets = [0, 2], sizes = [2, 1], strides = [1, 1]} : vector<2x6xf32> to vector<2x1xf32>
    %813 = vector.broadcast %812 : vector<2x1xf32> to vector<2x128xf32>
    %814 = vector.broadcast %799 : vector<1x128xf32> to vector<2x128xf32>
    %815 = arith.mulf %813, %814 : vector<2x128xf32>
    %816 = arith.addf %811, %815 : vector<2x128xf32>
    %817 = vector.extract_strided_slice %17 {offsets = [0, 3], sizes = [2, 1], strides = [1, 1]} : vector<2x6xf32> to vector<2x1xf32>
    %818 = vector.broadcast %817 : vector<2x1xf32> to vector<2x128xf32>
    %819 = vector.broadcast %800 : vector<1x128xf32> to vector<2x128xf32>
    %820 = arith.mulf %818, %819 : vector<2x128xf32>
    %821 = arith.addf %816, %820 : vector<2x128xf32>
    %822 = vector.extract_strided_slice %17 {offsets = [0, 4], sizes = [2, 1], strides = [1, 1]} : vector<2x6xf32> to vector<2x1xf32>
    %823 = vector.broadcast %822 : vector<2x1xf32> to vector<2x128xf32>
    %824 = vector.broadcast %801 : vector<1x128xf32> to vector<2x128xf32>
    %825 = arith.mulf %823, %824 : vector<2x128xf32>
    %826 = arith.addf %821, %825 : vector<2x128xf32>
    %827 = vector.extract_strided_slice %17 {offsets = [0, 5], sizes = [2, 1], strides = [1, 1]} : vector<2x6xf32> to vector<2x1xf32>
    %828 = vector.broadcast %827 : vector<2x1xf32> to vector<2x128xf32>
    %829 = vector.broadcast %802 : vector<1x128xf32> to vector<2x128xf32>
    %830 = arith.mulf %828, %829 : vector<2x128xf32>
    %831 = arith.addf %826, %830 : vector<2x128xf32>
    %832 = vector.extract_strided_slice %831 {offsets = [0, 0], sizes = [1, 128], strides = [1, 1]} : vector<2x128xf32> to vector<1x128xf32>
    %833 = vector.extract_strided_slice %831 {offsets = [1, 0], sizes = [1, 128], strides = [1, 1]} : vector<2x128xf32> to vector<1x128xf32>
    %834 = arith.mulf %832, %497 : vector<1x128xf32>
    %835 = arith.mulf %503, %507 : vector<1x128xf32>
    %836 = arith.mulf %503, %507 : vector<1x128xf32>
    %837 = arith.addf %835, %836 : vector<1x128xf32>
    %838 = arith.mulf %837, %498 : vector<1x128xf32>
    %839 = arith.subf %834, %838 : vector<1x128xf32>
    %840 = arith.mulf %488, %833 : vector<1x128xf32>
    %841 = arith.mulf %840, %498 : vector<1x128xf32>
    %842 = arith.subf %839, %841 : vector<1x128xf32>
    %cst_12 = arith.constant 2.000000e+00 : f32
    %843 = vector.broadcast %cst_12 : f32 to vector<1x128xf32>
    %844 = arith.mulf %843, %488 : vector<1x128xf32>
    %845 = arith.mulf %844, %507 : vector<1x128xf32>
    %846 = arith.mulf %845, %507 : vector<1x128xf32>
    %847 = arith.mulf %846, %499 : vector<1x128xf32>
    %848 = arith.addf %842, %847 : vector<1x128xf32>
    %849 = arith.mulf %493, %848 : vector<1x128xf32>
    %850 = arith.mulf %56, %58 : vector<4x1xf32>
    %cst_13 = arith.constant 0.000000e+00 : f32
    %851 = vector.broadcast %cst_13 : f32 to vector<4x1xf32>
    %852 = arith.subf %851, %850 : vector<4x1xf32>
    %853 = vector.broadcast %852 : vector<4x1xf32> to vector<4x128xf32>
    %854 = arith.mulf %51, %853 : vector<4x128xf32>
    %855 = arith.mulf %60, %66 : vector<2x1xf32>
    %856 = arith.mulf %64, %62 : vector<2x1xf32>
    %857 = arith.addf %855, %856 : vector<2x1xf32>
    %858 = vector.extract_strided_slice %854 {offsets = [0, 0], sizes = [1, 128], strides = [1, 1]} : vector<4x128xf32> to vector<1x128xf32>
    %859 = vector.extract_strided_slice %854 {offsets = [1, 0], sizes = [1, 128], strides = [1, 1]} : vector<4x128xf32> to vector<1x128xf32>
    %860 = vector.extract_strided_slice %854 {offsets = [2, 0], sizes = [1, 128], strides = [1, 1]} : vector<4x128xf32> to vector<1x128xf32>
    %861 = vector.extract_strided_slice %854 {offsets = [3, 0], sizes = [1, 128], strides = [1, 1]} : vector<4x128xf32> to vector<1x128xf32>
    %862 = vector.extract_strided_slice %857 {offsets = [0, 0], sizes = [1, 1], strides = [1, 1]} : vector<2x1xf32> to vector<1x1xf32>
    %863 = vector.extract_strided_slice %857 {offsets = [1, 0], sizes = [1, 1], strides = [1, 1]} : vector<2x1xf32> to vector<1x1xf32>
    %864 = vector.extract_strided_slice %12 {offsets = [0, 0], sizes = [8, 1], strides = [1, 1]} : vector<8x6xf32> to vector<8x1xf32>
    %865 = vector.broadcast %864 : vector<8x1xf32> to vector<8x128xf32>
    %866 = vector.broadcast %858 : vector<1x128xf32> to vector<8x128xf32>
    %867 = arith.mulf %865, %866 : vector<8x128xf32>
    %868 = vector.extract_strided_slice %12 {offsets = [0, 1], sizes = [8, 1], strides = [1, 1]} : vector<8x6xf32> to vector<8x1xf32>
    %869 = vector.broadcast %868 : vector<8x1xf32> to vector<8x128xf32>
    %870 = vector.broadcast %859 : vector<1x128xf32> to vector<8x128xf32>
    %871 = arith.mulf %869, %870 : vector<8x128xf32>
    %872 = arith.addf %867, %871 : vector<8x128xf32>
    %873 = vector.extract_strided_slice %12 {offsets = [0, 2], sizes = [8, 1], strides = [1, 1]} : vector<8x6xf32> to vector<8x1xf32>
    %874 = vector.broadcast %873 : vector<8x1xf32> to vector<8x128xf32>
    %875 = vector.broadcast %860 : vector<1x128xf32> to vector<8x128xf32>
    %876 = arith.mulf %874, %875 : vector<8x128xf32>
    %877 = arith.addf %872, %876 : vector<8x128xf32>
    %878 = vector.extract_strided_slice %12 {offsets = [0, 3], sizes = [8, 1], strides = [1, 1]} : vector<8x6xf32> to vector<8x1xf32>
    %879 = vector.broadcast %878 : vector<8x1xf32> to vector<8x128xf32>
    %880 = vector.broadcast %861 : vector<1x128xf32> to vector<8x128xf32>
    %881 = arith.mulf %879, %880 : vector<8x128xf32>
    %882 = arith.addf %877, %881 : vector<8x128xf32>
    %883 = vector.extract_strided_slice %12 {offsets = [0, 4], sizes = [8, 1], strides = [1, 1]} : vector<8x6xf32> to vector<8x1xf32>
    %884 = vector.broadcast %862 : vector<1x1xf32> to vector<8x1xf32>
    %885 = arith.mulf %883, %884 : vector<8x1xf32>
    %886 = vector.broadcast %885 : vector<8x1xf32> to vector<8x128xf32>
    %887 = arith.addf %882, %886 : vector<8x128xf32>
    %888 = vector.extract_strided_slice %12 {offsets = [0, 5], sizes = [8, 1], strides = [1, 1]} : vector<8x6xf32> to vector<8x1xf32>
    %889 = vector.broadcast %863 : vector<1x1xf32> to vector<8x1xf32>
    %890 = arith.mulf %888, %889 : vector<8x1xf32>
    %891 = vector.broadcast %890 : vector<8x1xf32> to vector<8x128xf32>
    %892 = arith.addf %887, %891 : vector<8x128xf32>
    %893 = vector.extract_strided_slice %892 {offsets = [0, 0], sizes = [4, 128], strides = [1, 1]} : vector<8x128xf32> to vector<4x128xf32>
    %894 = vector.extract_strided_slice %892 {offsets = [4, 0], sizes = [2, 128], strides = [1, 1]} : vector<8x128xf32> to vector<2x128xf32>
    %895 = vector.extract_strided_slice %892 {offsets = [6, 0], sizes = [2, 128], strides = [1, 1]} : vector<8x128xf32> to vector<2x128xf32>
    %896 = arith.mulf %141, %893 : vector<4x128xf32>
    %897 = arith.mulf %283, %285 : vector<4x128xf32>
    %898 = arith.mulf %138, %897 : vector<4x128xf32>
    %899 = arith.subf %896, %898 : vector<4x128xf32>
    %900 = arith.mulf %135, %894 : vector<2x128xf32>
    %901 = arith.mulf %134, %895 : vector<2x128xf32>
    %902 = arith.addf %900, %901 : vector<2x128xf32>
    %903 = arith.mulf %287, %293 : vector<2x128xf32>
    %904 = arith.addf %902, %903 : vector<2x128xf32>
    %905 = arith.mulf %291, %289 : vector<2x128xf32>
    %906 = arith.addf %904, %905 : vector<2x128xf32>
    %907 = vector.extract_strided_slice %899 {offsets = [0, 0], sizes = [1, 128], strides = [1, 1]} : vector<4x128xf32> to vector<1x128xf32>
    %908 = vector.extract_strided_slice %899 {offsets = [1, 0], sizes = [1, 128], strides = [1, 1]} : vector<4x128xf32> to vector<1x128xf32>
    %909 = vector.extract_strided_slice %899 {offsets = [2, 0], sizes = [1, 128], strides = [1, 1]} : vector<4x128xf32> to vector<1x128xf32>
    %910 = vector.extract_strided_slice %899 {offsets = [3, 0], sizes = [1, 128], strides = [1, 1]} : vector<4x128xf32> to vector<1x128xf32>
    %911 = vector.extract_strided_slice %906 {offsets = [0, 0], sizes = [1, 128], strides = [1, 1]} : vector<2x128xf32> to vector<1x128xf32>
    %912 = vector.extract_strided_slice %906 {offsets = [1, 0], sizes = [1, 128], strides = [1, 1]} : vector<2x128xf32> to vector<1x128xf32>
    %913 = vector.extract_strided_slice %17 {offsets = [0, 0], sizes = [2, 1], strides = [1, 1]} : vector<2x6xf32> to vector<2x1xf32>
    %914 = vector.broadcast %913 : vector<2x1xf32> to vector<2x128xf32>
    %915 = vector.broadcast %907 : vector<1x128xf32> to vector<2x128xf32>
    %916 = arith.mulf %914, %915 : vector<2x128xf32>
    %917 = vector.extract_strided_slice %17 {offsets = [0, 1], sizes = [2, 1], strides = [1, 1]} : vector<2x6xf32> to vector<2x1xf32>
    %918 = vector.broadcast %917 : vector<2x1xf32> to vector<2x128xf32>
    %919 = vector.broadcast %908 : vector<1x128xf32> to vector<2x128xf32>
    %920 = arith.mulf %918, %919 : vector<2x128xf32>
    %921 = arith.addf %916, %920 : vector<2x128xf32>
    %922 = vector.extract_strided_slice %17 {offsets = [0, 2], sizes = [2, 1], strides = [1, 1]} : vector<2x6xf32> to vector<2x1xf32>
    %923 = vector.broadcast %922 : vector<2x1xf32> to vector<2x128xf32>
    %924 = vector.broadcast %909 : vector<1x128xf32> to vector<2x128xf32>
    %925 = arith.mulf %923, %924 : vector<2x128xf32>
    %926 = arith.addf %921, %925 : vector<2x128xf32>
    %927 = vector.extract_strided_slice %17 {offsets = [0, 3], sizes = [2, 1], strides = [1, 1]} : vector<2x6xf32> to vector<2x1xf32>
    %928 = vector.broadcast %927 : vector<2x1xf32> to vector<2x128xf32>
    %929 = vector.broadcast %910 : vector<1x128xf32> to vector<2x128xf32>
    %930 = arith.mulf %928, %929 : vector<2x128xf32>
    %931 = arith.addf %926, %930 : vector<2x128xf32>
    %932 = vector.extract_strided_slice %17 {offsets = [0, 4], sizes = [2, 1], strides = [1, 1]} : vector<2x6xf32> to vector<2x1xf32>
    %933 = vector.broadcast %932 : vector<2x1xf32> to vector<2x128xf32>
    %934 = vector.broadcast %911 : vector<1x128xf32> to vector<2x128xf32>
    %935 = arith.mulf %933, %934 : vector<2x128xf32>
    %936 = arith.addf %931, %935 : vector<2x128xf32>
    %937 = vector.extract_strided_slice %17 {offsets = [0, 5], sizes = [2, 1], strides = [1, 1]} : vector<2x6xf32> to vector<2x1xf32>
    %938 = vector.broadcast %937 : vector<2x1xf32> to vector<2x128xf32>
    %939 = vector.broadcast %912 : vector<1x128xf32> to vector<2x128xf32>
    %940 = arith.mulf %938, %939 : vector<2x128xf32>
    %941 = arith.addf %936, %940 : vector<2x128xf32>
    %942 = vector.extract_strided_slice %941 {offsets = [0, 0], sizes = [1, 128], strides = [1, 1]} : vector<2x128xf32> to vector<1x128xf32>
    %943 = vector.extract_strided_slice %941 {offsets = [1, 0], sizes = [1, 128], strides = [1, 1]} : vector<2x128xf32> to vector<1x128xf32>
    %944 = arith.mulf %942, %497 : vector<1x128xf32>
    %945 = arith.mulf %500, %506 : vector<1x128xf32>
    %946 = arith.mulf %502, %504 : vector<1x128xf32>
    %947 = arith.addf %945, %946 : vector<1x128xf32>
    %948 = arith.mulf %947, %498 : vector<1x128xf32>
    %949 = arith.subf %944, %948 : vector<1x128xf32>
    %950 = arith.mulf %488, %943 : vector<1x128xf32>
    %951 = arith.mulf %950, %498 : vector<1x128xf32>
    %952 = arith.subf %949, %951 : vector<1x128xf32>
    %cst_14 = arith.constant 2.000000e+00 : f32
    %953 = vector.broadcast %cst_14 : f32 to vector<1x128xf32>
    %954 = arith.mulf %953, %488 : vector<1x128xf32>
    %955 = arith.mulf %954, %504 : vector<1x128xf32>
    %956 = arith.mulf %955, %506 : vector<1x128xf32>
    %957 = arith.mulf %956, %499 : vector<1x128xf32>
    %958 = arith.addf %952, %957 : vector<1x128xf32>
    %959 = arith.mulf %493, %958 : vector<1x128xf32>
    %960 = arith.mulf %56, %59 : vector<4x1xf32>
    %cst_15 = arith.constant 0.000000e+00 : f32
    %961 = vector.broadcast %cst_15 : f32 to vector<4x1xf32>
    %962 = arith.subf %961, %960 : vector<4x1xf32>
    %963 = vector.broadcast %962 : vector<4x1xf32> to vector<4x128xf32>
    %964 = arith.mulf %51, %963 : vector<4x128xf32>
    %965 = arith.mulf %60, %67 : vector<2x1xf32>
    %966 = arith.mulf %64, %63 : vector<2x1xf32>
    %967 = arith.addf %965, %966 : vector<2x1xf32>
    %968 = vector.extract_strided_slice %964 {offsets = [0, 0], sizes = [1, 128], strides = [1, 1]} : vector<4x128xf32> to vector<1x128xf32>
    %969 = vector.extract_strided_slice %964 {offsets = [1, 0], sizes = [1, 128], strides = [1, 1]} : vector<4x128xf32> to vector<1x128xf32>
    %970 = vector.extract_strided_slice %964 {offsets = [2, 0], sizes = [1, 128], strides = [1, 1]} : vector<4x128xf32> to vector<1x128xf32>
    %971 = vector.extract_strided_slice %964 {offsets = [3, 0], sizes = [1, 128], strides = [1, 1]} : vector<4x128xf32> to vector<1x128xf32>
    %972 = vector.extract_strided_slice %967 {offsets = [0, 0], sizes = [1, 1], strides = [1, 1]} : vector<2x1xf32> to vector<1x1xf32>
    %973 = vector.extract_strided_slice %967 {offsets = [1, 0], sizes = [1, 1], strides = [1, 1]} : vector<2x1xf32> to vector<1x1xf32>
    %974 = vector.extract_strided_slice %12 {offsets = [0, 0], sizes = [8, 1], strides = [1, 1]} : vector<8x6xf32> to vector<8x1xf32>
    %975 = vector.broadcast %974 : vector<8x1xf32> to vector<8x128xf32>
    %976 = vector.broadcast %968 : vector<1x128xf32> to vector<8x128xf32>
    %977 = arith.mulf %975, %976 : vector<8x128xf32>
    %978 = vector.extract_strided_slice %12 {offsets = [0, 1], sizes = [8, 1], strides = [1, 1]} : vector<8x6xf32> to vector<8x1xf32>
    %979 = vector.broadcast %978 : vector<8x1xf32> to vector<8x128xf32>
    %980 = vector.broadcast %969 : vector<1x128xf32> to vector<8x128xf32>
    %981 = arith.mulf %979, %980 : vector<8x128xf32>
    %982 = arith.addf %977, %981 : vector<8x128xf32>
    %983 = vector.extract_strided_slice %12 {offsets = [0, 2], sizes = [8, 1], strides = [1, 1]} : vector<8x6xf32> to vector<8x1xf32>
    %984 = vector.broadcast %983 : vector<8x1xf32> to vector<8x128xf32>
    %985 = vector.broadcast %970 : vector<1x128xf32> to vector<8x128xf32>
    %986 = arith.mulf %984, %985 : vector<8x128xf32>
    %987 = arith.addf %982, %986 : vector<8x128xf32>
    %988 = vector.extract_strided_slice %12 {offsets = [0, 3], sizes = [8, 1], strides = [1, 1]} : vector<8x6xf32> to vector<8x1xf32>
    %989 = vector.broadcast %988 : vector<8x1xf32> to vector<8x128xf32>
    %990 = vector.broadcast %971 : vector<1x128xf32> to vector<8x128xf32>
    %991 = arith.mulf %989, %990 : vector<8x128xf32>
    %992 = arith.addf %987, %991 : vector<8x128xf32>
    %993 = vector.extract_strided_slice %12 {offsets = [0, 4], sizes = [8, 1], strides = [1, 1]} : vector<8x6xf32> to vector<8x1xf32>
    %994 = vector.broadcast %972 : vector<1x1xf32> to vector<8x1xf32>
    %995 = arith.mulf %993, %994 : vector<8x1xf32>
    %996 = vector.broadcast %995 : vector<8x1xf32> to vector<8x128xf32>
    %997 = arith.addf %992, %996 : vector<8x128xf32>
    %998 = vector.extract_strided_slice %12 {offsets = [0, 5], sizes = [8, 1], strides = [1, 1]} : vector<8x6xf32> to vector<8x1xf32>
    %999 = vector.broadcast %973 : vector<1x1xf32> to vector<8x1xf32>
    %1000 = arith.mulf %998, %999 : vector<8x1xf32>
    %1001 = vector.broadcast %1000 : vector<8x1xf32> to vector<8x128xf32>
    %1002 = arith.addf %997, %1001 : vector<8x128xf32>
    %1003 = vector.extract_strided_slice %1002 {offsets = [0, 0], sizes = [4, 128], strides = [1, 1]} : vector<8x128xf32> to vector<4x128xf32>
    %1004 = vector.extract_strided_slice %1002 {offsets = [4, 0], sizes = [2, 128], strides = [1, 1]} : vector<8x128xf32> to vector<2x128xf32>
    %1005 = vector.extract_strided_slice %1002 {offsets = [6, 0], sizes = [2, 128], strides = [1, 1]} : vector<8x128xf32> to vector<2x128xf32>
    %1006 = arith.mulf %141, %1003 : vector<4x128xf32>
    %1007 = arith.mulf %283, %286 : vector<4x128xf32>
    %1008 = arith.mulf %138, %1007 : vector<4x128xf32>
    %1009 = arith.subf %1006, %1008 : vector<4x128xf32>
    %1010 = arith.mulf %135, %1004 : vector<2x128xf32>
    %1011 = arith.mulf %134, %1005 : vector<2x128xf32>
    %1012 = arith.addf %1010, %1011 : vector<2x128xf32>
    %1013 = arith.mulf %287, %294 : vector<2x128xf32>
    %1014 = arith.addf %1012, %1013 : vector<2x128xf32>
    %1015 = arith.mulf %291, %290 : vector<2x128xf32>
    %1016 = arith.addf %1014, %1015 : vector<2x128xf32>
    %1017 = vector.extract_strided_slice %1009 {offsets = [0, 0], sizes = [1, 128], strides = [1, 1]} : vector<4x128xf32> to vector<1x128xf32>
    %1018 = vector.extract_strided_slice %1009 {offsets = [1, 0], sizes = [1, 128], strides = [1, 1]} : vector<4x128xf32> to vector<1x128xf32>
    %1019 = vector.extract_strided_slice %1009 {offsets = [2, 0], sizes = [1, 128], strides = [1, 1]} : vector<4x128xf32> to vector<1x128xf32>
    %1020 = vector.extract_strided_slice %1009 {offsets = [3, 0], sizes = [1, 128], strides = [1, 1]} : vector<4x128xf32> to vector<1x128xf32>
    %1021 = vector.extract_strided_slice %1016 {offsets = [0, 0], sizes = [1, 128], strides = [1, 1]} : vector<2x128xf32> to vector<1x128xf32>
    %1022 = vector.extract_strided_slice %1016 {offsets = [1, 0], sizes = [1, 128], strides = [1, 1]} : vector<2x128xf32> to vector<1x128xf32>
    %1023 = vector.extract_strided_slice %17 {offsets = [0, 0], sizes = [2, 1], strides = [1, 1]} : vector<2x6xf32> to vector<2x1xf32>
    %1024 = vector.broadcast %1023 : vector<2x1xf32> to vector<2x128xf32>
    %1025 = vector.broadcast %1017 : vector<1x128xf32> to vector<2x128xf32>
    %1026 = arith.mulf %1024, %1025 : vector<2x128xf32>
    %1027 = vector.extract_strided_slice %17 {offsets = [0, 1], sizes = [2, 1], strides = [1, 1]} : vector<2x6xf32> to vector<2x1xf32>
    %1028 = vector.broadcast %1027 : vector<2x1xf32> to vector<2x128xf32>
    %1029 = vector.broadcast %1018 : vector<1x128xf32> to vector<2x128xf32>
    %1030 = arith.mulf %1028, %1029 : vector<2x128xf32>
    %1031 = arith.addf %1026, %1030 : vector<2x128xf32>
    %1032 = vector.extract_strided_slice %17 {offsets = [0, 2], sizes = [2, 1], strides = [1, 1]} : vector<2x6xf32> to vector<2x1xf32>
    %1033 = vector.broadcast %1032 : vector<2x1xf32> to vector<2x128xf32>
    %1034 = vector.broadcast %1019 : vector<1x128xf32> to vector<2x128xf32>
    %1035 = arith.mulf %1033, %1034 : vector<2x128xf32>
    %1036 = arith.addf %1031, %1035 : vector<2x128xf32>
    %1037 = vector.extract_strided_slice %17 {offsets = [0, 3], sizes = [2, 1], strides = [1, 1]} : vector<2x6xf32> to vector<2x1xf32>
    %1038 = vector.broadcast %1037 : vector<2x1xf32> to vector<2x128xf32>
    %1039 = vector.broadcast %1020 : vector<1x128xf32> to vector<2x128xf32>
    %1040 = arith.mulf %1038, %1039 : vector<2x128xf32>
    %1041 = arith.addf %1036, %1040 : vector<2x128xf32>
    %1042 = vector.extract_strided_slice %17 {offsets = [0, 4], sizes = [2, 1], strides = [1, 1]} : vector<2x6xf32> to vector<2x1xf32>
    %1043 = vector.broadcast %1042 : vector<2x1xf32> to vector<2x128xf32>
    %1044 = vector.broadcast %1021 : vector<1x128xf32> to vector<2x128xf32>
    %1045 = arith.mulf %1043, %1044 : vector<2x128xf32>
    %1046 = arith.addf %1041, %1045 : vector<2x128xf32>
    %1047 = vector.extract_strided_slice %17 {offsets = [0, 5], sizes = [2, 1], strides = [1, 1]} : vector<2x6xf32> to vector<2x1xf32>
    %1048 = vector.broadcast %1047 : vector<2x1xf32> to vector<2x128xf32>
    %1049 = vector.broadcast %1022 : vector<1x128xf32> to vector<2x128xf32>
    %1050 = arith.mulf %1048, %1049 : vector<2x128xf32>
    %1051 = arith.addf %1046, %1050 : vector<2x128xf32>
    %1052 = vector.extract_strided_slice %1051 {offsets = [0, 0], sizes = [1, 128], strides = [1, 1]} : vector<2x128xf32> to vector<1x128xf32>
    %1053 = vector.extract_strided_slice %1051 {offsets = [1, 0], sizes = [1, 128], strides = [1, 1]} : vector<2x128xf32> to vector<1x128xf32>
    %1054 = arith.mulf %1052, %497 : vector<1x128xf32>
    %1055 = arith.mulf %500, %507 : vector<1x128xf32>
    %1056 = arith.mulf %503, %504 : vector<1x128xf32>
    %1057 = arith.addf %1055, %1056 : vector<1x128xf32>
    %1058 = arith.mulf %1057, %498 : vector<1x128xf32>
    %1059 = arith.subf %1054, %1058 : vector<1x128xf32>
    %1060 = arith.mulf %488, %1053 : vector<1x128xf32>
    %1061 = arith.mulf %1060, %498 : vector<1x128xf32>
    %1062 = arith.subf %1059, %1061 : vector<1x128xf32>
    %cst_16 = arith.constant 2.000000e+00 : f32
    %1063 = vector.broadcast %cst_16 : f32 to vector<1x128xf32>
    %1064 = arith.mulf %1063, %488 : vector<1x128xf32>
    %1065 = arith.mulf %1064, %504 : vector<1x128xf32>
    %1066 = arith.mulf %1065, %507 : vector<1x128xf32>
    %1067 = arith.mulf %1066, %499 : vector<1x128xf32>
    %1068 = arith.addf %1062, %1067 : vector<1x128xf32>
    %1069 = arith.mulf %493, %1068 : vector<1x128xf32>
    %1070 = arith.mulf %57, %58 : vector<4x1xf32>
    %cst_17 = arith.constant 0.000000e+00 : f32
    %1071 = vector.broadcast %cst_17 : f32 to vector<4x1xf32>
    %1072 = arith.subf %1071, %1070 : vector<4x1xf32>
    %1073 = vector.broadcast %1072 : vector<4x1xf32> to vector<4x128xf32>
    %1074 = arith.mulf %51, %1073 : vector<4x128xf32>
    %1075 = arith.mulf %61, %66 : vector<2x1xf32>
    %1076 = arith.mulf %65, %62 : vector<2x1xf32>
    %1077 = arith.addf %1075, %1076 : vector<2x1xf32>
    %1078 = vector.extract_strided_slice %1074 {offsets = [0, 0], sizes = [1, 128], strides = [1, 1]} : vector<4x128xf32> to vector<1x128xf32>
    %1079 = vector.extract_strided_slice %1074 {offsets = [1, 0], sizes = [1, 128], strides = [1, 1]} : vector<4x128xf32> to vector<1x128xf32>
    %1080 = vector.extract_strided_slice %1074 {offsets = [2, 0], sizes = [1, 128], strides = [1, 1]} : vector<4x128xf32> to vector<1x128xf32>
    %1081 = vector.extract_strided_slice %1074 {offsets = [3, 0], sizes = [1, 128], strides = [1, 1]} : vector<4x128xf32> to vector<1x128xf32>
    %1082 = vector.extract_strided_slice %1077 {offsets = [0, 0], sizes = [1, 1], strides = [1, 1]} : vector<2x1xf32> to vector<1x1xf32>
    %1083 = vector.extract_strided_slice %1077 {offsets = [1, 0], sizes = [1, 1], strides = [1, 1]} : vector<2x1xf32> to vector<1x1xf32>
    %1084 = vector.extract_strided_slice %12 {offsets = [0, 0], sizes = [8, 1], strides = [1, 1]} : vector<8x6xf32> to vector<8x1xf32>
    %1085 = vector.broadcast %1084 : vector<8x1xf32> to vector<8x128xf32>
    %1086 = vector.broadcast %1078 : vector<1x128xf32> to vector<8x128xf32>
    %1087 = arith.mulf %1085, %1086 : vector<8x128xf32>
    %1088 = vector.extract_strided_slice %12 {offsets = [0, 1], sizes = [8, 1], strides = [1, 1]} : vector<8x6xf32> to vector<8x1xf32>
    %1089 = vector.broadcast %1088 : vector<8x1xf32> to vector<8x128xf32>
    %1090 = vector.broadcast %1079 : vector<1x128xf32> to vector<8x128xf32>
    %1091 = arith.mulf %1089, %1090 : vector<8x128xf32>
    %1092 = arith.addf %1087, %1091 : vector<8x128xf32>
    %1093 = vector.extract_strided_slice %12 {offsets = [0, 2], sizes = [8, 1], strides = [1, 1]} : vector<8x6xf32> to vector<8x1xf32>
    %1094 = vector.broadcast %1093 : vector<8x1xf32> to vector<8x128xf32>
    %1095 = vector.broadcast %1080 : vector<1x128xf32> to vector<8x128xf32>
    %1096 = arith.mulf %1094, %1095 : vector<8x128xf32>
    %1097 = arith.addf %1092, %1096 : vector<8x128xf32>
    %1098 = vector.extract_strided_slice %12 {offsets = [0, 3], sizes = [8, 1], strides = [1, 1]} : vector<8x6xf32> to vector<8x1xf32>
    %1099 = vector.broadcast %1098 : vector<8x1xf32> to vector<8x128xf32>
    %1100 = vector.broadcast %1081 : vector<1x128xf32> to vector<8x128xf32>
    %1101 = arith.mulf %1099, %1100 : vector<8x128xf32>
    %1102 = arith.addf %1097, %1101 : vector<8x128xf32>
    %1103 = vector.extract_strided_slice %12 {offsets = [0, 4], sizes = [8, 1], strides = [1, 1]} : vector<8x6xf32> to vector<8x1xf32>
    %1104 = vector.broadcast %1082 : vector<1x1xf32> to vector<8x1xf32>
    %1105 = arith.mulf %1103, %1104 : vector<8x1xf32>
    %1106 = vector.broadcast %1105 : vector<8x1xf32> to vector<8x128xf32>
    %1107 = arith.addf %1102, %1106 : vector<8x128xf32>
    %1108 = vector.extract_strided_slice %12 {offsets = [0, 5], sizes = [8, 1], strides = [1, 1]} : vector<8x6xf32> to vector<8x1xf32>
    %1109 = vector.broadcast %1083 : vector<1x1xf32> to vector<8x1xf32>
    %1110 = arith.mulf %1108, %1109 : vector<8x1xf32>
    %1111 = vector.broadcast %1110 : vector<8x1xf32> to vector<8x128xf32>
    %1112 = arith.addf %1107, %1111 : vector<8x128xf32>
    %1113 = vector.extract_strided_slice %1112 {offsets = [0, 0], sizes = [4, 128], strides = [1, 1]} : vector<8x128xf32> to vector<4x128xf32>
    %1114 = vector.extract_strided_slice %1112 {offsets = [4, 0], sizes = [2, 128], strides = [1, 1]} : vector<8x128xf32> to vector<2x128xf32>
    %1115 = vector.extract_strided_slice %1112 {offsets = [6, 0], sizes = [2, 128], strides = [1, 1]} : vector<8x128xf32> to vector<2x128xf32>
    %1116 = arith.mulf %141, %1113 : vector<4x128xf32>
    %1117 = arith.mulf %284, %285 : vector<4x128xf32>
    %1118 = arith.mulf %138, %1117 : vector<4x128xf32>
    %1119 = arith.subf %1116, %1118 : vector<4x128xf32>
    %1120 = arith.mulf %135, %1114 : vector<2x128xf32>
    %1121 = arith.mulf %134, %1115 : vector<2x128xf32>
    %1122 = arith.addf %1120, %1121 : vector<2x128xf32>
    %1123 = arith.mulf %288, %293 : vector<2x128xf32>
    %1124 = arith.addf %1122, %1123 : vector<2x128xf32>
    %1125 = arith.mulf %292, %289 : vector<2x128xf32>
    %1126 = arith.addf %1124, %1125 : vector<2x128xf32>
    %1127 = vector.extract_strided_slice %1119 {offsets = [0, 0], sizes = [1, 128], strides = [1, 1]} : vector<4x128xf32> to vector<1x128xf32>
    %1128 = vector.extract_strided_slice %1119 {offsets = [1, 0], sizes = [1, 128], strides = [1, 1]} : vector<4x128xf32> to vector<1x128xf32>
    %1129 = vector.extract_strided_slice %1119 {offsets = [2, 0], sizes = [1, 128], strides = [1, 1]} : vector<4x128xf32> to vector<1x128xf32>
    %1130 = vector.extract_strided_slice %1119 {offsets = [3, 0], sizes = [1, 128], strides = [1, 1]} : vector<4x128xf32> to vector<1x128xf32>
    %1131 = vector.extract_strided_slice %1126 {offsets = [0, 0], sizes = [1, 128], strides = [1, 1]} : vector<2x128xf32> to vector<1x128xf32>
    %1132 = vector.extract_strided_slice %1126 {offsets = [1, 0], sizes = [1, 128], strides = [1, 1]} : vector<2x128xf32> to vector<1x128xf32>
    %1133 = vector.extract_strided_slice %17 {offsets = [0, 0], sizes = [2, 1], strides = [1, 1]} : vector<2x6xf32> to vector<2x1xf32>
    %1134 = vector.broadcast %1133 : vector<2x1xf32> to vector<2x128xf32>
    %1135 = vector.broadcast %1127 : vector<1x128xf32> to vector<2x128xf32>
    %1136 = arith.mulf %1134, %1135 : vector<2x128xf32>
    %1137 = vector.extract_strided_slice %17 {offsets = [0, 1], sizes = [2, 1], strides = [1, 1]} : vector<2x6xf32> to vector<2x1xf32>
    %1138 = vector.broadcast %1137 : vector<2x1xf32> to vector<2x128xf32>
    %1139 = vector.broadcast %1128 : vector<1x128xf32> to vector<2x128xf32>
    %1140 = arith.mulf %1138, %1139 : vector<2x128xf32>
    %1141 = arith.addf %1136, %1140 : vector<2x128xf32>
    %1142 = vector.extract_strided_slice %17 {offsets = [0, 2], sizes = [2, 1], strides = [1, 1]} : vector<2x6xf32> to vector<2x1xf32>
    %1143 = vector.broadcast %1142 : vector<2x1xf32> to vector<2x128xf32>
    %1144 = vector.broadcast %1129 : vector<1x128xf32> to vector<2x128xf32>
    %1145 = arith.mulf %1143, %1144 : vector<2x128xf32>
    %1146 = arith.addf %1141, %1145 : vector<2x128xf32>
    %1147 = vector.extract_strided_slice %17 {offsets = [0, 3], sizes = [2, 1], strides = [1, 1]} : vector<2x6xf32> to vector<2x1xf32>
    %1148 = vector.broadcast %1147 : vector<2x1xf32> to vector<2x128xf32>
    %1149 = vector.broadcast %1130 : vector<1x128xf32> to vector<2x128xf32>
    %1150 = arith.mulf %1148, %1149 : vector<2x128xf32>
    %1151 = arith.addf %1146, %1150 : vector<2x128xf32>
    %1152 = vector.extract_strided_slice %17 {offsets = [0, 4], sizes = [2, 1], strides = [1, 1]} : vector<2x6xf32> to vector<2x1xf32>
    %1153 = vector.broadcast %1152 : vector<2x1xf32> to vector<2x128xf32>
    %1154 = vector.broadcast %1131 : vector<1x128xf32> to vector<2x128xf32>
    %1155 = arith.mulf %1153, %1154 : vector<2x128xf32>
    %1156 = arith.addf %1151, %1155 : vector<2x128xf32>
    %1157 = vector.extract_strided_slice %17 {offsets = [0, 5], sizes = [2, 1], strides = [1, 1]} : vector<2x6xf32> to vector<2x1xf32>
    %1158 = vector.broadcast %1157 : vector<2x1xf32> to vector<2x128xf32>
    %1159 = vector.broadcast %1132 : vector<1x128xf32> to vector<2x128xf32>
    %1160 = arith.mulf %1158, %1159 : vector<2x128xf32>
    %1161 = arith.addf %1156, %1160 : vector<2x128xf32>
    %1162 = vector.extract_strided_slice %1161 {offsets = [0, 0], sizes = [1, 128], strides = [1, 1]} : vector<2x128xf32> to vector<1x128xf32>
    %1163 = vector.extract_strided_slice %1161 {offsets = [1, 0], sizes = [1, 128], strides = [1, 1]} : vector<2x128xf32> to vector<1x128xf32>
    %1164 = arith.mulf %1162, %497 : vector<1x128xf32>
    %1165 = arith.mulf %501, %506 : vector<1x128xf32>
    %1166 = arith.mulf %502, %505 : vector<1x128xf32>
    %1167 = arith.addf %1165, %1166 : vector<1x128xf32>
    %1168 = arith.mulf %1167, %498 : vector<1x128xf32>
    %1169 = arith.subf %1164, %1168 : vector<1x128xf32>
    %1170 = arith.mulf %488, %1163 : vector<1x128xf32>
    %1171 = arith.mulf %1170, %498 : vector<1x128xf32>
    %1172 = arith.subf %1169, %1171 : vector<1x128xf32>
    %cst_18 = arith.constant 2.000000e+00 : f32
    %1173 = vector.broadcast %cst_18 : f32 to vector<1x128xf32>
    %1174 = arith.mulf %1173, %488 : vector<1x128xf32>
    %1175 = arith.mulf %1174, %505 : vector<1x128xf32>
    %1176 = arith.mulf %1175, %506 : vector<1x128xf32>
    %1177 = arith.mulf %1176, %499 : vector<1x128xf32>
    %1178 = arith.addf %1172, %1177 : vector<1x128xf32>
    %1179 = arith.mulf %493, %1178 : vector<1x128xf32>
    %1180 = arith.mulf %57, %59 : vector<4x1xf32>
    %cst_19 = arith.constant 0.000000e+00 : f32
    %1181 = vector.broadcast %cst_19 : f32 to vector<4x1xf32>
    %1182 = arith.subf %1181, %1180 : vector<4x1xf32>
    %1183 = vector.broadcast %1182 : vector<4x1xf32> to vector<4x128xf32>
    %1184 = arith.mulf %51, %1183 : vector<4x128xf32>
    %1185 = arith.mulf %61, %67 : vector<2x1xf32>
    %1186 = arith.mulf %65, %63 : vector<2x1xf32>
    %1187 = arith.addf %1185, %1186 : vector<2x1xf32>
    %1188 = vector.extract_strided_slice %1184 {offsets = [0, 0], sizes = [1, 128], strides = [1, 1]} : vector<4x128xf32> to vector<1x128xf32>
    %1189 = vector.extract_strided_slice %1184 {offsets = [1, 0], sizes = [1, 128], strides = [1, 1]} : vector<4x128xf32> to vector<1x128xf32>
    %1190 = vector.extract_strided_slice %1184 {offsets = [2, 0], sizes = [1, 128], strides = [1, 1]} : vector<4x128xf32> to vector<1x128xf32>
    %1191 = vector.extract_strided_slice %1184 {offsets = [3, 0], sizes = [1, 128], strides = [1, 1]} : vector<4x128xf32> to vector<1x128xf32>
    %1192 = vector.extract_strided_slice %1187 {offsets = [0, 0], sizes = [1, 1], strides = [1, 1]} : vector<2x1xf32> to vector<1x1xf32>
    %1193 = vector.extract_strided_slice %1187 {offsets = [1, 0], sizes = [1, 1], strides = [1, 1]} : vector<2x1xf32> to vector<1x1xf32>
    %1194 = vector.extract_strided_slice %12 {offsets = [0, 0], sizes = [8, 1], strides = [1, 1]} : vector<8x6xf32> to vector<8x1xf32>
    %1195 = vector.broadcast %1194 : vector<8x1xf32> to vector<8x128xf32>
    %1196 = vector.broadcast %1188 : vector<1x128xf32> to vector<8x128xf32>
    %1197 = arith.mulf %1195, %1196 : vector<8x128xf32>
    %1198 = vector.extract_strided_slice %12 {offsets = [0, 1], sizes = [8, 1], strides = [1, 1]} : vector<8x6xf32> to vector<8x1xf32>
    %1199 = vector.broadcast %1198 : vector<8x1xf32> to vector<8x128xf32>
    %1200 = vector.broadcast %1189 : vector<1x128xf32> to vector<8x128xf32>
    %1201 = arith.mulf %1199, %1200 : vector<8x128xf32>
    %1202 = arith.addf %1197, %1201 : vector<8x128xf32>
    %1203 = vector.extract_strided_slice %12 {offsets = [0, 2], sizes = [8, 1], strides = [1, 1]} : vector<8x6xf32> to vector<8x1xf32>
    %1204 = vector.broadcast %1203 : vector<8x1xf32> to vector<8x128xf32>
    %1205 = vector.broadcast %1190 : vector<1x128xf32> to vector<8x128xf32>
    %1206 = arith.mulf %1204, %1205 : vector<8x128xf32>
    %1207 = arith.addf %1202, %1206 : vector<8x128xf32>
    %1208 = vector.extract_strided_slice %12 {offsets = [0, 3], sizes = [8, 1], strides = [1, 1]} : vector<8x6xf32> to vector<8x1xf32>
    %1209 = vector.broadcast %1208 : vector<8x1xf32> to vector<8x128xf32>
    %1210 = vector.broadcast %1191 : vector<1x128xf32> to vector<8x128xf32>
    %1211 = arith.mulf %1209, %1210 : vector<8x128xf32>
    %1212 = arith.addf %1207, %1211 : vector<8x128xf32>
    %1213 = vector.extract_strided_slice %12 {offsets = [0, 4], sizes = [8, 1], strides = [1, 1]} : vector<8x6xf32> to vector<8x1xf32>
    %1214 = vector.broadcast %1192 : vector<1x1xf32> to vector<8x1xf32>
    %1215 = arith.mulf %1213, %1214 : vector<8x1xf32>
    %1216 = vector.broadcast %1215 : vector<8x1xf32> to vector<8x128xf32>
    %1217 = arith.addf %1212, %1216 : vector<8x128xf32>
    %1218 = vector.extract_strided_slice %12 {offsets = [0, 5], sizes = [8, 1], strides = [1, 1]} : vector<8x6xf32> to vector<8x1xf32>
    %1219 = vector.broadcast %1193 : vector<1x1xf32> to vector<8x1xf32>
    %1220 = arith.mulf %1218, %1219 : vector<8x1xf32>
    %1221 = vector.broadcast %1220 : vector<8x1xf32> to vector<8x128xf32>
    %1222 = arith.addf %1217, %1221 : vector<8x128xf32>
    %1223 = vector.extract_strided_slice %1222 {offsets = [0, 0], sizes = [4, 128], strides = [1, 1]} : vector<8x128xf32> to vector<4x128xf32>
    %1224 = vector.extract_strided_slice %1222 {offsets = [4, 0], sizes = [2, 128], strides = [1, 1]} : vector<8x128xf32> to vector<2x128xf32>
    %1225 = vector.extract_strided_slice %1222 {offsets = [6, 0], sizes = [2, 128], strides = [1, 1]} : vector<8x128xf32> to vector<2x128xf32>
    %1226 = arith.mulf %141, %1223 : vector<4x128xf32>
    %1227 = arith.mulf %284, %286 : vector<4x128xf32>
    %1228 = arith.mulf %138, %1227 : vector<4x128xf32>
    %1229 = arith.subf %1226, %1228 : vector<4x128xf32>
    %1230 = arith.mulf %135, %1224 : vector<2x128xf32>
    %1231 = arith.mulf %134, %1225 : vector<2x128xf32>
    %1232 = arith.addf %1230, %1231 : vector<2x128xf32>
    %1233 = arith.mulf %288, %294 : vector<2x128xf32>
    %1234 = arith.addf %1232, %1233 : vector<2x128xf32>
    %1235 = arith.mulf %292, %290 : vector<2x128xf32>
    %1236 = arith.addf %1234, %1235 : vector<2x128xf32>
    %1237 = vector.extract_strided_slice %1229 {offsets = [0, 0], sizes = [1, 128], strides = [1, 1]} : vector<4x128xf32> to vector<1x128xf32>
    %1238 = vector.extract_strided_slice %1229 {offsets = [1, 0], sizes = [1, 128], strides = [1, 1]} : vector<4x128xf32> to vector<1x128xf32>
    %1239 = vector.extract_strided_slice %1229 {offsets = [2, 0], sizes = [1, 128], strides = [1, 1]} : vector<4x128xf32> to vector<1x128xf32>
    %1240 = vector.extract_strided_slice %1229 {offsets = [3, 0], sizes = [1, 128], strides = [1, 1]} : vector<4x128xf32> to vector<1x128xf32>
    %1241 = vector.extract_strided_slice %1236 {offsets = [0, 0], sizes = [1, 128], strides = [1, 1]} : vector<2x128xf32> to vector<1x128xf32>
    %1242 = vector.extract_strided_slice %1236 {offsets = [1, 0], sizes = [1, 128], strides = [1, 1]} : vector<2x128xf32> to vector<1x128xf32>
    %1243 = vector.extract_strided_slice %17 {offsets = [0, 0], sizes = [2, 1], strides = [1, 1]} : vector<2x6xf32> to vector<2x1xf32>
    %1244 = vector.broadcast %1243 : vector<2x1xf32> to vector<2x128xf32>
    %1245 = vector.broadcast %1237 : vector<1x128xf32> to vector<2x128xf32>
    %1246 = arith.mulf %1244, %1245 : vector<2x128xf32>
    %1247 = vector.extract_strided_slice %17 {offsets = [0, 1], sizes = [2, 1], strides = [1, 1]} : vector<2x6xf32> to vector<2x1xf32>
    %1248 = vector.broadcast %1247 : vector<2x1xf32> to vector<2x128xf32>
    %1249 = vector.broadcast %1238 : vector<1x128xf32> to vector<2x128xf32>
    %1250 = arith.mulf %1248, %1249 : vector<2x128xf32>
    %1251 = arith.addf %1246, %1250 : vector<2x128xf32>
    %1252 = vector.extract_strided_slice %17 {offsets = [0, 2], sizes = [2, 1], strides = [1, 1]} : vector<2x6xf32> to vector<2x1xf32>
    %1253 = vector.broadcast %1252 : vector<2x1xf32> to vector<2x128xf32>
    %1254 = vector.broadcast %1239 : vector<1x128xf32> to vector<2x128xf32>
    %1255 = arith.mulf %1253, %1254 : vector<2x128xf32>
    %1256 = arith.addf %1251, %1255 : vector<2x128xf32>
    %1257 = vector.extract_strided_slice %17 {offsets = [0, 3], sizes = [2, 1], strides = [1, 1]} : vector<2x6xf32> to vector<2x1xf32>
    %1258 = vector.broadcast %1257 : vector<2x1xf32> to vector<2x128xf32>
    %1259 = vector.broadcast %1240 : vector<1x128xf32> to vector<2x128xf32>
    %1260 = arith.mulf %1258, %1259 : vector<2x128xf32>
    %1261 = arith.addf %1256, %1260 : vector<2x128xf32>
    %1262 = vector.extract_strided_slice %17 {offsets = [0, 4], sizes = [2, 1], strides = [1, 1]} : vector<2x6xf32> to vector<2x1xf32>
    %1263 = vector.broadcast %1262 : vector<2x1xf32> to vector<2x128xf32>
    %1264 = vector.broadcast %1241 : vector<1x128xf32> to vector<2x128xf32>
    %1265 = arith.mulf %1263, %1264 : vector<2x128xf32>
    %1266 = arith.addf %1261, %1265 : vector<2x128xf32>
    %1267 = vector.extract_strided_slice %17 {offsets = [0, 5], sizes = [2, 1], strides = [1, 1]} : vector<2x6xf32> to vector<2x1xf32>
    %1268 = vector.broadcast %1267 : vector<2x1xf32> to vector<2x128xf32>
    %1269 = vector.broadcast %1242 : vector<1x128xf32> to vector<2x128xf32>
    %1270 = arith.mulf %1268, %1269 : vector<2x128xf32>
    %1271 = arith.addf %1266, %1270 : vector<2x128xf32>
    %1272 = vector.extract_strided_slice %1271 {offsets = [0, 0], sizes = [1, 128], strides = [1, 1]} : vector<2x128xf32> to vector<1x128xf32>
    %1273 = vector.extract_strided_slice %1271 {offsets = [1, 0], sizes = [1, 128], strides = [1, 1]} : vector<2x128xf32> to vector<1x128xf32>
    %1274 = arith.mulf %1272, %497 : vector<1x128xf32>
    %1275 = arith.mulf %501, %507 : vector<1x128xf32>
    %1276 = arith.mulf %503, %505 : vector<1x128xf32>
    %1277 = arith.addf %1275, %1276 : vector<1x128xf32>
    %1278 = arith.mulf %1277, %498 : vector<1x128xf32>
    %1279 = arith.subf %1274, %1278 : vector<1x128xf32>
    %1280 = arith.mulf %488, %1273 : vector<1x128xf32>
    %1281 = arith.mulf %1280, %498 : vector<1x128xf32>
    %1282 = arith.subf %1279, %1281 : vector<1x128xf32>
    %cst_20 = arith.constant 2.000000e+00 : f32
    %1283 = vector.broadcast %cst_20 : f32 to vector<1x128xf32>
    %1284 = arith.mulf %1283, %488 : vector<1x128xf32>
    %1285 = arith.mulf %1284, %505 : vector<1x128xf32>
    %1286 = arith.mulf %1285, %507 : vector<1x128xf32>
    %1287 = arith.mulf %1286, %499 : vector<1x128xf32>
    %1288 = arith.addf %1282, %1287 : vector<1x128xf32>
    %1289 = arith.mulf %493, %1288 : vector<1x128xf32>
    %1290 = vector.extract_strided_slice %0 {offsets = [0, 0], sizes = [1, 128], strides = [1, 1]} : vector<4x128xf32> to vector<1x128xf32>
    %1291 = vector.extract_strided_slice %0 {offsets = [1, 0], sizes = [1, 128], strides = [1, 1]} : vector<4x128xf32> to vector<1x128xf32>
    %1292 = arith.mulf %959, %1290 : vector<1x128xf32>
    %1293 = arith.mulf %1069, %1291 : vector<1x128xf32>
    %1294 = arith.addf %1292, %1293 : vector<1x128xf32>
    %1295 = arith.subf %514, %1294 : vector<1x128xf32>
    %1296 = arith.mulf %1179, %1290 : vector<1x128xf32>
    %1297 = arith.mulf %1289, %1291 : vector<1x128xf32>
    %1298 = arith.addf %1296, %1297 : vector<1x128xf32>
    %1299 = arith.subf %519, %1298 : vector<1x128xf32>
    %cst_21 = arith.constant 1.000000e-03 : f32
    %1300 = vector.broadcast %cst_21 : f32 to vector<1x128xf32>
    %1301 = arith.addf %629, %1300 : vector<1x128xf32>
    %cst_22 = arith.constant 1.000000e-03 : f32
    %1302 = vector.broadcast %cst_22 : f32 to vector<1x128xf32>
    %1303 = arith.addf %849, %1302 : vector<1x128xf32>
    %1304 = arith.mulf %1301, %1303 : vector<1x128xf32>
    %1305 = arith.mulf %739, %739 : vector<1x128xf32>
    %1306 = arith.subf %1304, %1305 : vector<1x128xf32>
    %cst_23 = arith.constant 1.000000e+00 : f32
    %1307 = vector.broadcast %cst_23 : f32 to vector<1x128xf32>
    %1308 = arith.divf %1307, %1306 : vector<1x128xf32>
    %1309 = arith.mulf %1303, %1295 : vector<1x128xf32>
    %1310 = arith.mulf %739, %1299 : vector<1x128xf32>
    %1311 = arith.subf %1309, %1310 : vector<1x128xf32>
    %1312 = arith.mulf %1311, %1308 : vector<1x128xf32>
    %1313 = arith.mulf %1301, %1299 : vector<1x128xf32>
    %1314 = arith.mulf %739, %1295 : vector<1x128xf32>
    %1315 = arith.subf %1313, %1314 : vector<1x128xf32>
    %1316 = arith.mulf %1315, %1308 : vector<1x128xf32>
    %c0_24 = arith.constant 0 : index
    %c0_25 = arith.constant 0 : index
    %1317 = vector.load %arg3[%c0_24, %c0_25] : memref<4x128xf32, #tpu.memory_space<vmem>>, vector<1x128xf32>
    tpu.vector_store %arg3[%c0_24, %c0_25], %1312 {strides = array<i32>} : memref<4x128xf32, #tpu.memory_space<vmem>>, vector<1x128xf32>,
    %c1 = arith.constant 1 : index
    %c0_26 = arith.constant 0 : index
    %1318 = vector.load %arg3[%c1, %c0_26] : memref<4x128xf32, #tpu.memory_space<vmem>>, vector<1x128xf32>
    tpu.vector_store %arg3[%c1, %c0_26], %1316 {strides = array<i32>} : memref<4x128xf32, #tpu.memory_space<vmem>>, vector<1x128xf32>,
    %c2 = arith.constant 2 : index
    %c0_27 = arith.constant 0 : index
    %1319 = vector.load %arg3[%c2, %c0_27] : memref<4x128xf32, #tpu.memory_space<vmem>>, vector<1x128xf32>
    tpu.vector_store %arg3[%c2, %c0_27], %509 {strides = array<i32>} : memref<4x128xf32, #tpu.memory_space<vmem>>, vector<1x128xf32>,
    %c3 = arith.constant 3 : index
    %c0_28 = arith.constant 0 : index
    %1320 = vector.load %arg3[%c3, %c0_28] : memref<4x128xf32, #tpu.memory_space<vmem>>, vector<1x128xf32>
    tpu.vector_store %arg3[%c3, %c0_28], %489 {strides = array<i32>} : memref<4x128xf32, #tpu.memory_space<vmem>>, vector<1x128xf32>,
    return
  }
  func.func @transform_0(%arg0: i32) -> (i32, i32) {
    %c0_i32 = arith.constant 0 : i32
    %c0_i32_0 = arith.constant 0 : i32
    return %c0_i32, %arg0 : i32, i32
  }
  func.func @transform_1(%arg0: i32) -> (i32, i32) {
    %c0_i32 = arith.constant 0 : i32
    %c0_i32_0 = arith.constant 0 : i32
    %c0_i32_1 = arith.constant 0 : i32
    return %c0_i32, %c0_i32_0 : i32, i32
  }
  func.func @transform_2(%arg0: i32) -> (i32, i32) {
    %c0_i32 = arith.constant 0 : i32
    %c0_i32_0 = arith.constant 0 : i32
    return %c0_i32, %arg0 : i32, i32
  }
}

</mosaic_0001>

<bundles_post_ra>
// kernel: leql_forward.1
= control target key start
LH: loop header
LB: loop body
LE: loop exit
PB: predicated region body
PF: predicated region fallthrough
CT: control target
= control target key end

     0   :  { %v2158_v0 = vmov 2   ;;  %v2159_v1 = vmov 0   ;;  %v2160_v3 = vmov 3   ;;  %v2161_v4 = vmov 1   ;;  %s2163_s11 = smov 8   ;;  %s2165_s12 = smov 127   ;;  %s3347_s1 = inlined_call_operand.vmem [shape: f32[8,128], index: 1, kind: input, shape index: {}]   ;;  %s3348_s0 = inlined_call_operand.vmem [shape: f32[4,128], index: 0, kind: input, shape index: {}]   ;;  %s3349_s2 = inlined_call_operand.vmem [shape: f32[4,128], index: 2, kind: output, shape index: {}]  }
   0x1   :  { %2116 = vset.pattern.permute.xlu1 %v2158_v0  ;;  %2114 = vset.pattern.permute.xlu0 %v2159_v1  ;;  %v2213_v2 = vld [vmem:[%s3347_s1] sm:$0xff]  ;;  %v2162_v5 = vmov 4   ;;  %v2164_v6 = vmov 10   ;;  %s2166_s13 = smov 7   ;;  %v2167_v9 = vmov 11   ;;  %s2168_s14 = smov 126   ;;  %v22_v14 = vlaneseq }
   0x2   :  { %45 = vperm.xlu1 %2116, %v2213_v2   ;;  %26 = vperm.xlu0 %2114, %v2213_v2   ;;  %v1201_v7 = vrot.slane %v2213_v2, 6  ;;  %v1047_v8 = vrot.slane %v2213_v2, 2  ;;  %s2169_s15 = smov 125   ;;  %v2170_v10 = vmov 13   ;;  %v2171_v11 = vmov 12   ;;  %s2175_s16 = smov 12  }
   0x3   :  { %v2172_v12 = vmov 16   ;;  %v3352_v13 = vmov 14   ;;  %v3350_v15 = vmov 15   ;;  %v2238_v16 = vshrl.u32 %v22_v14, 7  ;;  %s2176_s17 = smov 13   ;;  %s2177_s20 = smov 11  }
   0x4   :  { %v1049_v17 = vmul.f32 %v1047_v8, %v2213_v2  ;;  %v2256_v23 = vmul.f32 %v2213_v2, %v2213_v2  ;;  %v11_v30 = vld [vmem:[%s3348_s0] sm:$0xf]  ;;  %s2178_s21 = smov 14   ;;  %s2179_s22 = smov 15  }
   0x5   :  { %v2244_v18 = vsub.s32 4, %v2238_v16  ;;  %v2249_v21 = vsub.s32 5, %v2238_v16  ;;  %v2263_v25 = vsub.s32 0, %v2238_v16  ;;  %v2266_v26 = vsub.s32 1, %v2238_v16 }
   0x6   :  { %2117 = vset.pattern.permute.xlu1 %v2160_v3  ;;  %2115 = vset.pattern.permute.xlu0 %v2161_v4  ;;  %v1050_v19 = vadd.f32 %v1049_v17, %v1049_v17  ;;  %v1040_v24 = vsub.f32 0.0, %v2256_v23  ;;  %v2269_v27 = vsub.s32 2, %v2238_v16  ;;  %v2281_v33 = vsub.s32 3, %v2238_v16 }
   0x7   :  { %55 = vperm.xlu1 %2117, %v2213_v2   ;;  %35 = vperm.xlu0 %2115, %v2213_v2   ;;  %3382 = vst [vmem:[#allocation2_spill] sm:$0xff] %v2244_v18  ;;  %3383 = vst [vmem:[#allocation3_spill] sm:$0xff] %v2249_v21  ;;  %v32_v31 = vrot.slane %v11_v30, %v2263_v25  ;;  %v41_v32 = vrot.slane %v11_v30, %v2266_v26  ;;  %v2189_v23 = vmov 28   ;;  %vm24_vm9 = vcmp.lt.s32.totalorder %v2238_v16, 2 }
   0x8   :  { %v1077_v20 = vrot.slane %v1050_v19, %v2244_v18  ;;  %v1092_v22 = vrot.slane %v1050_v19, %v2249_v21  ;;  %v51_v34 = vrot.slane %v11_v30, %v2269_v27  ;;  %v61_v39 = vrot.slane %v11_v30, %v2281_v33 }
   0xb   :  { %2118 = vset.pattern.permute.xlu1 %v2162_v5  ;;  %14 = vrot.lane.b32.xlu0 %v2213_v2, %s2163_s11 }
   0xc   :  { %65 = vperm.xlu1 %2118, %v2213_v2   ;;  %2119 = vset.pattern.permute.xlu0 %v2164_v6 }
   0xf   :  { %1202 = vrot.lane.b32.xlu0 %v1201_v7, %s2165_s12 }
  0x10   :  { %18 = vrot.lane.b32.xlu1 %v2213_v2, %s2166_s13 }
  0x11   :  { %2120 = vset.pattern.permute.xlu1 %v2167_v9 }
  0x13   :  { %1480 = vrot.lane.b32.xlu0 %v1201_v7, %s2168_s14 }
  0x14   :  { %1197 = vrot.lane.b32.xlu1 %v1047_v8, %s2165_s12 }
  0x17   :  { %1476 = vrot.lane.b32.xlu0 %v1047_v8, %s2168_s14 }
  0x18   :  { %1633 = vrot.lane.b32.xlu1 %v1201_v7, %s2169_s15 }
  0x1b   :  { %328 = vperm.xlu0 %2119, %v2213_v2  }
  0x1c   :  { %1629 = vrot.lane.b32.xlu1 %v1047_v8, %s2169_s15 }
  0x1f   :  { %2122 = vset.pattern.permute.xlu0 %v2170_v10 }
  0x20   :  { %337 = vperm.xlu1 %2120, %v2213_v2   ;;  %357 = vperm.xlu0 %2122, %v2213_v2  }
  0x24   :  { %2121 = vset.pattern.permute.xlu1 %v2171_v11  ;;  %2125 = vset.pattern.permute.xlu0 %v2172_v12 }
  0x25   :  { %347 = vperm.xlu1 %2121, %v2213_v2  }
  0x29   :  { %2123 = vset.pattern.permute.xlu1 %v3352_v13 }
  0x2a   :  { %367 = vperm.xlu1 %2123, %v2213_v2  }
  0x2e   :  { %2124 = vset.pattern.permute.xlu1 %v3350_v15 }
  0x2f   :  { %377 = vperm.xlu1 %2124, %v2213_v2  }
  0x33   :  { %1186 = vrot.lane.b32.xlu1 %v2213_v2, %s2165_s12 }
  0x34   :  { %2126 = vset.pattern.permute.xlu1 %v2158_v0 }
  0x37   :  { %1465 = vrot.lane.b32.xlu1 %v2213_v2, %s2168_s14 }
  0x3b   :  { %1079 = vrot.lane.b32.xlu1 %v1077_v20, %s2175_s16 }
  0x3f   :  { %1094 = vrot.lane.b32.xlu1 %v1092_v22, %s2176_s17 }
  0x43   :  { %1380 = vrot.lane.b32.xlu1 %v1092_v22, %s2175_s16 }
  0x47   :  { %1043 = vperm.xlu1 %2126, %v1040_v24  }
  0x7d   :  { %v2271_v28 = vpop.permute.xlu1 %45  ;;  %v2273_v29 = vpop.permute.xlu0 %26 }
  0x7e   :  { %v33_v37 = vmul.f32 %v32_v31, %v2273_v29  ;;  %v52_v40 = vmul.f32 %v51_v34, %v2271_v28 }
  0x82   :  { %v2284_v35 = vpop.permute.xlu1 %55  ;;  %v2286_v36 = vpop.permute.xlu0 %35 }
  0x83   :  { %v42_v38 = vmul.f32 %v41_v32, %v2286_v36  ;;  %v62_v45 = vmul.f32 %v61_v39, %v2284_v35 }
  0x85   :  { %v43_v41 = vadd.f32 %v42_v38, %v33_v37 }
  0x86   :  { %v15_v42 = vpop.permute.xlu0 %14 }
  0x87   :  { %v66_v43 = vpop.permute.xlu1 %65  ;;  %v53_v44 = vadd.f32 %v52_v40, %v43_v41  ;;  %v17_v46 = vadd.f32 %v15_v42, %v2213_v2  ;;  %v3363_v41 = vmov 683565275  }
  0x89   :  { %v63_v47 = vadd.f32 %v62_v45, %v53_v44 }
  0x8a   :  { %v1203_v48 = vpop.permute.xlu0 %1202 }
  0x8b   :  { %v19_v49 = vpop.permute.xlu1 %18  ;;  %v1205_v50 = vmul.f32 %v1203_v48, %v2213_v2  ;;  %v2297_v52 = vadd.f32 %v66_v43, %v63_v47  ;;  %v3361_v43 = vmov 2475754826  }
  0x8c   :  { %v2295_v51 = vadd.f32 %v19_v49, %v17_v46  ;;  %v3359_v46 = vmov 2131351028   ;;  %v3357_v49 = vmov 2102212464  }
  0x8d   :  { %v1207_v53 = vrot.slane %v1205_v50, 2  ;;  %v72_v61 = vand.u32 2139095040, %v2297_v52  ;;  %vm71_vm7 = vcmp.lt.s32.totalorder %v2297_v52, 0 }
  0x8e   :  { %388 = vperm.xlu0 %2125, %v2295_v51   ;;  %v1481_v54 = vpop.permute.xlu0 %1480 }
  0x8f   :  { %v1198_v55 = vpop.permute.xlu1 %1197  ;;  %v1483_v56 = vmul.f32 %v1481_v54, %v2213_v2  ;;  %v73_v8 = vshrl.u32 %v72_v61, 23  ;;  %v3355_v54 = vmov 920167782  }
  0x90   :  { %v1200_v57 = vmul.f32 %v1198_v55, %v2213_v2 }
  0x91   :  { %v1485_v58 = vrot.slane %v1483_v56, 2  ;;  %v2053_v12 = vadd.s32 4294967169, %v73_v8 }
  0x92   :  { %v1209_v59 = vadd.f32 %v1207_v53, %v1200_v57  ;;  %1618 = vrot.lane.b32.xlu0 %v2213_v2, %s2169_s15  ;;  %v1477_v60 = vpop.permute.xlu0 %1476  ;;  %v3354_v57 = vmov 1326507024  }
  0x93   :  { %v1634_v62 = vpop.permute.xlu1 %1633  ;;  %v1479_v63 = vmul.f32 %v1477_v60, %v2213_v2  ;;  %2127 = vset.pattern.permute.xlu0 %v2160_v3  ;;  %v69_v3 = vand.u32 2147483647, %v2297_v52  ;;  %v79_v19 = vadd.s32 1, %v2053_v12 }
  0x94   :  { %v1636_v0 = vmul.f32 %v1634_v62, %v2213_v2  ;;  %v1236_v7 = vrot.slane %v1209_v59, %v2244_v18  ;;  %v1251_v17 = vrot.slane %v1209_v59, %v2249_v21 }
  0x95   :  { %v1487_v5 = vadd.f32 %v1485_v58, %v1479_v63  ;;  %vm80_vm0 = vcmp.gt.s32.totalorder %v79_v19, 0  ;;  %v76_v30 = vand.u32 8388607, %v69_v3  ;;  %vm70_vm8 = vcmp.le.f32.partialorder %v69_v3, 0.7853982 }
  0x96   :  { %v1638_v6 = vrot.slane %v1636_v0, 2  ;;  %1370 = vrot.lane.b32.xlu0 %v1077_v20, %s2177_s20  ;;  %v81_v31 = vsel %vm80_vm0, %v79_v19, 0  ;;  %v320_v3 = vrot.slane %v2284_v35, 2  ;;  %vm161_vm0 = vweird.f32 %v2297_v52 }
  0x97   :  { %v1630_v9 = vpop.permute.xlu1 %1629  ;;  %v1514_v10 = vrot.slane %v1487_v5, %v2244_v18  ;;  %v1529_v22 = vrot.slane %v1487_v5, %v2249_v21  ;;  %v83_v34 = vand.u32 31, %v81_v31  ;;  %v77_v39 = vor.u32 8388608, %v76_v30 }
  0x98   :  { %v1632_v11 = vmul.f32 %v1630_v9, %v2213_v2  ;;  %v82_v40 = vshrl.u32 %v81_v31, 5 }
  0x99   :  { %1516 = vrot.lane.b32.xlu1 %v1514_v10, %s2178_s21  ;;  %v84_v38 = vsub.s32 32, %v83_v34  ;;  %v86_v42 = vshll.u32 %v3363_v41, %v83_v34  ;;  %v89_v44 = vshll.u32 %v3361_v43, %v83_v34  ;;  %v92_v48 = vshll.u32 %v3359_v46, %v83_v34 }
  0x9a   :  { %v1640_v14 = vadd.f32 %v1638_v6, %v1632_v11  ;;  %1238 = vrot.lane.b32.xlu0 %v1236_v7, %s2175_s16  ;;  %v95_v53 = vshll.u32 %v3357_v49, %v83_v34  ;;  %v98_v56 = vshll.u32 %v3355_v54, %v83_v34  ;;  %v117_v5 = vshll.u32 %v77_v39, 8 }
  0x9b   :  { %v2315_v20 = vpop.permute.xlu1 %337  ;;  %v87_v45 = vshrl.u32 %v3361_v43, %v84_v38  ;;  %v90_v47 = vshrl.u32 %v3359_v46, %v84_v38  ;;  %v93_v50 = vshrl.u32 %v3357_v49, %v84_v38  ;;  %v96_v55 = vshrl.u32 %v3355_v54, %v84_v38 }
  0x9c   :  { %v1667_v32 = vrot.slane %v1640_v14, %v2244_v18  ;;  %v99_v58 = vshrl.u32 %v3354_v57, %v84_v38  ;;  %v1682_v6 = vrot.slane %v1640_v14, %v2249_v21  ;;  %vm101_vm1 = vcmp.lt.s32.totalorder %v82_v40, 1 }
  0x9d   :  { %1798 = vrot.lane.b32.xlu1 %v1236_v7, %s2176_s17  ;;  %v88_v59 = vor.u32 %v87_v45, %v86_v42  ;;  %v91_v60 = vor.u32 %v90_v47, %v89_v44  ;;  %v94_v61 = vor.u32 %v93_v50, %v92_v48  ;;  %v97_v63 = vor.u32 %v96_v55, %v95_v53 }
  0x9e   :  { %1253 = vrot.lane.b32.xlu0 %v1251_v17, %s2176_s17  ;;  %v100_v0 = vor.u32 %v99_v58, %v98_v56  ;;  %v85_v7 = vshrl.u32 %v3363_v41, %v84_v38  ;;  %vm104_vm2 = vcmp.lt.s32.totalorder %v82_v40, 4  ;;  %vm103_vm3 = vcmp.lt.s32.totalorder %v82_v40, 3 }
  0x9f   :  { %v106_v8 = vsel %vm104_vm2, %v94_v61, 2102212464  ;;  %v109_v9 = vsel %vm101_vm1, %v88_v59, %v91_v60  ;;  %v110_v11 = vsel %vm104_vm2, %v97_v63, 920167782  ;;  %vm102_vm4 = vcmp.lt.s32.totalorder %v82_v40, 2 }
  0xa0   :  { %v2323_v37 = vpop.permute.xlu1 %347  ;;  %v111_v12 = vsel %vm103_vm3, %v94_v61, %v110_v11  ;;  %v113_v19 = vsel %vm101_vm1, %v91_v60, %v94_v61  ;;  %v114_v30 = vsel %vm104_vm2, %v100_v0, 1326507024  ;;  %v2188_v0 = vmov 30  }
  0xa1   :  { %1531 = vrot.lane.b32.xlu1 %v1529_v22, %s2179_s22  ;;  %v112_v31 = vsel %vm102_vm4, %v109_v9, %v111_v12  ;;  %v2190_v9 = vmov 29  }
  0xa2   :  { %1669 = vrot.lane.b32.xlu0 %v1667_v32, %s2178_s21  ;;  %v115_v32 = vsel %vm103_vm3, %v97_v63, %v114_v30  ;;  %v2346_v38 = vmul.u32.u64.low %v117_v5, %v112_v31  ;;  %v2347_v39 = vmul.u32.u64.high %v117_v5, %v112_v31, %v2346_v38  ;;  %v2191_v30 = vmov 32  }
  0xa3   :  { %v116_v14 = vsel %vm102_vm4, %v113_v19, %v115_v32 }
  0xa4   :  { %v2349_v42 = vmul.u32.u64.low %v117_v5, %v116_v14  ;;  %v2350_v44 = vmul.u32.u64.high %v117_v5, %v116_v14, %v2349_v42  ;;  %v127_v47 = vadd.s32 1, %v2347_v39 }
  0xa5   :  { %v2337_v62 = vpop.permute.xlu1 %367  ;;  %1808 = vrot.lane.b32.xlu1 %v1251_v17, %s2178_s21  ;;  %v105_v17 = vsel %vm101_vm1, %v85_v7, %v88_v59  ;;  %v2186_v59 = vmov 27  }
  0xa6   :  { %1923 = vrot.lane.b32.xlu0 %v1514_v10, %s2176_s17  ;;  %v107_v10 = vsel %vm103_vm3, %v91_v60, %v106_v8  ;;  %vm126_vm5 = vc.u32 %v2350_v44, %v2346_v38  ;;  %v125_v31 = vadd.s32 %v2346_v38, %v2350_v44 }
  0xa7   :  { %v108_v45 = vsel %vm102_vm4, %v105_v17, %v107_v10  ;;  %v128_v55 = vsel %vm126_vm5, %v127_v47, %v2347_v39 }
  0xa8   :  { %v124_v50 = vmul.u32 %v117_v5, %v108_v45 }
  0xaa   :  { %v2343_v34 = vpop.permute.xlu1 %377  ;;  %1684 = vrot.lane.b32.xlu0 %v1682_v6, %s2179_s22  ;;  %v129_v56 = vadd.s32 %v128_v55, %v124_v50  ;;  %v290_v55 = vrot.slane %v2273_v29, 2 }
  0xac   :  { %v130_v58 = vadd.s32 536870912, %v129_v56 }
  0xae   :  { %v1187_v40 = vpop.permute.xlu1 %1186  ;;  %1933 = vrot.lane.b32.xlu0 %v1529_v22, %s2178_s21  ;;  %v131_v60 = vshrl.u32 %v130_v58, 30  ;;  %v2187_v22 = vmov 26   ;;  %v310_v58 = vrot.slane %v2271_v28, 2 }
  0xaf   :  { %v1189_v48 = vmul.f32 %v1187_v40, %v2213_v2 }
  0xb0   :  { %v132_v61 = vshll.u32 %v131_v60, 30  ;;  %v155_v44 = vsub.s32 4, %v131_v60 }
  0xb1   :  { %v1190_v53 = vsub.f32 0.0, %v1189_v48 }
  0xb2   :  { %1343 = vperm.xlu0 %2127, %v1040_v24   ;;  %v133_v63 = vsub.s32 %v129_v56, %v132_v61  ;;  %v1466_v24 = vpop.permute.xlu1 %1465  ;;  %v156_v61 = vsel %vm71_vm7, %v155_v44, %v131_v60 }
  0xb3   :  { %1193 = vperm.xlu1 %2126, %v1190_v53   ;;  %v2364_v7 = vmul.f32 %v1466_v24, %v2213_v2  ;;  %v287_v24 = vrot.slane %v2273_v29, 6 }
  0xb4   :  { %v135_v5 = vsub.s32 0, %v133_v63 }
  0xb5   :  { %v3365_v12 = vsub.f32 0.0, %v2364_v7  ;;  %v289_v60 = vmul.f32 %v287_v24, %v2297_v52 }
  0xb6   :  { %2129 = vset.pattern.permute.xlu0 %v2186_v59  ;;  %v2054_v6 = vmin.u32 %v135_v5, %v133_v63  ;;  %v1080_v19 = vpop.permute.xlu1 %1079  ;;  %v300_v59 = vrot.slane %v2286_v36, 2 }
  0xb7   :  { %804 = vperm.xlu0 %2129, %v2213_v2   ;;  %2128 = vset.pattern.permute.xlu1 %v2187_v22  ;;  %v1082_v14 = vmul.f32 %v1080_v19, %v2213_v2  ;;  %v292_v22 = vmul.f32 %v290_v55, %v2297_v52 }
  0xb8   :  { %795 = vperm.xlu1 %2128, %v2213_v2   ;;  %v137_v8 = vclz %v2054_v6  ;;  %v322_v6 = vmul.f32 %v320_v3, %v2297_v52 }
  0xb9   :  { %v294_v5 = vrot.slane %v292_v22, 6 }
  0xba   :  { %v2055_v11 = vadd.s32 4294967294, %v137_v8  ;;  %v307_v8 = vrot.slane %v2271_v28, 6 }
  0xbb   :  { %2132 = vset.pattern.permute.xlu0 %v2188_v0  ;;  %v312_v0 = vmul.f32 %v310_v58, %v2297_v52 }
  0xbc   :  { %834 = vperm.xlu0 %2132, %v2213_v2   ;;  %2130 = vset.pattern.permute.xlu1 %v2189_v23  ;;  %vm2056_vm6 = vcmp.lt.s32.totalorder %v2055_v11, 0  ;;  %v158_v23 = vsel %vm70_vm8, 0, %v156_v61 }
  0xbd   :  { %814 = vperm.xlu1 %2130, %v2213_v2   ;;  %v140_v17 = vsel %vm2056_vm6, 0, %v2055_v11  ;;  %v314_v19 = vrot.slane %v312_v0, 6 }
  0xbe   :  { %v141_v32 = vsub.s32 32, %v140_v17  ;;  %v145_v10 = vsub.s32 4294967266, %v140_v17  ;;  %v142_v39 = vshll.u32 %v133_v63, %v140_v17  ;;  %v302_v63 = vmul.f32 %v300_v59, %v2297_v52 }
  0xc0   :  { %2134 = vset.pattern.permute.xlu0 %v2161_v4  ;;  %v143_v42 = vshrl.u32 %v125_v31, %v141_v32  ;;  %v146_v45 = vadd.s32 127, %v145_v10  ;;  %v304_v11 = vrot.slane %v302_v63, 6  ;;  %v309_v31 = vmul.f32 %v307_v8, %v2297_v52 }
  0xc1   :  { %1771 = vperm.xlu0 %2134, %v1190_v53   ;;  %2131 = vset.pattern.permute.xlu1 %v2190_v9  ;;  %v297_v9 = vrot.slane %v2286_v36, 6  ;;  %v317_v32 = vrot.slane %v2284_v35, 6  ;;  %v2396_v10 = vsub.s32 6, %v2238_v16 }
  0xc2   :  { %824 = vperm.xlu1 %2131, %v2213_v2   ;;  %v144_v40 = vor.u32 %v143_v42, %v142_v39  ;;  %v147_v47 = vshll.u32 %v146_v45, 23  ;;  %v324_v39 = vrot.slane %v322_v6, 6  ;;  %v2398_v45 = vadd.f32 %v314_v19, %v309_v31 }
  0xc3   :  { %v299_v17 = vmul.f32 %v297_v9, %v2297_v52 }
  0xc5   :  { %2137 = vset.pattern.permute.xlu0 %v2191_v30  ;;  %v162_v30 = vadd.s32 3, %v158_v23  ;;  %v306_v42 = vadd.f32 %v304_v11, %v299_v17 }
  0xc6   :  { %854 = vperm.xlu0 %2137, %v2295_v51   ;;  %2133 = vset.pattern.permute.xlu1 %v2159_v1  ;;  %v148_v51 = vor.u32 4788187, %v147_v47  ;;  %v151_v1 = vcvt.s32.f32 %v144_v40  ;;  %v2401_v40 = vsub.s32 7, %v2238_v16  ;;  %v319_v47 = vmul.f32 %v317_v32, %v2297_v52 }
  0xc7   :  { %1472 = vperm.xlu1 %2133, %v3365_v12   ;;  %v667_v55 = vrot.slane %v306_v42, %v2396_v10 }
  0xc8   :  { %v149_v48 = vand.u32 2147483647, %v148_v51  ;;  %3384 = vst [vmem:[#allocation4_spill] sm:$0xff] %v2401_v40  ;;  %v163_v51 = vand.u32 3, %v162_v30  ;;  %v673_v8 = vrot.slane %v306_v42, %v2401_v40  ;;  %v708_v9 = vrot.slane %v2398_v45, %v2401_v40 }
  0xc9   :  { %v668_v42 = vmul.f32 %v667_v55, %v2337_v62 }
  0xca   :  { %2138 = vset.pattern.permute.xlu0 %v3352_v13  ;;  %v152_v50 = vmul.f32 %v151_v1, %v149_v48  ;;  %v266_v48 = vand.u32 3, %v158_v23  ;;  %v280_v1 = vrot.slane %v2297_v52, 2  ;;  %vm168_vm10 = vcmp.eq.s32.totalorder %v163_v51, 2 }
  0xcb   :  { %1085 = vperm.xlu0 %2138, %v1082_v14   ;;  %v296_v14 = vadd.f32 %v294_v5, %v289_v60  ;;  %vm165_vm12 = vcmp.eq.s32.totalorder %v163_v51, 0  ;;  %vm164_vm14 = vcmp.lt.s32.totalorder %v163_v51, 2  ;;  %v2442_v51 = vmul.f32 %v673_v8, %v2343_v34 }
  0xcc   :  { %v153_v38 = vxor.u32 2147483648, %v152_v50  ;;  %vm271_vm11 = vcmp.eq.s32.totalorder %v266_v48, 2  ;;  %v2414_v61 = vmul.f32 %v280_v1, %v2297_v52  ;;  %vm268_vm13 = vcmp.eq.s32.totalorder %v266_v48, 0  ;;  %v2446_v1 = vpop.permute.xlu0 %328 }
  0xcd   :  { %v632_v44 = vrot.slane %v296_v14, %v2396_v10  ;;  %v638_v58 = vrot.slane %v296_v14, %v2401_v40  ;;  %vm267_vm15 = vcmp.lt.s32.totalorder %v266_v48, 2 }
  0xce   :  { %v154_v53 = vsel %vm71_vm7, %v153_v38, %v152_v50  ;;  %v2405_v38 = vadd.f32 %v324_v39, %v319_v47  ;;  %v383_v39 = vrot.slane %v2414_v61, %v2249_v21 }
  0xcf   :  { %v157_v56 = vsel %vm70_vm8, %v2297_v52, %v154_v53  ;;  %v373_v52 = vrot.slane %v2414_v61, %v2244_v18  ;;  %v633_v31 = vmul.f32 %v632_v44, %v2337_v62  ;;  %v2439_v47 = vmul.f32 %v638_v58, %v2343_v34 }
  0xd0   :  { %2144 = vcosq.f32 %v157_v56  ;;  %v737_v24 = vrot.slane %v2405_v38, %v2396_v10  ;;  %v743_v60 = vrot.slane %v2405_v38, %v2401_v40  ;;  %v2484_v49 = vpop.permute.xlu0 %357 }
  0xd1   :  { %2146 = vsinq.f32 %v157_v56  ;;  %v702_v56 = vrot.slane %v2398_v45, %v2396_v10 }
  0xdd   :  { %v2145_v50 = vpop.eup %2144 }
  0xde   :  { %v2147_v53 = vpop.eup %2146  ;;  %v169_v59 = vxor.u32 2147483648, %v2145_v50 }
  0xdf   :  { %v166_v22 = vxor.u32 2147483648, %v2147_v53 }
  0xe0   :  { %v170_v63 = vsel %vm168_vm10, %v169_v59, %v2147_v53  ;;  %v273_v0 = vsel %vm271_vm11, %v169_v59, %v2147_v53 }
  0xe1   :  { %v167_v3 = vsel %vm165_vm12, %v2145_v50, %v166_v22  ;;  %v270_v23 = vsel %vm268_vm13, %v2145_v50, %v166_v22 }
  0xe2   :  { %v171_v5 = vsel %vm164_vm14, %v167_v3, %v170_v63  ;;  %v274_v6 = vsel %vm267_vm15, %v270_v23, %v273_v0 }
  0xe3   :  { %v172_v11 = vsel %vm161_vm0, nan, %v171_v5  ;;  %v275_v19 = vsel %vm161_vm0, nan, %v274_v6 }
  0xe4   :  { %v2426_v30 = vsel %vm24_vm9, %v172_v11, %v275_v19  ;;  %v277_v17 = vsub.f32 0.0, %v172_v11 }
  0xe5   :  { %v334_v32 = vrot.slane %v2426_v30, %v2263_v25  ;;  %v343_v14 = vrot.slane %v2426_v30, %v2266_v26  ;;  %v353_v55 = vrot.slane %v2426_v30, %v2269_v27  ;;  %v363_v63 = vrot.slane %v2426_v30, %v2281_v33 }
  0xe6   :  { %v278_v48 = vsel %vm24_vm9, %v275_v19, %v277_v17 }
  0xe7   :  { %v283_v50 = vmul.f32 %v278_v48, %v2273_v29  ;;  %v284_v44 = vmul.f32 %v278_v48, %v2286_v36  ;;  %v285_v53 = vmul.f32 %v278_v48, %v2271_v28  ;;  %v286_v58 = vmul.f32 %v278_v48, %v2284_v35 }
  0xe8   :  { %v335_v59 = vmul.f32 %v334_v32, %v2446_v1  ;;  %v344_v22 = vmul.f32 %v343_v14, %v2315_v20 }
  0xe9   :  { %v609_v0 = vrot.slane %v283_v50, %v2263_v25  ;;  %v614_v29 = vrot.slane %v283_v50, %v2266_v26  ;;  %v620_v36 = vrot.slane %v283_v50, %v2269_v27  ;;  %v644_v28 = vrot.slane %v284_v44, %v2263_v25 }
  0xea   :  { %v649_v3 = vrot.slane %v284_v44, %v2266_v26  ;;  %v655_v23 = vrot.slane %v284_v44, %v2269_v27  ;;  %v679_v35 = vrot.slane %v285_v53, %v2263_v25  ;;  %v684_v5 = vrot.slane %v285_v53, %v2266_v26 }
  0xeb   :  { %v610_v6 = vmul.f32 %v609_v0, %v2446_v1  ;;  %v615_v8 = vmul.f32 %v614_v29, %v2315_v20  ;;  %v621_v11 = vmul.f32 %v620_v36, %v2323_v37  ;;  %v645_v19 = vmul.f32 %v644_v28, %v2446_v1 }
  0xec   :  { %v650_v17 = vmul.f32 %v649_v3, %v2315_v20  ;;  %v656_v32 = vmul.f32 %v655_v23, %v2323_v37  ;;  %v680_v14 = vmul.f32 %v679_v35, %v2446_v1  ;;  %v685_v48 = vmul.f32 %v684_v5, %v2315_v20 }
  0xed   :  { %v690_v15 = vrot.slane %v285_v53, %v2269_v27  ;;  %v714_v13 = vrot.slane %v286_v58, %v2263_v25  ;;  %v719_v0 = vrot.slane %v286_v58, %v2266_v26  ;;  %v725_v29 = vrot.slane %v286_v58, %v2269_v27 }
  0xee   :  { %v616_v57 = vadd.f32 %v615_v8, %v610_v6  ;;  %v626_v36 = vrot.slane %v283_v50, %v2281_v33  ;;  %v651_v28 = vadd.f32 %v650_v17, %v645_v19  ;;  %v661_v3 = vrot.slane %v284_v44, %v2281_v33 }
  0xef   :  { %v691_v23 = vmul.f32 %v690_v15, %v2323_v37  ;;  %v715_v35 = vmul.f32 %v714_v13, %v2446_v1  ;;  %v720_v5 = vmul.f32 %v719_v0, %v2315_v20  ;;  %v726_v54 = vmul.f32 %v725_v29, %v2323_v37 }
  0xf0   :  { %v622_v46 = vadd.f32 %v621_v11, %v616_v57  ;;  %v627_v43 = vmul.f32 %v626_v36, %v2484_v49  ;;  %v657_v41 = vadd.f32 %v656_v32, %v651_v28  ;;  %v662_v6 = vmul.f32 %v661_v3, %v2484_v49 }
  0xf1   :  { %v686_v50 = vadd.f32 %v685_v48, %v680_v14  ;;  %v696_v8 = vrot.slane %v285_v53, %v2281_v33  ;;  %v721_v44 = vadd.f32 %v720_v5, %v715_v35  ;;  %v731_v15 = vrot.slane %v286_v58, %v2281_v33 }
  0xf2   :  { %v628_v19 = vadd.f32 %v627_v43, %v622_v46  ;;  %v663_v13 = vadd.f32 %v662_v6, %v657_v41  ;;  %v345_v17 = vadd.f32 %v344_v22, %v335_v59  ;;  %v354_v0 = vmul.f32 %v353_v55, %v2323_v37  ;;  %v1095_v22 = vpop.permute.xlu1 %1094 }
  0xf3   :  { %v692_v29 = vadd.f32 %v691_v23, %v686_v50  ;;  %v697_v12 = vmul.f32 %v696_v8, %v2484_v49  ;;  %v727_v57 = vadd.f32 %v726_v54, %v721_v44  ;;  %v732_v11 = vmul.f32 %v731_v15, %v2484_v49 }
  0xf4   :  { %v634_v32 = vadd.f32 %v633_v31, %v628_v19  ;;  %v669_v36 = vadd.f32 %v668_v42, %v663_v13  ;;  %v355_v28 = vadd.f32 %v354_v0, %v345_v17  ;;  %v364_v14 = vmul.f32 %v363_v63, %v2484_v49 }
  0xf5   :  { %v703_v43 = vmul.f32 %v702_v56, %v2337_v62  ;;  %v738_v41 = vmul.f32 %v737_v24, %v2337_v62  ;;  %v698_v46 = vadd.f32 %v697_v12, %v692_v29  ;;  %v733_v53 = vadd.f32 %v732_v11, %v727_v57 }
  0xf6   :  { %v2503_v54 = vadd.f32 %v2439_v47, %v634_v32  ;;  %v2506_v31 = vadd.f32 %v2442_v51, %v669_v36  ;;  %v365_v42 = vadd.f32 %v364_v14, %v355_v28  ;;  %v374_v55 = vmul.f32 %v373_v52, %v2337_v62  ;;  %v2600_v17 = vpop.permute.xlu1 %1380 }
  0xf7   :  { %v709_v56 = vmul.f32 %v708_v9, %v2343_v34  ;;  %v704_v24 = vadd.f32 %v703_v43, %v698_v46  ;;  %v739_v12 = vadd.f32 %v738_v41, %v733_v53  ;;  %v744_v47 = vmul.f32 %v743_v60, %v2343_v34 }
  0xf8   :  { %v375_v51 = vadd.f32 %v374_v55, %v365_v42  ;;  %v384_v58 = vmul.f32 %v383_v39, %v2343_v34  ;;  %v3394_v55 = vsub.f32 0.0, %v2364_v7 }
  0xf9   :  { %v2524_v59 = vadd.f32 %v709_v56, %v704_v24  ;;  %v2526_v52 = vadd.f32 %v744_v47, %v739_v12 }
  0xfa   :  { %v385_v62 = vadd.f32 %v384_v58, %v375_v51  ;;  %v2606_v32 = vpop.permute.xlu1 %1043  ;;  %v1097_v58 = vmul.f32 %v1095_v22, %v2213_v2 }
  0xfb   :  { %v2529_v45 = vrot.slane %v2524_v59, 2  ;;  %v2532_v9 = vrot.slane %v2524_v59, 6  ;;  %v2535_v38 = vrot.slane %v2526_v52, 6  ;;  %v2538_v60 = vrot.slane %v2526_v52, 2 }
  0xfc   :  { %v2542_v34 = vmul.f32 %v2526_v52, %v2524_v59  ;;  %v2546_v61 = vmul.f32 %v2524_v59, %v2503_v54  ;;  %v2566_v23 = vmul.f32 %v2526_v52, %v2506_v31  ;;  %v2578_v6 = vmul.f32 %v2526_v52, %v2503_v54 }
  0xfd   :  { %v2550_v39 = vmul.f32 %v2529_v45, %v2503_v54  ;;  %v2554_v63 = vmul.f32 %v2538_v60, %v2524_v59  ;;  %v2558_v48 = vmul.f32 %v2535_v38, %v2524_v59  ;;  %v2562_v3 = vmul.f32 %v2532_v9, %v2503_v54 }
  0xfe   :  { %v2570_v35 = vmul.f32 %v2538_v60, %v2506_v31  ;;  %v2574_v5 = vmul.f32 %v2535_v38, %v2506_v31  ;;  %v2582_v50 = vmul.f32 %v2538_v60, %v2503_v54  ;;  %v2586_v8 = vmul.f32 %v2535_v38, %v2503_v54 }
  0xff   :  { %3385 = vst [vmem:[#allocation5_spill] sm:$0xff] %v2550_v39  ;;  %3386 = vst [vmem:[#allocation6_spill] sm:$0xff] %v2558_v48  ;;  %v2590_v44 = vmul.f32 %v2524_v59, %v2506_v31  ;;  %v2594_v15 = vmul.f32 %v2529_v45, %v2506_v31  ;;  %v2598_v19 = vmul.f32 %v2532_v9, %v2506_v31 }
 0x100   :  { %3387 = vst [vmem:[#allocation7_spill] sm:$0xff] %v2562_v3  ;;  %3388 = vst [vmem:[#allocation8_spill] sm:$0xff] %v2570_v35 }
 0x101   :  { %3389 = vst [vmem:[#allocation9_spill] sm:$0xff] %v2574_v5  ;;  %3390 = vst [vmem:[#allocation10_spill] sm:$0xff] %v2582_v50 }
 0x102   :  { %3391 = vst [vmem:[#allocation11_spill] sm:$0xff] %v2586_v8  ;;  %3392 = vst [vmem:[#allocation12_spill] sm:$0xff] %v2594_v15  ;;  %v3400_v8 = vmov 1326507024  }
 0x103   :  { %3393 = vst [vmem:[#allocation13_spill] sm:$0xff] %v2598_v19  ;;  %v3399_v19 = vmov 920167782  }
 0x109   :  { %v389_v13 = vpop.permute.xlu0 %388 }
 0x10a   :  { %v2602_v0 = vadd.f32 %v389_v13, %v385_v62  ;;  %v2192_v13 = vmov 31  }
 0x10b   :  { %v2608_v41 = vpop.permute.xlu1 %1516 }
 0x10c   :  { %v395_v11 = vand.u32 2139095040, %v2602_v0  ;;  %v3366_v56 = vand.u32 2147483647, %v2602_v0  ;;  %vm394_vm8 = vcmp.lt.s32.totalorder %v2602_v0, 0 }
 0x10d   :  { %v1619_v29 = vpop.permute.xlu0 %1618 }
 0x10e   :  { %v1621_v57 = vmul.f32 %v1619_v29, %v2213_v2  ;;  %v396_v14 = vshrl.u32 %v395_v11, 23 }
 0x10f   :  { %v2617_v51 = vpop.permute.xlu1 %1798 }
 0x110   :  { %v1622_v36 = vsub.f32 0.0, %v1621_v57  ;;  %v2061_v43 = vadd.s32 4294967169, %v396_v14  ;;  %v3395_v57 = vmov 683565275  }
 0x111   :  { %v1371_v28 = vpop.permute.xlu0 %1370 }
 0x112   :  { %1625 = vperm.xlu1 %2133, %v1622_v36   ;;  %v402_v53 = vadd.s32 1, %v2061_v43  ;;  %v1373_v62 = vmul.f32 %v1371_v28, %v2213_v2  ;;  %v3396_v36 = vmov 2475754826   ;;  %v3397_v43 = vmov 2131351028  }
 0x114   :  { %vm403_vm1 = vcmp.gt.s32.totalorder %v402_v53, 0 }
 0x115   :  { %v1239_v46 = vpop.permute.xlu0 %1238  ;;  %v404_v24 = vsel %vm403_vm1, %v402_v53, 0  ;;  %vm484_vm1 = vweird.f32 %v2602_v0 }
 0x116   :  { %v1241_v42 = vmul.f32 %v1239_v46, %v2213_v2  ;;  %2135 = vset.pattern.permute.xlu1 %v2161_v4  ;;  %v406_v47 = vand.u32 31, %v404_v24  ;;  %v399_v4 = vand.u32 8388607, %v3366_v56  ;;  %v405_v29 = vshrl.u32 %v404_v24, 5 }
 0x117   :  { %1896 = vperm.xlu1 %2135, %v3394_v55  }
 0x118   :  { %1244 = vperm.xlu0 %2138, %v1241_v42   ;;  %v407_v7 = vsub.s32 32, %v406_v47  ;;  %v409_v11 = vshll.u32 %v3395_v57, %v406_v47  ;;  %v412_v14 = vshll.u32 %v3396_v36, %v406_v47  ;;  %v415_v46 = vshll.u32 %v3397_v43, %v406_v47 }
 0x119   :  { %v2615_v12 = vpop.permute.xlu0 %1253  ;;  %v3398_v42 = vmov 2102212464   ;;  %v421_v24 = vshll.u32 %v3399_v19, %v406_v47  ;;  %v400_v5 = vor.u32 8388608, %v399_v4  ;;  %vm424_vm2 = vcmp.lt.s32.totalorder %v405_v29, 1 }
 0x11a   :  { %v410_v22 = vshrl.u32 %v3396_v36, %v407_v7  ;;  %v413_v28 = vshrl.u32 %v3397_v43, %v407_v7  ;;  %v416_v55 = vshrl.u32 %v3398_v42, %v407_v7  ;;  %v419_v15 = vshrl.u32 %v3399_v19, %v407_v7  ;;  %v1532_v43 = vpop.permute.xlu1 %1531 }
 0x11b   :  { %2136 = vset.pattern.permute.xlu1 %v2192_v13  ;;  %v418_v13 = vshll.u32 %v3398_v42, %v406_v47  ;;  %v422_v50 = vshrl.u32 %v3400_v8, %v407_v7  ;;  %v3401_v36 = vmov 14   ;;  %vm427_vm3 = vcmp.lt.s32.totalorder %v405_v29, 4 }
 0x11c   :  { %844 = vperm.xlu1 %2136, %v2213_v2   ;;  %v411_v3 = vor.u32 %v410_v22, %v409_v11  ;;  %v414_v48 = vor.u32 %v413_v28, %v412_v14  ;;  %v417_v40 = vor.u32 %v416_v55, %v415_v46  ;;  %v408_v47 = vshrl.u32 %v3395_v57, %v407_v7 }
 0x11d   :  { %v1670_v53 = vpop.permute.xlu0 %1669  ;;  %v420_v21 = vor.u32 %v419_v15, %v418_v13  ;;  %v423_v18 = vor.u32 %v422_v50, %v421_v24  ;;  %vm426_vm4 = vcmp.lt.s32.totalorder %v405_v29, 3  ;;  %vm425_vm5 = vcmp.lt.s32.totalorder %v405_v29, 2 }
 0x11e   :  { %v1672_v56 = vmul.f32 %v1670_v53, %v2213_v2  ;;  %v1534_v53 = vmul.f32 %v1532_v43, %v2213_v2  ;;  %v429_v35 = vsel %vm427_vm3, %v417_v40, 2102212464  ;;  %v432_v19 = vsel %vm424_vm2, %v411_v3, %v414_v48 }
 0x11f   :  { %v436_v8 = vsel %vm424_vm2, %v414_v48, %v417_v40  ;;  %v437_v4 = vsel %vm427_vm3, %v423_v18, 1326507024  ;;  %v440_v50 = vshll.u32 %v400_v5, 8  ;;  %v3402_v14 = vmov 15  }
 0x120   :  { %1675 = vperm.xlu0 %2138, %v1672_v56   ;;  %2139 = vset.pattern.permute.xlu1 %v3401_v36  ;;  %v433_v56 = vsel %vm427_vm3, %v420_v21, 920167782  ;;  %v438_v15 = vsel %vm426_vm4, %v420_v21, %v437_v4  ;;  %v430_v46 = vsel %vm426_vm4, %v414_v48, %v429_v35 }
 0x121   :  { %v1924_v42 = vpop.permute.xlu0 %1923  ;;  %1376 = vperm.xlu1 %2139, %v1373_v62   ;;  %v434_v11 = vsel %vm426_vm4, %v417_v40, %v433_v56  ;;  %v428_v62 = vsel %vm424_vm2, %v408_v47, %v411_v3  ;;  %v439_v22 = vsel %vm425_vm5, %v436_v8, %v438_v15  ;;  %v2156_v40 = vld [vmem:[%s3347_s1] sm:$0xff]  ;;  %v1809_v15 = vpop.permute.xlu1 %1808 }
 0x122   :  { %v435_v2 = vsel %vm425_vm5, %v432_v19, %v434_v11  ;;  %v2643_v55 = vmul.u32.u64.low %v440_v50, %v439_v22  ;;  %v2644_v7 = vmul.u32.u64.high %v440_v50, %v439_v22, %v2643_v55  ;;  %v431_v21 = vsel %vm425_vm5, %v428_v62, %v430_v46 }
 0x123   :  { %v2646_v57 = vmul.u32.u64.low %v440_v50, %v435_v2  ;;  %v2647_v18 = vmul.u32.u64.high %v440_v50, %v435_v2, %v2646_v57  ;;  %v1383_v48 = vmul.f32 %v2156_v40, %v2600_v17  ;;  %v447_v29 = vmul.u32 %v440_v50, %v431_v21 }
 0x124   :  { %2142 = vset.pattern.permute.xlu0 %v3402_v14  ;;  %v1256_v24 = vmul.f32 %v2156_v40, %v2615_v12  ;;  %v1801_v19 = vmul.f32 %v2156_v40, %v2617_v51  ;;  %v1926_v47 = vmul.f32 %v2156_v40, %v1924_v42  ;;  %v1811_v62 = vmul.f32 %v2156_v40, %v1809_v15 }
 0x125   :  { %v1685_v28 = vpop.permute.xlu0 %1684  ;;  %2140 = vset.pattern.permute.xlu1 %v3402_v14  ;;  %1537 = vperm.xlu0 %2142, %v1534_v53   ;;  %vm449_vm6 = vc.u32 %v2644_v7, %v2646_v57  ;;  %v450_v35 = vadd.s32 1, %v2647_v18  ;;  %v1519_v53 = vmul.f32 %v2156_v40, %v2608_v41  ;;  %v448_v51 = vadd.s32 %v2646_v57, %v2644_v7 }
 0x126   :  { %1100 = vperm.xlu1 %2140, %v1097_v58   ;;  %v1687_v12 = vmul.f32 %v2156_v40, %v1685_v28  ;;  %v762_v15 = vrot.slane %v2506_v31, 6 }
 0x127   :  { %v451_v13 = vsel %vm449_vm6, %v450_v35, %v2647_v18 }
 0x128   :  { %v452_v58 = vadd.s32 %v451_v13, %v447_v29 }
 0x129   :  { %v1934_v3 = vpop.permute.xlu0 %1933 }
 0x12a   :  { %v1936_v5 = vmul.f32 %v2156_v40, %v1934_v3  ;;  %1386 = vperm.xlu1 %2140, %v1383_v48   ;;  %v453_v43 = vadd.s32 536870912, %v452_v58 }
 0x12c   :  { %1939 = vperm.xlu0 %2142, %v1936_v5   ;;  %v454_v17 = vshrl.u32 %v453_v43, 30  ;;  %v3403_v5 = vand.u32 2147483647, %v2602_v0  ;;  %v2669_v43 = vmul.f32 %v2606_v32, %v2426_v30 }
 0x12e   :  { %1259 = vperm.xlu1 %2140, %v1256_v24   ;;  %v455_v8 = vshll.u32 %v454_v17, 30  ;;  %v478_v40 = vsub.s32 4, %v454_v17  ;;  %vm393_vm10 = vcmp.le.f32.partialorder %v3403_v5, 0.7853982 }
 0x130   :  { %v456_v56 = vsub.s32 %v452_v58, %v455_v8  ;;  %v479_v57 = vsel %vm394_vm8, %v478_v40, %v454_v17  ;;  %v754_v58 = vrot.slane %v2503_v54, 2  ;;  %v765_v17 = vrot.slane %v2506_v31, 2 }
 0x131   :  { %v481_v13 = vsel %vm393_vm10, 0, %v479_v57  ;;  %v775_v57 = vmul.f32 %v2532_v9, %v2602_v0 }
 0x132   :  { %2141 = vset.pattern.permute.xlu1 %v3401_v36  ;;  %v458_v4 = vsub.s32 0, %v456_v56  ;;  %v485_v24 = vadd.s32 3, %v481_v13 }
 0x133   :  { %1522 = vperm.xlu1 %2141, %v1519_v53   ;;  %v756_v53 = vmul.f32 %v754_v58, %v2602_v0  ;;  %v1105_v58 = vmul.f32 %v2524_v59, %v2524_v59 }
 0x134   :  { %v2062_v11 = vmin.u32 %v458_v4, %v456_v56  ;;  %v486_v8 = vand.u32 3, %v485_v24 }
 0x136   :  { %v460_v50 = vclz %v2062_v11  ;;  %v1054_v11 = vrot.slane %v2669_v43, %v2263_v25  ;;  %vm491_vm11 = vcmp.eq.s32.totalorder %v486_v8, 2  ;;  %vm488_vm13 = vcmp.eq.s32.totalorder %v486_v8, 0 }
 0x137   :  { %1804 = vperm.xlu1 %2141, %v1801_v19   ;;  %v751_v19 = vrot.slane %v2503_v54, 6  ;;  %vm487_vm15 = vcmp.lt.s32.totalorder %v486_v8, 2  ;;  %v764_v8 = vmul.f32 %v762_v15, %v2602_v0 }
 0x138   :  { %v2063_v41 = vadd.s32 4294967294, %v460_v50 }
 0x139   :  { %v753_v32 = vmul.f32 %v751_v19, %v2602_v0 }
 0x13a   :  { %vm2064_vm7 = vcmp.lt.s32.totalorder %v2063_v41, 0 }
 0x13b   :  { %1929 = vperm.xlu1 %2141, %v1926_v47   ;;  %v463_v36 = vsel %vm2064_vm7, 0, %v2063_v41  ;;  %v589_v47 = vand.u32 3, %v481_v13  ;;  %v758_v41 = vrot.slane %v756_v53, 6  ;;  %v1391_v53 = vmul.f32 %v2526_v52, %v2526_v52 }
 0x13c   :  { %v464_v46 = vsub.s32 32, %v463_v36  ;;  %v468_v2 = vsub.s32 4294967266, %v463_v36  ;;  %v465_v22 = vshll.u32 %v456_v56, %v463_v36  ;;  %v778_v56 = vmul.f32 %v2529_v45, %v2602_v0 }
 0x13d   :  { %vm594_vm12 = vcmp.eq.s32.totalorder %v589_v47, 2  ;;  %vm591_vm14 = vcmp.eq.s32.totalorder %v589_v47, 0  ;;  %vm590_vm0 = vcmp.lt.s32.totalorder %v589_v47, 2  ;;  %v2704_v19 = vadd.f32 %v758_v41, %v753_v32 }
 0x13e   :  { %v466_v42 = vshrl.u32 %v448_v51, %v464_v46  ;;  %v469_v55 = vadd.s32 127, %v468_v2  ;;  %v789_v51 = vmul.f32 %v2538_v60, %v2602_v0  ;;  %v2685_v46 = vpop.permute.xlu0 %1343  ;;  %v2687_v2 = vpop.permute.xlu1 %1193  ;;  %v786_v47 = vmul.f32 %v2535_v38, %v2602_v0 }
 0x13f   :  { %2143 = vset.pattern.permute.xlu1 %v3402_v14  ;;  %v2728_v38 = vmul.f32 %v1054_v11, %v2446_v1 }
 0x140   :  { %1690 = vperm.xlu1 %2143, %v1687_v12   ;;  %v467_v18 = vor.u32 %v466_v42, %v465_v22  ;;  %v470_v21 = vshll.u32 %v469_v55, 23  ;;  %v1059_v12 = vrot.slane %v2669_v43, %v2266_v26  ;;  %v780_v22 = vrot.slane %v778_v56, 6 }
 0x142   :  { %v471_v28 = vor.u32 4788187, %v470_v21  ;;  %v474_v3 = vcvt.s32.f32 %v467_v18  ;;  %v2692_v40 = vpop.permute.xlu1 %795  ;;  %v2709_v56 = vadd.f32 %v780_v22, %v775_v57 }
 0x144   :  { %1814 = vperm.xlu1 %2143, %v1811_v62   ;;  %v472_v48 = vand.u32 2147483647, %v471_v28  ;;  %v767_v62 = vmul.f32 %v765_v17, %v2602_v0 }
 0x146   :  { %v475_v14 = vmul.f32 %v474_v3, %v472_v48  ;;  %v769_v48 = vrot.slane %v767_v62, 6 }
 0x148   :  { %v476_v35 = vxor.u32 2147483648, %v475_v14  ;;  %v2725_v15 = vadd.f32 %v769_v48, %v764_v8 }
 0x14a   :  { %v477_v29 = vsel %vm394_vm8, %v476_v35, %v475_v14  ;;  %v2690_v35 = vpop.permute.xlu0 %804 }
 0x14b   :  { %v480_v7 = vsel %vm393_vm10, %v2602_v0, %v477_v29 }
 0x14c   :  { %2148 = vcosq.f32 %v480_v7 }
 0x14d   :  { %2150 = vsinq.f32 %v480_v7  ;;  %v791_v7 = vrot.slane %v789_v51, 6  ;;  %v2749_v51 = vpop.permute.xlu1 %814 }
 0x14e   :  { %v2745_v11 = vpop.permute.xlu0 %834 }
 0x14f   :  { %v2733_v16 = vadd.f32 %v791_v7, %v786_v47 }
 0x159   :  { %v2149_v4 = vpop.eup %2148 }
 0x15a   :  { %v2151_v50 = vpop.eup %2150  ;;  %v492_v36 = vxor.u32 2147483648, %v2149_v4 }
 0x15b   :  { %v489_v42 = vxor.u32 2147483648, %v2151_v50 }
 0x15c   :  { %v493_v55 = vsel %vm491_vm11, %v492_v36, %v2151_v50  ;;  %v596_v18 = vsel %vm594_vm12, %v492_v36, %v2151_v50  ;;  %v2731_v50 = vmul.f32 %v1059_v12, %v2315_v20  ;;  %v884_v12 = vrot.slane %v2704_v19, %v2396_v10 }
 0x15d   :  { %v490_v21 = vsel %vm488_vm13, %v2149_v4, %v489_v42  ;;  %v593_v28 = vsel %vm591_vm14, %v2149_v4, %v489_v42 }
 0x15e   :  { %v494_v3 = vsel %vm487_vm15, %v490_v21, %v493_v55  ;;  %v597_v14 = vsel %vm590_vm0, %v593_v28, %v596_v18  ;;  %v954_v21 = vrot.slane %v2709_v56, %v2396_v10 }
 0x15f   :  { %v495_v5 = vsel %vm484_vm1, nan, %v494_v3  ;;  %v598_v29 = vsel %vm484_vm1, nan, %v597_v14 }
 0x160   :  { %v2698_v13 = vsel %vm24_vm9, %v495_v5, %v598_v29  ;;  %v600_v24 = vsub.f32 0.0, %v495_v5 }
 0x161   :  { %v2716_v17 = vmul.f32 %v1105_v58, %v2698_v13  ;;  %v2719_v4 = vmul.f32 %v1391_v53, %v2698_v13  ;;  %v2723_v32 = vmul.f32 %v2542_v34, %v2698_v13  ;;  %v2743_v36 = vmul.f32 %v2546_v61, %v2698_v13 }
 0x162   :  { %v2713_v9 = vsel %vm24_vm9, %v598_v29, %v600_v24  ;;  %v2759_v22 = vmul.f32 %v2578_v6, %v2698_v13  ;;  %v885_v6 = vmul.f32 %v884_v12, %v2745_v11  ;;  %v2782_v12 = vpop.permute.xlu1 %824 }
 0x163   :  { %v749_v41 = vmul.f32 %v2526_v52, %v2713_v9  ;;  %v746_v62 = vmul.f32 %v2503_v54, %v2713_v9  ;;  %v748_v34 = vmul.f32 %v2524_v59, %v2713_v9  ;;  %v747_v42 = vmul.f32 %v2506_v31, %v2713_v9 }
 0x164   :  { %v2755_v54 = vmul.f32 %v2566_v23, %v2698_v13  ;;  %3405 = vst [vmem:[#allocation15_spill] sm:$0xff] %v2759_v22  ;;  %v989_v31 = vrot.slane %v2733_v16, %v2396_v10 }
 0x165   :  { %v966_v61 = vrot.slane %v749_v41, %v2263_v25  ;;  %v971_v55 = vrot.slane %v749_v41, %v2266_v26  ;;  %v977_v18 = vrot.slane %v749_v41, %v2269_v27  ;;  %v861_v28 = vrot.slane %v746_v62, %v2263_v25 }
 0x166   :  { %3404 = vst [vmem:[#allocation14_spill] sm:$0xff] %v2755_v54  ;;  %v866_v23 = vrot.slane %v746_v62, %v2266_v26  ;;  %v872_v48 = vrot.slane %v746_v62, %v2269_v27  ;;  %v983_v5 = vrot.slane %v749_v41, %v2281_v33  ;;  %v990_v7 = vmul.f32 %v989_v31, %v2745_v11 }
 0x167   :  { %v967_v3 = vmul.f32 %v966_v61, %v2692_v40  ;;  %v972_v14 = vmul.f32 %v971_v55, %v2690_v35  ;;  %v978_v29 = vmul.f32 %v977_v18, %v2749_v51  ;;  %v862_v57 = vmul.f32 %v861_v28, %v2692_v40 }
 0x168   :  { %v867_v24 = vmul.f32 %v866_v23, %v2690_v35  ;;  %v878_v53 = vrot.slane %v746_v62, %v2281_v33  ;;  %v931_v8 = vrot.slane %v748_v34, %v2263_v25  ;;  %v936_v47 = vrot.slane %v748_v34, %v2266_v26 }
 0x169   :  { %v973_v58 = vadd.f32 %v972_v14, %v967_v3  ;;  %v873_v41 = vmul.f32 %v872_v48, %v2749_v51  ;;  %v942_v55 = vrot.slane %v748_v34, %v2269_v27  ;;  %v948_v18 = vrot.slane %v748_v34, %v2281_v33 }
 0x16a   :  { %v868_v61 = vadd.f32 %v867_v24, %v862_v57  ;;  %v984_v28 = vmul.f32 %v983_v5, %v2782_v12  ;;  %v932_v23 = vmul.f32 %v931_v8, %v2692_v40  ;;  %v937_v62 = vmul.f32 %v936_v47, %v2690_v35 }
 0x16b   :  { %v979_v31 = vadd.f32 %v978_v29, %v973_v58  ;;  %v879_v14 = vmul.f32 %v878_v53, %v2782_v12  ;;  %v943_v22 = vmul.f32 %v942_v55, %v2749_v51  ;;  %v896_v57 = vrot.slane %v747_v42, %v2263_v25 }
 0x16c   :  { %v874_v3 = vadd.f32 %v873_v41, %v868_v61  ;;  %v938_v48 = vadd.f32 %v937_v62, %v932_v23  ;;  %v901_v54 = vrot.slane %v747_v42, %v2266_v26  ;;  %v907_v34 = vrot.slane %v747_v42, %v2269_v27 }
 0x16d   :  { %v985_v24 = vadd.f32 %v984_v28, %v979_v31  ;;  %v949_v5 = vmul.f32 %v948_v18, %v2782_v12  ;;  %v897_v58 = vmul.f32 %v896_v57, %v2692_v40  ;;  %v2799_v8 = vmul.f32 %v2590_v44, %v2698_v13 }
 0x16e   :  { %v880_v29 = vadd.f32 %v879_v14, %v874_v3  ;;  %v944_v47 = vadd.f32 %v943_v22, %v938_v48  ;;  %v902_v61 = vmul.f32 %v901_v54, %v2690_v35  ;;  %v913_v41 = vrot.slane %v747_v42, %v2281_v33 }
 0x16f   :  { %3406 = vst [vmem:[#allocation16_spill] sm:$0xff] %v2799_v8  ;;  %v2801_v53 = vadd.f32 %v990_v7, %v985_v24  ;;  %v1065_v55 = vrot.slane %v2669_v43, %v2269_v27  ;;  %v955_v18 = vmul.f32 %v954_v21, %v2745_v11  ;;  %v908_v62 = vmul.f32 %v907_v34, %v2749_v51  ;;  %v1473_v34 = vpop.permute.xlu1 %1472 }
 0x170   :  { %v2807_v31 = vadd.f32 %v885_v6, %v880_v29  ;;  %v950_v28 = vadd.f32 %v949_v5, %v944_v47  ;;  %v903_v23 = vadd.f32 %v902_v61, %v897_v58  ;;  %v1061_v44 = vadd.f32 %v2731_v50, %v2728_v38 }
 0x171   :  { %v919_v22 = vrot.slane %v2725_v15, %v2396_v10  ;;  %v914_v7 = vmul.f32 %v913_v41, %v2782_v12  ;;  %v2820_v6 = vmul.f32 %v2685_v46, %v2426_v30  ;;  %v1071_v21 = vrot.slane %v2669_v43, %v2281_v33 }
 0x172   :  { %v2815_v54 = vadd.f32 %v955_v18, %v950_v28  ;;  %v909_v42 = vadd.f32 %v908_v62, %v903_v23  ;;  %v2826_v3 = vmul.f32 %v2687_v2, %v2426_v30  ;;  %v1066_v50 = vmul.f32 %v1065_v55, %v2323_v37  ;;  %v1772_v18 = vpop.permute.xlu0 %1771  ;;  %v3410_v28 = vld [vmem:[#allocation4_spill] sm:$0xff] }
 0x173   :  { %v920_v38 = vmul.f32 %v919_v22, %v2745_v11  ;;  %v603_v57 = vrot.slane %v2602_v0, 2  ;;  %v2833_v48 = vmul.f32 %v2529_v45, %v2524_v59  ;;  %v1350_v43 = vrot.slane %v2820_v6, %v2263_v25 }
 0x174   :  { %v915_v14 = vadd.f32 %v914_v7, %v909_v42  ;;  %v1067_v24 = vadd.f32 %v1066_v50, %v1061_v44  ;;  %v1355_v2 = vrot.slane %v2820_v6, %v2266_v26  ;;  %v801_v29 = vrot.slane %v2698_v13, %v2263_v25 }
 0x175   :  { %v810_v5 = vrot.slane %v2698_v13, %v2266_v26  ;;  %v1213_v58 = vrot.slane %v2826_v3, %v2263_v25  ;;  %v1218_v59 = vrot.slane %v2826_v3, %v2266_v26  ;;  %v1072_v45 = vmul.f32 %v1071_v21, %v2484_v49 }
 0x176   :  { %v2835_v46 = vadd.f32 %v920_v38, %v915_v14  ;;  %v2852_v47 = vmul.f32 %v2538_v60, %v2526_v52  ;;  %v2855_v61 = vmul.f32 %v603_v57, %v2602_v0  ;;  %v2858_v41 = vmul.f32 %v1473_v34, %v2426_v30  ;;  %v2896_v39 = vpop.permute.xlu0 %854 }
 0x177   :  { %v2860_v55 = vadd.f32 %v1072_v45, %v1067_v24  ;;  %v1351_v23 = vmul.f32 %v1350_v43, %v2446_v1  ;;  %v1356_v62 = vmul.f32 %v1355_v2, %v2315_v20  ;;  %v802_v44 = vmul.f32 %v801_v29, %v2692_v40  ;;  %v3408_v29 = vld [vmem:[#allocation2_spill] sm:$0xff] }
 0x178   :  { %v811_v52 = vmul.f32 %v810_v5, %v2690_v35  ;;  %v1214_v60 = vmul.f32 %v1213_v58, %v2446_v1  ;;  %v1219_v22 = vmul.f32 %v1218_v59, %v2315_v20  ;;  %v1224_v21 = vrot.slane %v2826_v3, %v2269_v27  ;;  %v3409_v58 = vld [vmem:[#allocation3_spill] sm:$0xff] }
 0x179   :  { %v1361_v38 = vrot.slane %v2820_v6, %v2269_v27  ;;  %v820_v50 = vrot.slane %v2698_v13, %v2269_v27  ;;  %v2879_v57 = vmul.f32 %v1772_v18, %v2426_v30  ;;  %v1491_v24 = vrot.slane %v2858_v41, %v2263_v25 }
 0x17a   :  { %v1496_v43 = vrot.slane %v2858_v41, %v2266_v26  ;;  %v840_v5 = vrot.slane %v2855_v61, %v3408_v29  ;;  %v850_v59 = vrot.slane %v2855_v61, %v3409_v58  ;;  %v1357_v45 = vadd.f32 %v1356_v62, %v1351_v23 }
 0x17b   :  { %v812_v7 = vadd.f32 %v811_v52, %v802_v44  ;;  %v1220_v14 = vadd.f32 %v1219_v22, %v1214_v60  ;;  %v1230_v18 = vrot.slane %v2826_v3, %v2281_v33  ;;  %v1367_v42 = vrot.slane %v2820_v6, %v2281_v33 }
 0x17c   :  { %v890_v8 = vrot.slane %v2704_v19, %v3410_v28  ;;  %v1225_v29 = vmul.f32 %v1224_v21, %v2323_v37  ;;  %v1362_v2 = vmul.f32 %v1361_v38, %v2323_v37  ;;  %v821_v61 = vmul.f32 %v820_v50, %v2749_v51 }
 0x17d   :  { %v830_v23 = vrot.slane %v2698_v13, %v2281_v33  ;;  %v1778_v3 = vrot.slane %v2879_v57, %v2263_v25  ;;  %v1783_v6 = vrot.slane %v2879_v57, %v2266_v26  ;;  %v1492_v19 = vmul.f32 %v1491_v24, %v2446_v1 }
 0x17e   :  { %v1497_v62 = vmul.f32 %v1496_v43, %v2315_v20  ;;  %v1363_v44 = vadd.f32 %v1362_v2, %v1357_v45  ;;  %v822_v52 = vadd.f32 %v821_v61, %v812_v7  ;;  %v960_v60 = vrot.slane %v2709_v56, %v3410_v28 }
 0x17f   :  { %v925_v22 = vrot.slane %v2725_v15, %v3410_v28  ;;  %v1226_v21 = vadd.f32 %v1225_v29, %v1220_v14  ;;  %v995_v13 = vrot.slane %v2733_v16, %v3410_v28  ;;  %v1502_v38 = vrot.slane %v2858_v41, %v2269_v27  ;;  %v1086_v29 = vpop.permute.xlu0 %1085 }
 0x180   :  { %v1789_v50 = vrot.slane %v2879_v57, %v2269_v27  ;;  %v1231_v7 = vmul.f32 %v1230_v18, %v2484_v49  ;;  %v1368_v56 = vmul.f32 %v1367_v42, %v2484_v49  ;;  %v831_v43 = vmul.f32 %v830_v23, %v2782_v12 }
 0x181   :  { %v1498_v14 = vadd.f32 %v1497_v62, %v1492_v19  ;;  %v1508_v16 = vrot.slane %v2858_v41, %v2281_v33  ;;  %v1779_v2 = vmul.f32 %v1778_v3, %v2446_v1  ;;  %v1784_v58 = vmul.f32 %v1783_v6, %v2315_v20 }
 0x182   :  { %v841_v45 = vmul.f32 %v840_v5, %v2745_v11  ;;  %v2931_v61 = vadd.f32 %v1368_v56, %v1363_v44  ;;  %v832_v18 = vadd.f32 %v831_v43, %v822_v52  ;;  %v1232_v42 = vadd.f32 %v1231_v7, %v1226_v21 }
 0x183   :  { %v1503_v23 = vmul.f32 %v1502_v38, %v2323_v37  ;;  %v2935_v19 = vmul.f32 %v1789_v50, %v2323_v37  ;;  %v1509_v44 = vmul.f32 %v1508_v16, %v2484_v49  ;;  %v2945_v52 = vadd.f32 %v1784_v58, %v1779_v2 }
 0x184   :  { %v842_v50 = vadd.f32 %v841_v45, %v832_v18 }
 0x185   :  { %v1504_v62 = vadd.f32 %v1503_v23, %v1498_v14 }
 0x18d   :  { %v1626_v34 = vpop.permute.xlu1 %1625 }
 0x18e   :  { %v2920_v24 = vmul.f32 %v1626_v34, %v2426_v30 }
 0x190   :  { %v1644_v41 = vrot.slane %v2920_v24, %v2263_v25  ;;  %v1649_v3 = vrot.slane %v2920_v24, %v2266_v26  ;;  %v1655_v38 = vrot.slane %v2920_v24, %v2269_v27 }
 0x192   :  { %v1897_v15 = vpop.permute.xlu1 %1896  ;;  %v1645_v16 = vmul.f32 %v1644_v41, %v2446_v1  ;;  %v1650_v2 = vmul.f32 %v1649_v3, %v2315_v20 }
 0x193   :  { %v1899_v34 = vmul.f32 %v1897_v15, %v2426_v30  ;;  %v1088_v30 = vadd.f32 %v1086_v29, %v2860_v55 }
 0x195   :  { %v1903_v5 = vrot.slane %v1899_v34, %v2263_v25  ;;  %v1908_v6 = vrot.slane %v1899_v34, %v2266_v26  ;;  %v1914_v14 = vrot.slane %v1899_v34, %v2269_v27  ;;  %v1920_v3 = vrot.slane %v1899_v34, %v2281_v33 }
 0x197   :  { %v2947_v21 = vpop.permute.xlu1 %844  ;;  %v1904_v7 = vmul.f32 %v1903_v5, %v2446_v1  ;;  %v1909_v56 = vmul.f32 %v1908_v6, %v2315_v20  ;;  %v2970_v1 = vadd.f32 %v1509_v44, %v1504_v62 }
 0x198   :  { %v851_v43 = vmul.f32 %v850_v59, %v2947_v21  ;;  %v996_v15 = vmul.f32 %v995_v13, %v2947_v21  ;;  %v891_v55 = vmul.f32 %v890_v8, %v2947_v21  ;;  %v961_v58 = vmul.f32 %v960_v60, %v2947_v21  ;;  %v1245_v60 = vpop.permute.xlu0 %1244 }
 0x199   :  { %v926_v45 = vmul.f32 %v925_v22, %v2947_v21  ;;  %v1910_v59 = vadd.f32 %v1909_v56, %v1904_v7  ;;  %v1661_v8 = vrot.slane %v2920_v24, %v2281_v33  ;;  %v1651_v24 = vadd.f32 %v1650_v2, %v1645_v16 }
 0x19a   :  { %v852_v29 = vadd.f32 %v851_v43, %v842_v50  ;;  %v997_v18 = vadd.f32 %v996_v15, %v2801_v53  ;;  %v2963_v23 = vadd.f32 %v891_v55, %v2807_v31  ;;  %v2968_v13 = vadd.f32 %v961_v58, %v2815_v54 }
 0x19b   :  { %v2973_v20 = vadd.f32 %v926_v45, %v2835_v46  ;;  %v1915_v31 = vmul.f32 %v1914_v14, %v2323_v37  ;;  %v1656_v54 = vmul.f32 %v1655_v38, %v2323_v37  ;;  %v2999_v37 = vadd.f32 %v1245_v60, %v1232_v42 }
 0x19c   :  { %3411 = vst [vmem:[#allocation2_spill] sm:$0xff] %v2963_v23  ;;  %3412 = vst [vmem:[#allocation3_spill] sm:$0xff] %v2968_v13  ;;  %v1377_v22 = vpop.permute.xlu1 %1376  ;;  %v2976_v41 = vadd.f32 %v2896_v39, %v852_v29  ;;  %v2978_v53 = vrot.slane %v997_v18, 1  ;;  %v2984_v5 = vrot.slane %v2963_v23, 1  ;;  %v2987_v46 = vrot.slane %v2968_v13, 1 }
 0x19d   :  { %3413 = vst [vmem:[#allocation4_spill] sm:$0xff] %v2973_v20  ;;  %v1916_v62 = vadd.f32 %v1915_v31, %v1910_v59  ;;  %v3002_v34 = vmul.f32 %v1661_v8, %v2484_v49  ;;  %v3013_v7 = vrot.slane %v2973_v20, 1  ;;  %v1921_v42 = vmul.f32 %v1920_v3, %v2484_v49 }
 0x19e   :  { %3414 = vst [vmem:[#allocation17_spill] sm:$0xff] %v2984_v5  ;;  %vm998_vm9 = vcmp.gt.f32.partialorder %v2976_v41, 0.5  ;;  %v2991_v39 = vmul.f32 2.0, %v2976_v41  ;;  %v1324_v6 = vmul.f32 %v2978_v53, %v2968_v13  ;;  %2048 = vst [vmem:[%s3349_s2 + $0x2] sm:$0x2] %v2976_v41  ;;  %v1325_v38 = vmul.f32 %v2987_v46, %v997_v18 }
 0x19f   :  { %v1001_v44 = vsel %vm998_vm9, %v2976_v41, 1.0  ;;  %3415 = vst [vmem:[#allocation18_spill] sm:$0xff] %v3013_v7  ;;  %v3016_v56 = vadd.f32 %v1656_v54, %v1651_v24  ;;  %v1599_v55 = vmul.f32 %v2987_v46, %v2963_v23  ;;  %v1600_v14 = vmul.f32 %v2984_v5, %v2968_v13 }
 0x1a0   :  { %2152 = vrcp.f32 %v1001_v44  ;;  %v3010_v50 = vmul.f32 %v2991_v39, %v2987_v46  ;;  %v3018_v15 = vadd.f32 %v1325_v38, %v1324_v6  ;;  %v1379_v16 = vadd.f32 %v1377_v22, %v2931_v61 }
 0x1a1   :  { %v1101_v43 = vpop.permute.xlu1 %1100  ;;  %v3029_v45 = vadd.f32 %v1921_v42, %v1916_v62  ;;  %v3031_v29 = vadd.f32 %v1600_v14, %v1599_v55  ;;  %v1610_v59 = vmul.f32 %v2991_v39, %v2984_v5  ;;  %v3037_v8 = vmul.f32 %v2991_v39, %v3013_v7 }
 0x1a2   :  { %v1103_v2 = vadd.f32 %v1101_v43, %v1088_v30  ;;  %v3027_v58 = vmul.f32 %v2978_v53, %v3010_v50  ;;  %v2001_v60 = vmul.f32 %v2978_v53, %v2973_v20  ;;  %v2002_v31 = vmul.f32 %v3013_v7, %v997_v18 }
 0x1a3   :  { %3416 = vst [vmem:[#allocation19_spill] sm:$0xff] %v3037_v8  ;;  %v1447_v24 = vmul.f32 %v2978_v53, %v997_v18  ;;  %v3045_v54 = vmul.f32 %v1610_v59, %v2987_v46  ;;  %v3049_v6 = vmul.f32 %v3037_v8, %v2978_v53  ;;  %v1752_v62 = vmul.f32 %v2978_v53, %v2963_v23 }
 0x1a4   :  { %v1104_v61 = vmul.f32 %v1103_v2, %v2713_v9  ;;  %v1109_v30 = vrot.slane %v1103_v2, 6  ;;  %v1112_v22 = vrot.slane %v1103_v2, 2  ;;  %v2193_v42 = vmov 0.0  }
 0x1a5   :  { %v1387_v3 = vpop.permute.xlu1 %1386  ;;  %3417 = vst [vmem:[#allocation20_spill] sm:$0xff] %v3049_v6  ;;  %v3057_v43 = vsel %vm998_vm9, 1.0, %v2193_v42  ;;  %v3060_v2 = vadd.f32 %v2002_v31, %v2001_v60  ;;  %v1753_v8 = vmul.f32 %v2984_v5, %v997_v18  ;;  %v3064_v7 = vmul.f32 %v1610_v59, %v2978_v53 }
 0x1a6   :  { %v1107_v44 = vsub.f32 %v1104_v61, %v2716_v17  ;;  %v1114_v38 = vmul.f32 %v1112_v22, %v2602_v0  ;;  %v1389_v55 = vadd.f32 %v1387_v3, %v1379_v16  ;;  %v1111_v14 = vmul.f32 %v1109_v30, %v2602_v0 }
 0x1a7   :  { %3418 = vst [vmem:[#allocation21_spill] sm:$0xff] %v3060_v2  ;;  %3419 = vst [vmem:[#allocation22_spill] sm:$0xff] %v3064_v7  ;;  %v1164_v60 = vmul.f32 %v2987_v46, %v2968_v13  ;;  %v3074_v31 = vadd.f32 %v1447_v24, %v1447_v24 }
 0x1a8   :  { %v1116_v23 = vrot.slane %v1114_v38, 6  ;;  %v1128_v17 = vrot.slane %v1107_v44, %v2263_v25  ;;  %v1133_v61 = vrot.slane %v1107_v44, %v2266_v26  ;;  %v1139_v22 = vrot.slane %v1107_v44, %v2269_v27 }
 0x1a9   :  { %v1390_v42 = vmul.f32 %v1389_v55, %v2713_v9  ;;  %v1395_v6 = vrot.slane %v1389_v55, 6  ;;  %v1398_v16 = vrot.slane %v1389_v55, 2  ;;  %v1145_v38 = vrot.slane %v1107_v44, %v2281_v33  ;;  %v1260_v20 = vpop.permute.xlu1 %1259 }
 0x1aa   :  { %v1118_v30 = vadd.f32 %v1116_v23, %v1111_v14  ;;  %v1129_v18 = vmul.f32 %v1128_v17, %v2692_v40  ;;  %v1134_v59 = vmul.f32 %v1133_v61, %v2690_v35  ;;  %v1140_v3 = vmul.f32 %v1139_v22, %v2749_v51 }
 0x1ab   :  { %v1393_v7 = vsub.f32 %v1390_v42, %v2719_v4  ;;  %v1400_v5 = vmul.f32 %v1398_v16, %v2602_v0  ;;  %v3420_v55 = vrot.slane %v2833_v48, 6  ;;  %v1397_v23 = vmul.f32 %v1395_v6, %v2602_v0 }
 0x1ac   :  { %v1135_v13 = vadd.f32 %v1134_v59, %v1129_v18  ;;  %v3083_v14 = vadd.f32 %v1753_v8, %v1752_v62  ;;  %v1262_v6 = vadd.f32 %v1260_v20, %v2999_v37  ;;  %v1165_v18 = vadd.f32 %v1164_v60, %v1164_v60 }
 0x1ad   :  { %v1123_v2 = vadd.f32 %v3420_v55, %v1118_v30  ;;  %v3085_v17 = vpop.eup %2152  ;;  %v1402_v24 = vrot.slane %v1400_v5, 6  ;;  %v1414_v61 = vrot.slane %v1393_v7, %v2263_v25  ;;  %v1419_v44 = vrot.slane %v1393_v7, %v2266_v26 }
 0x1ae   :  { %3421 = vst [vmem:[#allocation23_spill] sm:$0xff] %v3083_v14  ;;  %3422 = vst [vmem:[#allocation24_spill] sm:$0xff] %v3085_v17  ;;  %v1425_v4 = vrot.slane %v1393_v7, %v2269_v27  ;;  %v3423_v22 = vmov %v3420_v55  ;;  %v1141_v16 = vadd.f32 %v1140_v3, %v1135_v13  ;;  %v1457_v30 = vmul.f32 %v2978_v53, %v2991_v39 }
 0x1af   :  { %v1124_v42 = vadd.f32 %v1123_v2, %v3423_v22  ;;  %v1404_v8 = vadd.f32 %v1402_v24, %v1397_v23  ;;  %v1415_v62 = vmul.f32 %v1414_v61, %v2692_v40  ;;  %v1420_v5 = vmul.f32 %v1419_v44, %v2690_v35 }
 0x1b0   :  { %v1004_v59 = vmul.f32 %v3085_v17, %v3085_v17  ;;  %v1146_v55 = vmul.f32 %v1145_v38, %v2782_v12  ;;  %v3424_v2 = vrot.slane %v2852_v47, 6  ;;  %v1426_v20 = vmul.f32 %v1425_v4, %v2749_v51 }
 0x1b1   :  { %v1151_v48 = vrot.slane %v1124_v42, %v2396_v10  ;;  %v1157_v13 = vrot.slane %v1124_v42, %v3410_v28  ;;  %v1421_v3 = vadd.f32 %v1420_v5, %v1415_v62  ;;  %v1431_v37 = vrot.slane %v1393_v7, %v2281_v33  ;;  %v1523_v62 = vpop.permute.xlu1 %1522 }
 0x1b2   :  { %v1409_v39 = vadd.f32 %v3424_v2, %v1404_v8  ;;  %v3107_v23 = vrot.slane %v3085_v17, 1  ;;  %v1147_v60 = vadd.f32 %v1146_v55, %v1141_v16  ;;  %v1263_v38 = vmul.f32 %v1262_v6, %v2713_v9 }
 0x1b3   :  { %v1152_v24 = vmul.f32 %v1151_v48, %v2745_v11  ;;  %v1158_v61 = vmul.f32 %v1157_v13, %v2947_v21  ;;  %v3425_v44 = vmov %v3424_v2  ;;  %v1427_v42 = vadd.f32 %v1426_v20, %v1421_v3 }
 0x1b4   :  { %v1410_v22 = vadd.f32 %v1409_v39, %v3425_v44  ;;  %v1432_v8 = vmul.f32 %v1431_v37, %v2782_v12  ;;  %v1266_v7 = vsub.f32 %v1263_v38, %v2723_v32  ;;  %v1268_v5 = vrot.slane %v1262_v6, 6 }
 0x1b5   :  { %v1153_v4 = vadd.f32 %v1152_v24, %v1147_v60  ;;  %v1271_v2 = vrot.slane %v1262_v6, 2  ;;  %v3116_v14 = vrot.slane %v1004_v59, 1  ;;  %v1005_v16 = vmul.f32 %v3085_v17, %v1004_v59 }
 0x1b6   :  { %v1437_v55 = vrot.slane %v1410_v22, %v2396_v10  ;;  %v1443_v48 = vrot.slane %v1410_v22, %v3410_v28  ;;  %v1433_v47 = vadd.f32 %v1432_v8, %v1427_v42  ;;  %v1288_v3 = vrot.slane %v1266_v7, %v2263_v25 }
 0x1b7   :  { %v1159_v13 = vadd.f32 %v1158_v61, %v1153_v4  ;;  %v1273_v39 = vmul.f32 %v1271_v2, %v2602_v0  ;;  %v1270_v32 = vmul.f32 %v1268_v5, %v2602_v0  ;;  %v1293_v6 = vrot.slane %v1266_v7, %v2266_v26  ;;  %v3129_v61 = vpop.permute.xlu0 %1675  ;;  %v3134_v4 = vpop.permute.xlu1 %1804 }
 0x1b8   :  { %v1438_v20 = vmul.f32 %v1437_v55, %v2745_v11  ;;  %v1299_v37 = vrot.slane %v1266_v7, %v2269_v27  ;;  %v1289_v38 = vmul.f32 %v1288_v3, %v2692_v40  ;;  %v1444_v22 = vmul.f32 %v1443_v48, %v2947_v21 }
 0x1b9   :  { %v1160_v59 = vmul.f32 %v1159_v13, %v3107_v23  ;;  %v1169_v60 = vrot.slane %v1159_v13, 1  ;;  %v1275_v24 = vrot.slane %v1273_v39, 6  ;;  %v1458_v42 = vmul.f32 %v1457_v30, %v2978_v53 }
 0x1ba   :  { %v1439_v44 = vadd.f32 %v1438_v20, %v1433_v47  ;;  %v1294_v8 = vmul.f32 %v1293_v6, %v2690_v35  ;;  %v3137_v2 = vrot.slane %v1005_v16, 1  ;;  %v1166_v13 = vmul.f32 %v1165_v18, %v3116_v14 }
 0x1bb   :  { %v1171_v5 = vmul.f32 %v1169_v60, %v2976_v41  ;;  %v1277_v55 = vadd.f32 %v1275_v24, %v1270_v32  ;;  %v1300_v17 = vmul.f32 %v1299_v37, %v2749_v51  ;;  %v1176_v48 = vmul.f32 %v3010_v50, %v2987_v46  ;;  %v1538_v60 = vpop.permute.xlu0 %1537  ;;  %v3427_v24 = vld [vmem:[#allocation6_spill] sm:$0xff] }
 0x1bc   :  { %v1445_v39 = vadd.f32 %v1444_v22, %v1439_v44  ;;  %v1295_v3 = vadd.f32 %v1294_v8, %v1289_v38  ;;  %v3426_v30 = vrot.slane %v2554_v63, 6  ;;  %v1305_v20 = vrot.slane %v1266_v7, %v2281_v33 }
 0x1bd   :  { %v1172_v53 = vmul.f32 %v1171_v5, %v3116_v14  ;;  %v1167_v6 = vsub.f32 %v1160_v59, %v1166_v13  ;;  %v1449_v18 = vmul.f32 %v3074_v31, %v3116_v14  ;;  %v1525_v37 = vadd.f32 %v1523_v62, %v2970_v1  ;;  %v1930_v5 = vpop.permute.xlu1 %1929 }
 0x1be   :  { %v1282_v47 = vadd.f32 %v3426_v30, %v1277_v55  ;;  %v1446_v16 = vmul.f32 %v1445_v39, %v3107_v23  ;;  %v1452_v32 = vrot.slane %v1445_v39, 1  ;;  %v1301_v50 = vadd.f32 %v1300_v17, %v1295_v3 }
 0x1bf   :  { %v1173_v44 = vsub.f32 %v1167_v6, %v1172_v53  ;;  %v1180_v22 = vmul.f32 %v3137_v2, %v1176_v48  ;;  %v1459_v7 = vmul.f32 %v1458_v42, %v3137_v2  ;;  %v1540_v59 = vadd.f32 %v1538_v60, %v1525_v37  ;;  %v1940_v6 = vpop.permute.xlu0 %1939 }
 0x1c0   :  { %v1284_v38 = vadd.f32 %v3427_v24, %v1282_v47  ;;  %v1450_v63 = vsub.f32 %v1446_v16, %v1449_v18  ;;  %v1454_v8 = vmul.f32 %v1452_v32, %v2976_v41  ;;  %v1306_v55 = vmul.f32 %v1305_v20, %v2782_v12 }
 0x1c1   :  { %v1181_v1 = vadd.f32 %v1180_v22, %v1173_v44  ;;  %v1541_v17 = vmul.f32 %v1540_v59, %v2713_v9  ;;  %v1546_v39 = vrot.slane %v1540_v59, 6  ;;  %v1549_v3 = vrot.slane %v1540_v59, 2 }
 0x1c2   :  { %v1311_v31 = vrot.slane %v1284_v38, %v2396_v10  ;;  %v1317_v13 = vrot.slane %v1284_v38, %v3410_v28  ;;  %v1455_v62 = vmul.f32 %v1454_v8, %v3116_v14  ;;  %v1307_v48 = vadd.f32 %v1306_v55, %v1301_v50 }
 0x1c3   :  { %v1183_v30 = vrot.slane %v1181_v1, 7  ;;  %v1932_v42 = vadd.f32 %v1930_v5, %v3029_v45  ;;  %v1544_v16 = vsub.f32 %v1541_v17, %v2743_v36  ;;  %v1551_v18 = vmul.f32 %v1549_v3, %v2602_v0 }
 0x1c4   :  { %v1312_v53 = vmul.f32 %v1311_v31, %v2745_v11  ;;  %v1456_v47 = vsub.f32 %v1450_v63, %v1455_v62  ;;  %v1318_v20 = vmul.f32 %v1317_v13, %v2947_v21  ;;  %v1548_v37 = vmul.f32 %v1546_v39, %v2602_v0 }
 0x1c5   :  { %v1185_v60 = vmul.f32 %v3057_v43, %v1183_v30  ;;  %v1942_v24 = vadd.f32 %v1940_v6, %v1932_v42  ;;  %v1553_v50 = vrot.slane %v1551_v18, 6  ;;  %v1566_v44 = vrot.slane %v1544_v16, %v2263_v25 }
 0x1c6   :  { %v1313_v32 = vadd.f32 %v1312_v53, %v1307_v48  ;;  %v1460_v38 = vadd.f32 %v1459_v7, %v1456_v47  ;;  %v1571_v45 = vrot.slane %v1544_v16, %v2266_v26  ;;  %v1327_v63 = vmul.f32 %v3018_v15, %v3116_v14  ;;  %v3428_v15 = vld [vmem:[#allocation5_spill] sm:$0xff] }
 0x1c7   :  { %v1577_v36 = vrot.slane %v1544_v16, %v2269_v27  ;;  %v1583_v8 = vrot.slane %v1544_v16, %v2281_v33  ;;  %v1555_v5 = vadd.f32 %v1553_v50, %v1548_v37  ;;  %v1567_v55 = vmul.f32 %v1566_v44, %v2692_v40  ;;  %v3430_v16 = vld [vmem:[#allocation7_spill] sm:$0xff] }
 0x1c8   :  { %v1319_v22 = vadd.f32 %v1318_v20, %v1313_v32  ;;  %v1462_v59 = vrot.slane %v1460_v38, 7  ;;  %v1572_v31 = vmul.f32 %v1571_v45, %v2690_v35  ;;  %v3177_v62 = vadd.f32 0.001, %v1185_v60  ;;  %v3431_v60 = vld [vmem:[#allocation14_spill] sm:$0xff] }
 0x1c9   :  { %v1578_v1 = vmul.f32 %v1577_v36, %v2749_v51  ;;  %v3429_v39 = vrot.slane %v3428_v15, 6  ;;  %v1943_v53 = vmul.f32 %v1942_v24, %v2713_v9  ;;  %v1948_v47 = vrot.slane %v1942_v24, 6 }
 0x1ca   :  { %v1320_v7 = vmul.f32 %v1319_v22, %v3107_v23  ;;  %v1330_v13 = vrot.slane %v1319_v22, 1  ;;  %v1464_v17 = vmul.f32 %v3057_v43, %v1462_v59  ;;  %v1573_v48 = vadd.f32 %v1572_v31, %v1567_v55 }
 0x1cb   :  { %v1560_v3 = vadd.f32 %v3429_v39, %v1555_v5  ;;  %v1951_v20 = vrot.slane %v1942_v24, 2  ;;  %v1946_v37 = vsub.f32 %v1943_v53, %v3431_v60  ;;  %v1336_v50 = vmul.f32 %v3027_v58, %v3137_v2 }
 0x1cc   :  { %v1332_v30 = vmul.f32 %v1330_v13, %v2976_v41  ;;  %v1328_v42 = vsub.f32 %v1320_v7, %v1327_v63  ;;  %v3184_v6 = vadd.f32 0.001, %v1464_v17  ;;  %v1579_v32 = vadd.f32 %v1578_v1, %v1573_v48 }
 0x1cd   :  { %v1562_v18 = vadd.f32 %v3430_v16, %v1560_v3  ;;  %v1584_v44 = vmul.f32 %v1583_v8, %v2782_v12  ;;  %v1953_v45 = vmul.f32 %v1951_v20, %v2602_v0  ;;  %v1950_v36 = vmul.f32 %v1948_v47, %v2602_v0  ;;  %v1691_v3 = vpop.permute.xlu1 %1690 }
 0x1ce   :  { %v1333_v38 = vmul.f32 %v1332_v30, %v3116_v14  ;;  %v3197_v63 = vmul.f32 %v3184_v6, %v3177_v62  ;;  %v1968_v55 = vrot.slane %v1946_v37, %v2263_v25  ;;  %v1973_v58 = vrot.slane %v1946_v37, %v2266_v26 }
 0x1cf   :  { %v1589_v22 = vrot.slane %v1562_v18, %v2396_v10  ;;  %v1595_v24 = vrot.slane %v1562_v18, %v3410_v28  ;;  %v1955_v5 = vrot.slane %v1953_v45, 6  ;;  %v1663_v8 = vadd.f32 %v3002_v34, %v3016_v56  ;;  %v3432_v56 = vld [vmem:[#allocation8_spill] sm:$0xff] }
 0x1d0   :  { %v1334_v59 = vsub.f32 %v1328_v42, %v1333_v38  ;;  %v1585_v31 = vadd.f32 %v1584_v44, %v1579_v32  ;;  %v1979_v13 = vrot.slane %v1946_v37, %v2269_v27  ;;  %v1969_v15 = vmul.f32 %v1968_v55, %v2692_v40  ;;  %v3434_v44 = vld [vmem:[#allocation9_spill] sm:$0xff] }
 0x1d1   :  { %v1590_v7 = vmul.f32 %v1589_v22, %v2745_v11  ;;  %v1957_v17 = vadd.f32 %v1955_v5, %v1950_v36  ;;  %v1974_v39 = vmul.f32 %v1973_v58, %v2690_v35  ;;  %v1678_v48 = vadd.f32 %v3129_v61, %v1663_v8 }
 0x1d2   :  { %v1337_v1 = vadd.f32 %v1336_v50, %v1334_v59  ;;  %v1596_v30 = vmul.f32 %v1595_v24, %v2947_v21  ;;  %v1985_v42 = vrot.slane %v1946_v37, %v2281_v33  ;;  %v3433_v47 = vrot.slane %v3432_v56, 6 }
 0x1d3   :  { %v1591_v53 = vadd.f32 %v1590_v7, %v1585_v31  ;;  %v1975_v16 = vadd.f32 %v1974_v39, %v1969_v15  ;;  %v1980_v18 = vmul.f32 %v1979_v13, %v2749_v51  ;;  %v1795_v60 = vrot.slane %v2879_v57, %v2281_v33  ;;  %v3435_v31 = vld [vmem:[#allocation15_spill] sm:$0xff] }
 0x1d4   :  { %v1339_v34 = vrot.slane %v1337_v1, 7  ;;  %v1962_v20 = vadd.f32 %v3433_v47, %v1957_v17  ;;  %v1693_v38 = vadd.f32 %v1691_v3, %v1678_v48  ;;  %v1791_v61 = vadd.f32 %v2935_v19, %v2945_v52 }
 0x1d5   :  { %v1597_v32 = vadd.f32 %v1596_v30, %v1591_v53  ;;  %v1981_v45 = vadd.f32 %v1980_v18, %v1975_v16  ;;  %v1602_v24 = vmul.f32 %v3031_v29, %v3116_v14  ;;  %v1986_v5 = vmul.f32 %v1985_v42, %v2782_v12 }
 0x1d6   :  { %v3217_v50 = vmul.f32 %v3057_v43, %v1339_v34  ;;  %v1964_v37 = vadd.f32 %v3434_v44, %v1962_v20  ;;  %v1694_v59 = vmul.f32 %v1693_v38, %v2713_v9  ;;  %v1796_v8 = vmul.f32 %v1795_v60, %v2484_v49  ;;  %v1815_v60 = vpop.permute.xlu1 %1814 }
 0x1d7   :  { %v1598_v22 = vmul.f32 %v1597_v32, %v3107_v23  ;;  %v1605_v36 = vrot.slane %v1597_v32, 1  ;;  %v1987_v13 = vadd.f32 %v1986_v5, %v1981_v45  ;;  %v1007_v17 = vrot.slane %v2976_v41, 7 }
 0x1d8   :  { %v3228_v57 = vmul.f32 %v3217_v50, %v3217_v50  ;;  %v1991_v55 = vrot.slane %v1964_v37, %v2396_v10  ;;  %v1997_v19 = vrot.slane %v1964_v37, %v3410_v28  ;;  %v1697_v29 = vsub.f32 %v1694_v59, %v3435_v31 }
 0x1d9   :  { %v1603_v52 = vsub.f32 %v1598_v22, %v1602_v24  ;;  %v1607_v58 = vmul.f32 %v1605_v36, %v2976_v41  ;;  %v1699_v39 = vrot.slane %v1693_v38, 6  ;;  %v1702_v3 = vrot.slane %v1693_v38, 2  ;;  %v3436_v22 = vld [vmem:[#allocation21_spill] sm:$0xff] }
 0x1da   :  { %v2034_v7 = vsub.f32 %v3197_v63, %v3228_v57  ;;  %v1992_v1 = vmul.f32 %v1991_v55, %v2745_v11  ;;  %v1719_v48 = vrot.slane %v1697_v29, %v2263_v25  ;;  %v1797_v53 = vadd.f32 %v1796_v8, %v1791_v61  ;;  %v3438_v55 = vld [vmem:[#allocation10_spill] sm:$0xff] }
 0x1db   :  { %v1608_v15 = vmul.f32 %v1607_v58, %v3116_v14  ;;  %v1998_v49 = vmul.f32 %v1997_v19, %v2947_v21  ;;  %v1724_v42 = vrot.slane %v1697_v29, %v2266_v26  ;;  %v1612_v56 = vmul.f32 %v3045_v54, %v3137_v2 }
 0x1dc   :  { %v1993_v30 = vadd.f32 %v1992_v1, %v1987_v13  ;;  %v1704_v47 = vmul.f32 %v1702_v3, %v2602_v0  ;;  %v1720_v20 = vmul.f32 %v1719_v48, %v2692_v40  ;;  %v1807_v16 = vadd.f32 %v3134_v4, %v1797_v53  ;;  %v3437_v4 = vld [vmem:[#allocation24_spill] sm:$0xff] }
 0x1dd   :  { %v1609_v34 = vsub.f32 %v1603_v52, %v1608_v15  ;;  %v1725_v32 = vmul.f32 %v1724_v42, %v2690_v35  ;;  %v1009_v38 = vmul.f32 %v3057_v43, %v1007_v17  ;;  %v1701_v44 = vmul.f32 %v1699_v39, %v2602_v0  ;;  %v3439_v1 = vld [vmem:[#allocation4_spill] sm:$0xff] }
 0x1de   :  { %v1999_v18 = vadd.f32 %v1998_v49, %v1993_v30  ;;  %v1706_v37 = vrot.slane %v1704_v47, 6  ;;  %v1730_v45 = vrot.slane %v1697_v29, %v2269_v27  ;;  %v2004_v24 = vmul.f32 %v3436_v22, %v3116_v14  ;;  %v3440_v49 = vld [vmem:[#allocation20_spill] sm:$0xff] }
 0x1df   :  { %v3251_v61 = vadd.f32 %v1612_v56, %v1609_v34  ;;  %v1010_v59 = vmul.f32 %v3437_v4, %v1009_v38  ;;  %v1711_v19 = vrot.slane %v3438_v55, 6  ;;  %v1726_v52 = vadd.f32 %v1725_v32, %v1720_v20  ;;  %v3442_v47 = vld [vmem:[#allocation16_spill] sm:$0xff]  ;;  %v3444_v38 = vld [vmem:[#allocation18_spill] sm:$0xff] }
 0x1e0   :  { %v2000_v54 = vmul.f32 %v1999_v18, %v3107_v23  ;;  %v2007_v36 = vrot.slane %v1999_v18, 1  ;;  %v1708_v5 = vadd.f32 %v1706_v37, %v1701_v44  ;;  %v1817_v58 = vadd.f32 %v1815_v60, %v1807_v16  ;;  %v3443_v60 = vld [vmem:[#allocation3_spill] sm:$0xff] }
 0x1e1   :  { %v1736_v13 = vrot.slane %v1697_v29, %v2281_v33  ;;  %v1876_v17 = vmul.f32 %v2987_v46, %v3439_v1  ;;  %2047 = vst [vmem:[%s3349_s2 + $0x1] sm:$0x2] %v1010_v59  ;;  %v1731_v39 = vmul.f32 %v1730_v45, %v2749_v51  ;;  %v2013_v42 = vmul.f32 %v3440_v49, %v3137_v2  ;;  %v3441_v29 = vld [vmem:[#allocation11_spill] sm:$0xff] }
 0x1e2   :  { %v2005_v8 = vsub.f32 %v2000_v54, %v2004_v24  ;;  %v2009_v31 = vmul.f32 %v2007_v36, %v2976_v41  ;;  %v1713_v15 = vadd.f32 %v1711_v19, %v1708_v5  ;;  %v1818_v3 = vmul.f32 %v1817_v58, %v2713_v9 }
 0x1e3   :  { %v1823_v53 = vrot.slane %v1817_v58, 6  ;;  %v1826_v30 = vrot.slane %v1817_v58, 2  ;;  %v1732_v56 = vadd.f32 %v1731_v39, %v1726_v52  ;;  %v1737_v18 = vmul.f32 %v1736_v13, %v2782_v12  ;;  %v3445_v52 = vld [vmem:[#allocation12_spill] sm:$0xff]  ;;  %v3446_v13 = vld [vmem:[#allocation19_spill] sm:$0xff] }
 0x1e4   :  { %v2010_v48 = vmul.f32 %v2009_v31, %v3116_v14  ;;  %v1715_v34 = vadd.f32 %v3441_v29, %v1713_v15  ;;  %v1821_v20 = vsub.f32 %v1818_v3, %v3442_v47  ;;  %v1877_v9 = vmul.f32 %v3444_v38, %v3443_v60 }
 0x1e5   :  { %v1828_v32 = vmul.f32 %v1826_v30, %v2602_v0  ;;  %v1825_v45 = vmul.f32 %v1823_v53, %v2602_v0  ;;  %v1738_v59 = vadd.f32 %v1737_v18, %v1732_v56  ;;  %v1835_v58 = vrot.slane %v3445_v52, 6 }
 0x1e6   :  { %v2011_v16 = vsub.f32 %v2005_v8, %v2010_v48  ;;  %v1742_v44 = vrot.slane %v1715_v34, %v2396_v10  ;;  %v1748_v37 = vrot.slane %v1715_v34, %v3410_v28  ;;  %v1843_v54 = vrot.slane %v1821_v20, %v2263_v25 }
 0x1e7   :  { %v1830_v24 = vrot.slane %v1828_v32, 6  ;;  %v1848_v36 = vrot.slane %v1821_v20, %v2266_v26  ;;  %v1854_v4 = vrot.slane %v1821_v20, %v2269_v27  ;;  %v1878_v31 = vadd.f32 %v1877_v9, %v1876_v17  ;;  %v3450_v9 = vld [vmem:[#allocation2_spill] sm:$0xff] }
 0x1e8   :  { %v3282_v22 = vadd.f32 %v2013_v42, %v2011_v16  ;;  %v1743_v5 = vmul.f32 %v1742_v44, %v2745_v11  ;;  %v1844_v55 = vmul.f32 %v1843_v54, %v2692_v40  ;;  %v1749_v25 = vmul.f32 %v1748_v37, %v2947_v21  ;;  %v3447_v40 = vld [vmem:[#allocation13_spill] sm:$0xff]  ;;  %v3451_v37 = vld [vmem:[#allocation22_spill] sm:$0xff] }
 0x1e9   :  { %v1832_v19 = vadd.f32 %v1830_v24, %v1825_v45  ;;  %v1849_v8 = vmul.f32 %v1848_v36, %v2690_v35  ;;  %v1888_v15 = vmul.f32 %v3446_v13, %v2987_v46  ;;  %v1855_v27 = vmul.f32 %v1854_v4, %v2749_v51  ;;  %v3448_v35 = vld [vmem:[#allocation23_spill] sm:$0xff]  ;;  %v3449_v51 = vld [vmem:[#allocation17_spill] sm:$0xff] }
 0x1ea   :  { %v1744_v0 = vadd.f32 %v1743_v5, %v1738_v59  ;;  %v1860_v3 = vrot.slane %v1821_v20, %v2281_v33  ;;  %v1755_v42 = vmul.f32 %v3448_v35, %v3116_v14  ;;  %v1018_v56 = vmul.f32 %v3449_v51, %v2976_v41 }
 0x1eb   :  { %v1837_v26 = vadd.f32 %v1835_v58, %v1832_v19  ;;  %v1850_v39 = vadd.f32 %v1849_v8, %v1844_v55  ;;  %v1764_v45 = vmul.f32 %v3451_v37, %v3137_v2  ;;  %v1879_v4 = vmul.f32 %v1878_v31, %v3116_v14 }
 0x1ec   :  { %v1750_v48 = vadd.f32 %v1749_v25, %v1744_v0  ;;  %v1861_v17 = vmul.f32 %v1860_v3, %v2782_v12  ;;  %v1022_v18 = vmul.f32 %v3116_v14, %v1018_v56  ;;  %v1032_v19 = vmul.f32 %v3444_v38, %v2976_v41 }
 0x1ed   :  { %v1839_v53 = vadd.f32 %v3447_v40, %v1837_v26  ;;  %v1856_v30 = vadd.f32 %v1855_v27, %v1850_v39  ;;  %v2016_v39 = vrot.slane %v3282_v22, 7  ;;  %v1028_v27 = vmul.f32 %v3107_v23, %v3439_v1 }
 0x1ee   :  { %v1751_v49 = vmul.f32 %v1750_v48, %v3107_v23  ;;  %v1758_v29 = vrot.slane %v1750_v48, 1  ;;  %v1033_v25 = vmul.f32 %v1032_v19, %v3116_v14  ;;  %v1889_v38 = vmul.f32 %v1888_v15, %v3137_v2 }
 0x1ef   :  { %v1866_v46 = vrot.slane %v1839_v53, %v2396_v10  ;;  %v1872_v34 = vrot.slane %v1839_v53, %v3410_v28  ;;  %v1862_v20 = vadd.f32 %v1861_v17, %v1856_v30  ;;  %v1615_v10 = vrot.slane %v3251_v61, 7 }
 0x1f0   :  { %v1756_v33 = vsub.f32 %v1751_v49, %v1755_v42  ;;  %v1760_v47 = vmul.f32 %v1758_v29, %v2976_v41  ;;  %v1014_v28 = vmul.f32 %v3107_v23, %v3450_v9  ;;  %v1034_v40 = vsub.f32 %v1028_v27, %v1033_v25 }
 0x1f1   :  { %v1867_v16 = vmul.f32 %v1866_v46, %v2745_v11  ;;  %v1873_v12 = vmul.f32 %v1872_v34, %v2947_v21  ;;  %v2157_v21 = vld [vmem:[%s3348_s0] sm:$0xf]  ;;  %v1617_v5 = vmul.f32 %v3057_v43, %v1615_v10  ;;  %2154 = vrcp.f32 %v2034_v7 }
 0x1f2   :  { %v1761_v32 = vmul.f32 %v1760_v47, %v3116_v14  ;;  %v1023_v24 = vsub.f32 %v1014_v28, %v1022_v18  ;;  %v2020_v61 = vrot.slane %v2157_v21, 7  ;;  %v1036_v1 = vrot.slane %v1034_v40, 7 }
 0x1f3   :  { %v1868_v60 = vadd.f32 %v1867_v16, %v1862_v20 }
 0x1f4   :  { %v1762_v44 = vsub.f32 %v1756_v33, %v1761_v32  ;;  %v1025_v8 = vrot.slane %v1023_v24, 7  ;;  %v2022_v13 = vmul.f32 %v2020_v61, %v1617_v5  ;;  %v1038_v42 = vmul.f32 %v3057_v43, %v1036_v1 }
 0x1f5   :  { %v1874_v54 = vadd.f32 %v1873_v12, %v1868_v60 }
 0x1f6   :  { %v1765_v36 = vadd.f32 %v1764_v45, %v1762_v44  ;;  %v1027_v48 = vmul.f32 %v3057_v43, %v1025_v8 }
 0x1f7   :  { %v1875_v11 = vmul.f32 %v1874_v54, %v3107_v23  ;;  %v1882_v59 = vrot.slane %v1874_v54, 1 }
 0x1f8   :  { %v1767_v55 = vrot.slane %v1765_v36, 7 }
 0x1f9   :  { %v1880_v52 = vsub.f32 %v1875_v11, %v1879_v4  ;;  %v1884_v58 = vmul.f32 %v1882_v59, %v2976_v41 }
 0x1fa   :  { %v1769_v0 = vmul.f32 %v3057_v43, %v1767_v55 }
 0x1fb   :  { %v1885_v31 = vmul.f32 %v1884_v58, %v3116_v14  ;;  %v2018_v14 = vmul.f32 %v3057_v43, %v2016_v39 }
 0x1fc   :  { %v2023_v26 = vmul.f32 %v2157_v21, %v1769_v0 }
 0x1fd   :  { %v1886_v3 = vsub.f32 %v1880_v52, %v1885_v31  ;;  %v2027_v15 = vmul.f32 %v2157_v21, %v2018_v14 }
 0x1fe   :  { %v2024_v41 = vadd.f32 %v2023_v26, %v2022_v13  ;;  %v2155_v34 = vpop.eup %2154 }
 0x1ff   :  { %v1890_v53 = vadd.f32 %v1889_v38, %v1886_v3 }
 0x200   :  { %v2025_v30 = vsub.f32 %v1027_v48, %v2024_v41 }
 0x201   :  { %v1892_v49 = vrot.slane %v1890_v53, 7 }
 0x202   :  { %v2037_v22 = vmul.f32 %v3184_v6, %v2025_v30  ;;  %v2042_v23 = vmul.f32 %v2025_v30, %v3217_v50 }
 0x203   :  { %v1894_v2 = vmul.f32 %v3057_v43, %v1892_v49 }
 0x205   :  { %v2026_v35 = vmul.f32 %v2020_v61, %v1894_v2 }
 0x207   :  { %v2028_v29 = vadd.f32 %v2027_v15, %v2026_v35 }
 0x209   :  { %v2029_v17 = vsub.f32 %v1038_v42, %v2028_v29 }
 0x20b   :  { %v2038_v46 = vmul.f32 %v2029_v17, %v3217_v50  ;;  %v2041_v63 = vmul.f32 %v3177_v62, %v2029_v17 }
 0x20d   :  { %v2039_v57 = vsub.f32 %v2037_v22, %v2038_v46  ;;  %v2043_v7 = vsub.f32 %v2041_v63, %v2042_v23 }
 0x20f   :  { %v2040_v51 = vmul.f32 %v2155_v34, %v2039_v57  ;;  %v2044_v6 = vmul.f32 %v2155_v34, %v2043_v7 }
 0x211   :  { %2045 = vst [vmem:[%s3349_s2 - $0x1] sm:$0x2] %v2040_v51  ;;  %2046 = vst [vmem:[%s3349_s2] sm:$0x2] %v2044_v6 }

</bundles_post_ra>
